<compile_context>
chip_gen: v7x
topology: tpu7x:2x2x1
jax: 0.10.0
libtpu: 0.0.40
codegen_flags: <defaults>
</compile_context>

<pallas_src>
import functools

import jax
import jax.numpy as jnp
from jax import lax
from jax.experimental import pallas as pl
from jax.experimental.pallas import tpu as pltpu


def _self_attn_kernel(x_ref, a_ref, c_ref, wvt_ref, bv_ref, gamma_ref, out_ref,
                      *, add, n_valid, mm_dtype):
    """One grid step: `bb` batch elements x one query tile.

    x_ref:     (bb, C, n_pad)  features, channels on sublanes, spatial on lanes
    a_ref:     (C, C)          A = Wq @ Wk^T
    c_ref:     (1, C)          c^T, c = Wk @ bq (query-bias term on the key side)
    wvt_ref:   (Cv, C)         value weight, transposed
    bv_ref:    (Cv, 1)         value bias
    gamma_ref: (1, 1)          SMEM scalar
    out_ref:   (bb, Cv, tq)    output tile (queries on lanes -> lane-dense store)
    """
    bb, C, n_pad = x_ref.shape
    tq = out_ref.shape[2]
    gamma = gamma_ref[0, 0]

    if tq == n_pad:
        q0 = 0
    else:
        q0 = pl.multiple_of(pl.program_id(1) * tq, 128)  # tq is a multiple of 128

    # Padded key positions (spatial padding to a lane multiple) must not leak
    # into the softmax denominator: additive mask, built once per grid step.
    if n_valid < n_pad:
        key_ids = lax.broadcasted_iota(jnp.int32, (1, n_pad), 1)
        key_bias = jnp.where(key_ids < n_valid, 0.0, -1e30).astype(jnp.float32)
    else:
        key_bias = None

    for b in range(bb):  # bb is small and static (unrolled)
        x = x_ref[b]                                              # (C, n_pad) f32
        xq = x if tq == n_pad else x_ref[b, :, pl.ds(q0, tq)]     # (C, tq)   f32
        x_mm = x.astype(mm_dtype)

        # Query-side projection with the key-side query bias folded in:
        #   axc[i, :] = x_i^T A + c^T       (A = Wq Wk^T, c = Wk bq)
        # Tiny C x C contraction -> kept in f32.
        axc = lax.dot_general(xq, a_ref[...], (((0,), (0,)), ((), ())),
                              preferred_element_type=jnp.float32) + c_ref[...]   # (tq, C)

        # energy[i, m] = x_i^T A x_m + c . x_m   (terms constant over keys m,
        # including the key bias bk, cancel in the softmax and are dropped).
        energy = jnp.dot(axc.astype(mm_dtype), x_mm,
                         preferred_element_type=jnp.float32)                     # (tq, n_pad)
        if key_bias is not None:
            energy = energy + key_bias

        # Softmax over keys (lane axis); stats stay f32.
        m = jnp.max(energy, axis=-1, keepdims=True)               # (tq, 1)
        p = jnp.exp(energy - m)                                   # (tq, n_pad)
        l = jnp.sum(p, axis=-1, keepdims=True)                    # (tq, 1)
        r = pl.reciprocal(l, approx=True)
        r = r * (2.0 - l * r)                                     # Newton step -> f32 accuracy
        attn = (p * r).astype(mm_dtype)                           # rows sum to 1

        # Value side, re-associated:  out = Wv^T (x @ attn^T) + bv.
        # The (Cv, N) value projection is never materialized; since attn rows
        # are normalized, the bias epilogue is exactly +bv.
        xp = lax.dot_general(x_mm, attn, (((1,), (1,)), ((), ())),
                             preferred_element_type=jnp.float32)                 # (C, tq)
        out = jnp.dot(wvt_ref[...], xp,
                      preferred_element_type=jnp.float32) + bv_ref[...]          # (Cv, tq)

        out = out * gamma
        if add:                                                   # residual (Cv == C)
            out = out + xq
        out_ref[b] = out.astype(out_ref.dtype)


def _vmem_capacity_bytes():
    try:
        return int(pltpu.get_tpu_info().vmem_capacity_bytes)
    except Exception:
        return 64 << 20  # conservative default (v7x-sized VMEM)


def _plan_tiles(N, big_vmem):
    """Query-tile width and padded spatial size (both lane multiples)."""
    lane = 128
    n128 = pl.cdiv(N, lane) * lane
    single_max = 2048 if big_vmem else 1024
    if n128 <= single_max:
        tq = n128
    else:
        tq = 1024 if big_vmem else 256
    n_pad = pl.cdiv(N, tq) * tq
    return tq, n_pad


def _pick_batch_pack(B, C, Cv, n_pad, tq, big_vmem):
    """Batch elements per grid step (only pack small feature maps)."""
    if n_pad >= 2048:
        return 1  # per-step overhead negligible; keep live intermediates small
    per_b = (4 + 2) * C * n_pad + (4 + 4 + 2) * tq * n_pad + 8 * (C + Cv) * tq
    budget = (32 << 20) if big_vmem else (8 << 20)
    bb = max(1, min(B, 8, budget // max(per_b, 1)))
    while B % bb:
        bb -= 1
    return bb


def self_attn_pallas(x_nchw, wq, bq, wk, bk, wv, bv, gamma, *, add=False,
                     matmul_dtype=jnp.bfloat16):
    """SAGAN self-attention forward.

    x_nchw: (B, C, W, H) float32.  Conv-1x1 weights in channel-matmul form
    (Cin, Cout).  bk is accepted for API parity but is mathematically dropped:
    its contribution is constant per query and cancels in the softmax over keys.
    """
    del bk
    B, C, W, H = x_nchw.shape
    N = W * H
    Cv = wv.shape[1]
    if add and Cv != C:
        raise ValueError("add=True requires out_dim == in_dim")

    big_vmem = _vmem_capacity_bytes() >= (96 << 20)
    tq, n_pad = _plan_tiles(N, big_vmem)
    nq = n_pad // tq
    bb = _pick_batch_pack(B, C, Cv, n_pad, tq, big_vmem)
    nb = B // bb

    # NCHW -> (B, C, N): pure reshape (spatial stays on the lane axis).  Pad the
    # spatial axis to a tile multiple if needed (padded keys masked in-kernel,
    # padded query columns sliced off below).
    x_bcn = x_nchw.reshape(B, C, N)
    if n_pad != N:
        x_bcn = jnp.pad(x_bcn, ((0, 0), (0, 0), (0, n_pad - N)))

    # Algebraic fusion of the query/key 1x1 convs (see kernel docstring).
    a_mat = jnp.dot(wq, wk.T)                      # (C, C)  A = Wq Wk^T
    c_row = jnp.dot(wk, bq).reshape(1, C)          # (1, C)  c^T = (Wk bq)^T
    wv_t = wv.T                                    # (Cv, C)
    bv_col = bv.reshape(Cv, 1)
    gamma2d = jnp.reshape(gamma, (1, 1)).astype(jnp.float32)

    kernel = functools.partial(_self_attn_kernel, add=add, n_valid=N,
                               mm_dtype=matmul_dtype)

    cost = pl.CostEstimate(
        flops=2 * B * (C * C * n_pad + 2 * C * n_pad * n_pad + Cv * C * n_pad),
        transcendentals=B * n_pad * n_pad,
        bytes_accessed=4 * (B * C * n_pad + B * Cv * n_pad + C * C + C + Cv * C + Cv),
    )

    weight_bytes = 4 * (C * C + C + Cv * C + Cv)
    x_block = 4 * bb * C * n_pad
    out_block = 4 * bb * Cv * tq
    interm = bb * ((4 + 4 + 2) * tq * n_pad + (4 + 2) * C * n_pad + 8 * (C + Cv) * tq)
    cap = (96 << 20) if big_vmem else (48 << 20)
    vmem_limit = int(min(max(2 * (x_block + out_block) + 2 * weight_bytes
                             + interm + (8 << 20), 32 << 20), cap))

    out_bcn = pl.pallas_call(
        kernel,
        out_shape=jax.ShapeDtypeStruct((B, Cv, n_pad), jnp.float32),
        grid_spec=pltpu.PrefetchScalarGridSpec(
            num_scalar_prefetch=0,
            grid=(nb, nq),
            in_specs=[
                pl.BlockSpec((bb, C, n_pad), lambda b, q: (b, 0, 0)),  # x (resident across q)
                pl.BlockSpec((C, C), lambda b, q: (0, 0)),             # A = Wq Wk^T
                pl.BlockSpec((1, C), lambda b, q: (0, 0)),             # c^T = (Wk bq)^T
                pl.BlockSpec((Cv, C), lambda b, q: (0, 0)),            # Wv^T
                pl.BlockSpec((Cv, 1), lambda b, q: (0, 0)),            # bv
                pl.BlockSpec(memory_space=pltpu.MemorySpace.SMEM),     # gamma (1, 1)
            ],
            out_specs=pl.BlockSpec((bb, Cv, tq), lambda b, q: (b, 0, q)),
        ),
        compiler_params=pltpu.CompilerParams(
            # All (b, q) blocks are independent -> both axes shardable on v7x.
            dimension_semantics=("parallel", "parallel"),
            vmem_limit_bytes=vmem_limit,
        ),
        cost_estimate=cost,
    )(x_bcn, a_mat, c_row, wv_t, bv_col, gamma2d)

    if n_pad != N:
        out_bcn = out_bcn[:, :, :N]
    # (B, Cv, N) -> (B, Cv, W, H): pure reshape, no transpose.
    return out_bcn.reshape(B, Cv, W, H)


def self_attn_ref(x_nchw, wq, bq, wk, bk, wv, bv, gamma, *, add=False):
    """Plain-JAX reference mirroring the PyTorch forward."""
    B, C, W, H = x_nchw.shape
    N = W * H
    x_bcn = x_nchw.reshape(B, C, N)
    q = jnp.einsum("bcn,cd->bnd", x_bcn, wq) + bq            # (B, N, Cq)
    k = jnp.einsum("bcn,cd->bdn", x_bcn, wk) + bk[:, None]   # (B, Cq, N)
    v = jnp.einsum("bcn,cd->bdn", x_bcn, wv) + bv[:, None]   # (B, Cv, N)
    energy = jnp.einsum("bnd,bdm->bnm", q, k)                # (B, N, N)
    attn = jax.nn.softmax(energy, axis=-1)
    out = jnp.einsum("bcn,bmn->bcm", v, attn)                # (B, Cv, N)
    out = out.reshape(B, -1, W, H)
    if add:
        return gamma * out + x_nchw
    return gamma * out


if __name__ == "__main__":
    # Module config: in_dim=32, ratio=8 -> Cq = 4, out_dim = in_dim = 32
    B, C, W, H = 2, 32, 16, 16
    ratio = 8
    Cq = C // ratio
    Cv = C

    key = jax.random.PRNGKey(0)
    kx, kq, kk, kv, kbq, kbk, kbv = jax.random.split(key, 7)

    x = jax.random.normal(kx, (B, C, W, H), dtype=jnp.float32)

    # Conv-1x1 weights in channel-matmul form (Cin, Cout).
    wq = jax.random.normal(kq, (C, Cq), dtype=jnp.float32) * 0.1
    wk = jax.random.normal(kk, (C, Cq), dtype=jnp.float32) * 0.1
    wv = jax.random.normal(kv, (C, Cv), dtype=jnp.float32) * 0.1
    bq = jax.random.normal(kbq, (Cq,), dtype=jnp.float32) * 0.1
    bk = jax.random.normal(kbk, (Cq,), dtype=jnp.float32) * 0.1
    bv = jax.random.normal(kbv, (Cv,), dtype=jnp.float32) * 0.1
    # nn.Parameter(torch.zeros(1)) -> gamma; nonzero here so the test is non-trivial.
    gamma = jnp.array([0.5], dtype=jnp.float32)

    for add in (False, True):
        out = self_attn_pallas(x, wq, bq, wk, bk, wv, bv, gamma, add=add)
        out = jax.block_until_ready(out)
        ref = self_attn_ref(x, wq, bq, wk, bk, wv, bv, gamma, add=add)
        assert out.shape == (B, Cv, W, H)
        # bf16 MXU operands (f32 accumulation) -> slightly looser tolerance than
        # a pure-f32 path; observed error is well below this.
        err = float(jnp.max(jnp.abs(out - ref)))
        assert jnp.allclose(out, ref, atol=1e-2, rtol=1e-2), (
            f"mismatch vs JAX reference (add={add}, max_abs_err={err})")

    print("KERNEL_OK")
</pallas_src>

<mosaic_0001>
module attributes {stable_mosaic.version = 11 : i64} {
  func.func @_self_attn_kernel(%arg0: i32, %arg1: i32, %arg2: memref<2x32x256xf32, #tpu.memory_space<vmem>>, %arg3: memref<32x32xf32, #tpu.memory_space<vmem>>, %arg4: memref<1x32xf32, #tpu.memory_space<vmem>>, %arg5: memref<32x32xf32, #tpu.memory_space<vmem>>, %arg6: memref<32x1xf32, #tpu.memory_space<vmem>>, %arg7: memref<1x1xf32, #tpu.memory_space<smem>>, %arg8: memref<2x32x256xf32, #tpu.memory_space<vmem>>) attributes {dimension_semantics = [#tpu.dimension_semantics<parallel>, #tpu.dimension_semantics<parallel>], iteration_bounds = array<i64: 1, 1>, scalar_prefetch = 0 : i64, scratch_operands = 0 : i64, tpu.core_type = #tpu.core_type<tc>, window_params = [{transform_indices = @transform_0, window_bounds = array<i64: 2, 32, 256>}, {pipeline_mode = #tpu.pipeline_mode<synchronous>, transform_indices = @transform_1, window_bounds = array<i64: 32, 32>}, {pipeline_mode = #tpu.pipeline_mode<synchronous>, transform_indices = @transform_2, window_bounds = array<i64: 1, 32>}, {pipeline_mode = #tpu.pipeline_mode<synchronous>, transform_indices = @transform_3, window_bounds = array<i64: 32, 32>}, {pipeline_mode = #tpu.pipeline_mode<synchronous>, transform_indices = @transform_4, window_bounds = array<i64: 32, 1>}, {transform_indices = @transform_5, window_bounds = array<i64: 1, 1>}, {transform_indices = @transform_6, window_bounds = array<i64: 2, 32, 256>}]} {
    %c0 = arith.constant 0 : index
    %c0_0 = arith.constant 0 : index
    %0 = memref.load %arg7[%c0, %c0_0] : memref<1x1xf32, #tpu.memory_space<smem>>
    %c0_1 = arith.constant 0 : index
    %c0_2 = arith.constant 0 : index
    %c0_3 = arith.constant 0 : index
    %1 = vector.load %arg2[%c0_1, %c0_2, %c0_3] : memref<2x32x256xf32, #tpu.memory_space<vmem>>, vector<1x32x256xf32>
    %2 = vector.shape_cast %1 : vector<1x32x256xf32> to vector<32x256xf32>
    %3 = arith.truncf %2 : vector<32x256xf32> to vector<32x256xbf16>
    %c0_4 = arith.constant 0 : index
    %c0_5 = arith.constant 0 : index
    %4 = vector.load %arg3[%c0_4, %c0_5] : memref<32x32xf32, #tpu.memory_space<vmem>>, vector<32x32xf32>
    %cst = arith.constant dense<0.000000e+00> : vector<256x32xf32>
    %5 = tpu.matmul %2, %4, %cst {dimension_numbers = #tpu.dot_dimension_numbers<[0], [0], [1], [1], [0, 1, 1, 1], [], []>} : vector<32x256xf32>, vector<32x32xf32>, vector<256x32xf32> -> vector<256x32xf32>
    %c0_6 = arith.constant 0 : index
    %c0_7 = arith.constant 0 : index
    %6 = vector.load %arg4[%c0_6, %c0_7] : memref<1x32xf32, #tpu.memory_space<vmem>>, vector<1x32xf32>
    %7 = vector.broadcast %6 : vector<1x32xf32> to vector<256x32xf32>
    %8 = arith.addf %5, %7 : vector<256x32xf32>
    %9 = arith.truncf %8 : vector<256x32xf32> to vector<256x32xbf16>
    %cst_8 = arith.constant dense<0.000000e+00> : vector<256x256xf32>
    %10 = tpu.matmul %9, %3, %cst_8 {dimension_numbers = #tpu.dot_dimension_numbers<[1], [0], [0], [1], [0, 0, 1, 1], [], []>} : vector<256x32xbf16>, vector<32x256xbf16>, vector<256x256xf32> -> vector<256x256xf32>
    %cst_9 = arith.constant dense<0xFF800000> : vector<256xf32>
    %11 = vector.multi_reduction <maximumf>, %10, %cst_9 [1] : vector<256x256xf32> to vector<256xf32>
    %12 = vector.shape_cast %11 : vector<256xf32> to vector<256x1xf32>
    %13 = vector.broadcast %12 : vector<256x1xf32> to vector<256x256xf32>
    %14 = arith.subf %10, %13 : vector<256x256xf32>
    %15 = math.exp %14 : vector<256x256xf32>
    %cst_10 = arith.constant dense<0.000000e+00> : vector<256xf32>
    %16 = vector.multi_reduction <add>, %15, %cst_10 [1] : vector<256x256xf32> to vector<256xf32>
    %17 = vector.shape_cast %16 : vector<256xf32> to vector<256x1xf32>
    %18 = tpu.reciprocal %17 {approx = true} : vector<256x1xf32> -> vector<256x1xf32>
    %19 = arith.mulf %17, %18 : vector<256x1xf32>
    %cst_11 = arith.constant 2.000000e+00 : f32
    %20 = vector.broadcast %cst_11 : f32 to vector<256x1xf32>
    %21 = arith.subf %20, %19 : vector<256x1xf32>
    %22 = arith.mulf %18, %21 : vector<256x1xf32>
    %23 = vector.broadcast %22 : vector<256x1xf32> to vector<256x256xf32>
    %24 = arith.mulf %15, %23 : vector<256x256xf32>
    %25 = arith.truncf %24 : vector<256x256xf32> to vector<256x256xbf16>
    %cst_12 = arith.constant dense<0.000000e+00> : vector<32x256xf32>
    %26 = tpu.matmul %3, %25, %cst_12 {dimension_numbers = #tpu.dot_dimension_numbers<[1], [1], [0], [0], [0, 0, 1, 0], [], []>} : vector<32x256xbf16>, vector<256x256xbf16>, vector<32x256xf32> -> vector<32x256xf32>
    %c0_13 = arith.constant 0 : index
    %c0_14 = arith.constant 0 : index
    %27 = vector.load %arg5[%c0_13, %c0_14] : memref<32x32xf32, #tpu.memory_space<vmem>>, vector<32x32xf32>
    %cst_15 = arith.constant dense<0.000000e+00> : vector<32x256xf32>
    %28 = tpu.matmul %27, %26, %cst_15 {dimension_numbers = #tpu.dot_dimension_numbers<[1], [0], [0], [1], [0, 0, 1, 1], [], []>} : vector<32x32xf32>, vector<32x256xf32>, vector<32x256xf32> -> vector<32x256xf32>
    %c0_16 = arith.constant 0 : index
    %c0_17 = arith.constant 0 : index
    %29 = vector.load %arg6[%c0_16, %c0_17] : memref<32x1xf32, #tpu.memory_space<vmem>>, vector<32x1xf32>
    %30 = vector.broadcast %29 : vector<32x1xf32> to vector<32x256xf32>
    %31 = arith.addf %28, %30 : vector<32x256xf32>
    %32 = vector.broadcast %0 : f32 to vector<32x256xf32>
    %33 = arith.mulf %31, %32 : vector<32x256xf32>
    %c0_18 = arith.constant 0 : index
    %c0_19 = arith.constant 0 : index
    %c0_20 = arith.constant 0 : index
    %34 = vector.load %arg8[%c0_18, %c0_19, %c0_20] : memref<2x32x256xf32, #tpu.memory_space<vmem>>, vector<1x32x256xf32>
    %35 = vector.shape_cast %34 : vector<1x32x256xf32> to vector<32x256xf32>
    %36 = vector.shape_cast %33 : vector<32x256xf32> to vector<1x32x256xf32>
    tpu.vector_store %arg8[%c0_18, %c0_19, %c0_20], %36 {strides = array<i32>} : memref<2x32x256xf32, #tpu.memory_space<vmem>>, vector<1x32x256xf32>,
    %c1 = arith.constant 1 : index
    %c0_21 = arith.constant 0 : index
    %c0_22 = arith.constant 0 : index
    %37 = vector.load %arg2[%c1, %c0_21, %c0_22] : memref<2x32x256xf32, #tpu.memory_space<vmem>>, vector<1x32x256xf32>
    %38 = vector.shape_cast %37 : vector<1x32x256xf32> to vector<32x256xf32>
    %39 = arith.truncf %38 : vector<32x256xf32> to vector<32x256xbf16>
    %c0_23 = arith.constant 0 : index
    %c0_24 = arith.constant 0 : index
    %40 = vector.load %arg3[%c0_23, %c0_24] : memref<32x32xf32, #tpu.memory_space<vmem>>, vector<32x32xf32>
    %cst_25 = arith.constant dense<0.000000e+00> : vector<256x32xf32>
    %41 = tpu.matmul %38, %40, %cst_25 {dimension_numbers = #tpu.dot_dimension_numbers<[0], [0], [1], [1], [0, 1, 1, 1], [], []>} : vector<32x256xf32>, vector<32x32xf32>, vector<256x32xf32> -> vector<256x32xf32>
    %c0_26 = arith.constant 0 : index
    %c0_27 = arith.constant 0 : index
    %42 = vector.load %arg4[%c0_26, %c0_27] : memref<1x32xf32, #tpu.memory_space<vmem>>, vector<1x32xf32>
    %43 = vector.broadcast %42 : vector<1x32xf32> to vector<256x32xf32>
    %44 = arith.addf %41, %43 : vector<256x32xf32>
    %45 = arith.truncf %44 : vector<256x32xf32> to vector<256x32xbf16>
    %cst_28 = arith.constant dense<0.000000e+00> : vector<256x256xf32>
    %46 = tpu.matmul %45, %39, %cst_28 {dimension_numbers = #tpu.dot_dimension_numbers<[1], [0], [0], [1], [0, 0, 1, 1], [], []>} : vector<256x32xbf16>, vector<32x256xbf16>, vector<256x256xf32> -> vector<256x256xf32>
    %cst_29 = arith.constant dense<0xFF800000> : vector<256xf32>
    %47 = vector.multi_reduction <maximumf>, %46, %cst_29 [1] : vector<256x256xf32> to vector<256xf32>
    %48 = vector.shape_cast %47 : vector<256xf32> to vector<256x1xf32>
    %49 = vector.broadcast %48 : vector<256x1xf32> to vector<256x256xf32>
    %50 = arith.subf %46, %49 : vector<256x256xf32>
    %51 = math.exp %50 : vector<256x256xf32>
    %cst_30 = arith.constant dense<0.000000e+00> : vector<256xf32>
    %52 = vector.multi_reduction <add>, %51, %cst_30 [1] : vector<256x256xf32> to vector<256xf32>
    %53 = vector.shape_cast %52 : vector<256xf32> to vector<256x1xf32>
    %54 = tpu.reciprocal %53 {approx = true} : vector<256x1xf32> -> vector<256x1xf32>
    %55 = arith.mulf %53, %54 : vector<256x1xf32>
    %cst_31 = arith.constant 2.000000e+00 : f32
    %56 = vector.broadcast %cst_31 : f32 to vector<256x1xf32>
    %57 = arith.subf %56, %55 : vector<256x1xf32>
    %58 = arith.mulf %54, %57 : vector<256x1xf32>
    %59 = vector.broadcast %58 : vector<256x1xf32> to vector<256x256xf32>
    %60 = arith.mulf %51, %59 : vector<256x256xf32>
    %61 = arith.truncf %60 : vector<256x256xf32> to vector<256x256xbf16>
    %cst_32 = arith.constant dense<0.000000e+00> : vector<32x256xf32>
    %62 = tpu.matmul %39, %61, %cst_32 {dimension_numbers = #tpu.dot_dimension_numbers<[1], [1], [0], [0], [0, 0, 1, 0], [], []>} : vector<32x256xbf16>, vector<256x256xbf16>, vector<32x256xf32> -> vector<32x256xf32>
    %c0_33 = arith.constant 0 : index
    %c0_34 = arith.constant 0 : index
    %63 = vector.load %arg5[%c0_33, %c0_34] : memref<32x32xf32, #tpu.memory_space<vmem>>, vector<32x32xf32>
    %cst_35 = arith.constant dense<0.000000e+00> : vector<32x256xf32>
    %64 = tpu.matmul %63, %62, %cst_35 {dimension_numbers = #tpu.dot_dimension_numbers<[1], [0], [0], [1], [0, 0, 1, 1], [], []>} : vector<32x32xf32>, vector<32x256xf32>, vector<32x256xf32> -> vector<32x256xf32>
    %c0_36 = arith.constant 0 : index
    %c0_37 = arith.constant 0 : index
    %65 = vector.load %arg6[%c0_36, %c0_37] : memref<32x1xf32, #tpu.memory_space<vmem>>, vector<32x1xf32>
    %66 = vector.broadcast %65 : vector<32x1xf32> to vector<32x256xf32>
    %67 = arith.addf %64, %66 : vector<32x256xf32>
    %68 = vector.broadcast %0 : f32 to vector<32x256xf32>
    %69 = arith.mulf %67, %68 : vector<32x256xf32>
    %c1_38 = arith.constant 1 : index
    %c0_39 = arith.constant 0 : index
    %c0_40 = arith.constant 0 : index
    %70 = vector.load %arg8[%c1_38, %c0_39, %c0_40] : memref<2x32x256xf32, #tpu.memory_space<vmem>>, vector<1x32x256xf32>
    %71 = vector.shape_cast %70 : vector<1x32x256xf32> to vector<32x256xf32>
    %72 = vector.shape_cast %69 : vector<32x256xf32> to vector<1x32x256xf32>
    tpu.vector_store %arg8[%c1_38, %c0_39, %c0_40], %72 {strides = array<i32>} : memref<2x32x256xf32, #tpu.memory_space<vmem>>, vector<1x32x256xf32>,
    return
  }
  func.func @transform_0(%arg0: i32, %arg1: i32) -> (i32, i32, i32) {
    %c0_i32 = arith.constant 0 : i32
    %c0_i32_0 = arith.constant 0 : i32
    %c0_i32_1 = arith.constant 0 : i32
    return %arg0, %c0_i32, %c0_i32_0 : i32, i32, i32
  }
  func.func @transform_1(%arg0: i32, %arg1: i32) -> (i32, i32) {
    %c0_i32 = arith.constant 0 : i32
    %c0_i32_0 = arith.constant 0 : i32
    %c0_i32_1 = arith.constant 0 : i32
    return %c0_i32, %c0_i32_0 : i32, i32
  }
  func.func @transform_2(%arg0: i32, %arg1: i32) -> (i32, i32) {
    %c0_i32 = arith.constant 0 : i32
    %c0_i32_0 = arith.constant 0 : i32
    %c0_i32_1 = arith.constant 0 : i32
    return %c0_i32, %c0_i32_0 : i32, i32
  }
  func.func @transform_3(%arg0: i32, %arg1: i32) -> (i32, i32) {
    %c0_i32 = arith.constant 0 : i32
    %c0_i32_0 = arith.constant 0 : i32
    %c0_i32_1 = arith.constant 0 : i32
    return %c0_i32, %c0_i32_0 : i32, i32
  }
  func.func @transform_4(%arg0: i32, %arg1: i32) -> (i32, i32) {
    %c0_i32 = arith.constant 0 : i32
    %c0_i32_0 = arith.constant 0 : i32
    %c0_i32_1 = arith.constant 0 : i32
    return %c0_i32, %c0_i32_0 : i32, i32
  }
  func.func @transform_5(%arg0: i32, %arg1: i32) -> (i32, i32) {
    %c0_i32 = arith.constant 0 : i32
    %c0_i32_0 = arith.constant 0 : i32
    %c0_i32_1 = arith.constant 0 : i32
    return %c0_i32, %c0_i32_0 : i32, i32
  }
  func.func @transform_6(%arg0: i32, %arg1: i32) -> (i32, i32, i32) {
    %c0_i32 = arith.constant 0 : i32
    %c0_i32_0 = arith.constant 0 : i32
    return %arg0, %c0_i32, %arg1 : i32, i32, i32
  }
}

</mosaic_0001>

<bundles_post_ra>
// kernel: tpu_custom_call.1
= control target key start
LH: loop header
LB: loop body
LE: loop exit
PB: predicated region body
PF: predicated region fallthrough
CT: control target
= control target key end

     0   :  { %12 = vsyncpa [#allocation4], 0  ;;  %s5343_s0 = inlined_call_operand.hbm [shape: f32[2,32,256], index: 0, kind: input, shape index: {}]   ;;  %s5344_s1 = inlined_call_operand.vmem [shape: f32[32,32], index: 1, kind: input, shape index: {}]   ;;  %s5345_s2 = inlined_call_operand.vmem [shape: f32[1,32], index: 2, kind: input, shape index: {}]   ;;  %s5346_s3 = inlined_call_operand.hbm [shape: f32[32,32], index: 3, kind: input, shape index: {}]   ;;  %s5347_s4 = inlined_call_operand.vmem [shape: f32[32,1], index: 4, kind: input, shape index: {}]   ;;  %s5348_s5 = inlined_call_operand.<no memory space> [shape: f32[1,1], index: 5, kind: input, shape index: {}]   ;;  %s5349_s6 = inlined_call_operand.hbm [shape: f32[2,32,256], index: 6, kind: output, shape index: {}]  }
   0x1   :  { %13 = vsyncpa [#allocation7], 0 }
   0x2   :  { %14 = vsyncpa [#allocation5], 0  ;;  %s3808_s21 = smov [#allocation3]   ;;  %s3736_s25 = scalar_lea.hbm %s5343_s0, 2048 }
   0x3   :  { %s20_s22 = sshll.u32 %s3808_s21, 4  ;;  %p3737_p0 = scmp.ne.s32.totalorder %s5343_s0, %s3736_s25  ;;  %s21_s22 = int_to_ptr.vmem [resolvable:$true] %s20_s22 }
   0x4   :  { %p3740_p1 = scmp.lt.u32.totalorder %s3736_s25, %s5343_s0 }
   0x6   :  { %p3742_p2 = pnand %p3740_p1, %p3737_p0 }
   0x8   :  { %3745 = shalt.err (!%p3742_p2)
}
   0x9   :  { %s3746_s30 = scalar_lea.vmem %s21_s22, 2048  ;;  %p3751_p4 = scmp.lt.s32.totalorder %s21_s22, %s21_s22 }
   0xa   :  { %p3747_p3 = scmp.ne.s32.totalorder %s21_s22, %s3746_s30  ;;  %p3752_p5 = scmp.lt.s32.totalorder %s3746_s30, %s3746_s30 }
   0xc   :  { %p3753_p6 = por %p3752_p5, %p3751_p4 }
   0xe   :  { %p3754_p7 = pnand %p3753_p6, %p3747_p3 }
  0x10   :  { %3757 = shalt.err (!%p3754_p7)
}
  0x11   :  { %s3809_s7 = smov 256   ;;  %s3810_s8 = smov 16  }
  0x12   :  { %26 = dma.hbm_to_vmem [thread:$0]  %s5343_s0, 2048, %s21_s22, [#allocation4], %s3809_s7, %s3809_s7, %s3810_s8  }
  0x13   :  { %s3811_s11 = smov [#allocation6]   ;;  %s3758_s15 = scalar_lea.hbm %s5346_s3, 512 }
  0x14   :  { %s36_s12 = sshll.u32 %s3811_s11, 4  ;;  %p3759_p8 = scmp.ne.s32.totalorder %s5346_s3, %s3758_s15  ;;  %s37_s12 = int_to_ptr.vmem [resolvable:$true] %s36_s12 }
  0x15   :  { %p3762_p9 = scmp.lt.u32.totalorder %s3758_s15, %s5346_s3 }
  0x17   :  { %p3764_p10 = pnand %p3762_p9, %p3759_p8 }
  0x19   :  { %3767 = shalt.err (!%p3764_p10)
}
  0x1a   :  { %s3768_s20 = scalar_lea.vmem %s37_s12, 512  ;;  %p3773_p12 = scmp.lt.s32.totalorder %s37_s12, %s37_s12 }
  0x1b   :  { %p3769_p11 = scmp.ne.s32.totalorder %s37_s12, %s3768_s20  ;;  %p3774_p13 = scmp.lt.s32.totalorder %s3768_s20, %s3768_s20 }
  0x1d   :  { %p3775_p0 = por %p3774_p13, %p3773_p12 }
  0x1f   :  { %p3776_p1 = pnand %p3775_p0, %p3769_p11 }
  0x21   :  { %3779 = shalt.err (!%p3776_p1)
}
  0x22   :  { %s3812_s0 = smov 128   ;;  %s3813_s21 = smov 8  }
  0x23   :  { %42 = dma.hbm_to_vmem [thread:$0]  %s5346_s3, 512, %s37_s12, [#allocation7], %s3812_s0, %s3812_s0, %s3813_s21  }
  0x24   :  { %3802 = dma.done.wait [#allocation4], 2048  }
  0x25   :  { %3803 = vsyncadd [#allocation4], 4294965248 }
  0x26   :  { %3804 = dma.done.wait [#allocation7], 512  }
  0x27   :  { %3805 = vsyncadd [#allocation7], 4294966784  ;;  %v55_v0 = vld [vmem:[#allocation3] sm:$0xff]  ;;  %v57_v1 = vld [vmem:[#allocation3 + $0x10] sm:$0xff]  ;;  %vm142_vm0 = vcmask 261120   ;;  %v5350_v50 = vmov 0  }
  0x28   :  { %v59_v2 = vld [vmem:[#allocation3 + $0x20] sm:$0xff]  ;;  %78 = vxpose.xlu0.b32.start [1/4] (short) %v55_v0, 128  ;;  %v61_v3 = vld [vmem:[#allocation3 + $0x30] sm:$0xff]  ;;  %v56_v4 = vld [vmem:[#allocation3 + $0x8] sm:$0xff]  ;;  %v3897_v17 = vpack.c.bf16 %v57_v1, %v55_v0  ;;  %560 = vmatprep.mubr.bf16.mxu1 %v5350_v50 }
  0x29   :  { %v58_v5 = vld [vmem:[#allocation3 + $0x18] sm:$0xff]  ;;  %v3879_v6 = vpack.c.bf16 %v61_v3, %v59_v2  ;;  %110 = vxpose.xlu1.b32.start [1/4] (short) %v56_v4, 128  ;;  %v60_v7 = vld [vmem:[#allocation3 + $0x28] sm:$0xff]  ;;  %v67_v9 = vld [vmem:[%s5344_s1] sm:$0xff] }
  0x2a   :  { %v62_v8 = vld [vmem:[#allocation3 + $0x38] sm:$0xff]  ;;  %v68_v11 = vld [vmem:[%s5344_s1 + $0x8] sm:$0xff]  ;;  %v69_v12 = vld [vmem:[%s5344_s1 + $0x10] sm:$0xff]  ;;  %v3895_v16 = vpack.c.bf16 %v58_v5, %v56_v4  ;;  %5421 = vst [vmem:[#allocation14_spill] sm:$0xff] %v3897_v17 }
  0x2b   :  { %5419 = vst [vmem:[#allocation12_spill] sm:$0xff] %v3879_v6  ;;  %v3884_v10 = vpack.c.bf16 %v62_v8, %v60_v7  ;;  %v70_v13 = vld [vmem:[%s5344_s1 + $0x18] sm:$0xff]  ;;  %v3309_v14 = vpack.c.bf16 %v68_v11, %v67_v9  ;;  %v3940_v51 = vld [vmem:[%s5345_s2] ss:$0 sm:$0xff] }
  0x2c   :  { %v3313_v15 = vpack.c.bf16 %v70_v13, %v69_v12  ;;  %79 = vxpose.xlu0.b32.cont [2/4] (short) %v57_v1, 128  ;;  %528 = vmatprep.subr.bf16.mxu1 %v3895_v16 }
  0x2d   :  { %5420 = vst [vmem:[#allocation13_spill] sm:$0xff] %v3884_v10  ;;  %111 = vxpose.xlu1.b32.cont [2/4] (short) %v58_v5, 128  ;;  %3310 = vmatprep.subr.bf16.mxu0 %v3309_v14 }
  0x2e   :  { %3312 = vmatpush3.bf16.msra.mxu0 %v3309_v14  ;;  %529 = vmatpush1.bf16.msra.mxu1 %v3897_v17 }
  0x2f   :  { %3314 = vmatprep.subr.bf16.mxu0 %v3313_v15  ;;  %530 = vmatprep.subr.bf16.mxu1 %v3884_v10 }
  0x30   :  { %80 = vxpose.xlu0.b32.cont [3/4] (short) %v59_v2, 128 }
  0x31   :  { %112 = vxpose.xlu1.b32.cont [3/4] (short) %v60_v7, 128 }
  0x32   :  { %3316 = vmatpush3.bf16.msra.mxu0 %v3313_v15  ;;  %531 = vmatpush1.bf16.msra.mxu1 %v3879_v6 }
  0x34   :  { %81 = vxpose.xlu0.b32.end [4/4] (short) %v61_v3, 128 }
  0x35   :  { %113 = vxpose.xlu1.b32.end [4/4] (short) %v62_v8, 128 }
  0xa8   :  { %v94_v18 = vpop.trf.xlu0 }
  0xa9   :  { %3205 = vmatprep.mubr.msk.f32.mxu0 %vm142_vm0, %v94_v18  ;;  %v126_v19 = vpop.trf.xlu1 }
  0xac   :  { %v95_v20 = vpop.trf.xlu0 }
  0xad   :  { %3206 = vmatmul.mubr.msk.f32.vlgmr.msra.gmra.mrb[0].mxu0 %vm142_vm0, %v95_v20  ;;  %v127_v22 = vpop.trf.xlu1 }
  0xb0   :  { %v96_v21 = vpop.trf.xlu0 }
  0xb1   :  { %3208 = vmatprep.mubr.msk.f32.mxu0 %vm142_vm0, %v96_v21  ;;  %v128_v24 = vpop.trf.xlu1 }
  0xb4   :  { %v97_v23 = vpop.trf.xlu0 }
  0xb5   :  { %3209 = vmatmul.mubr.msk.f32.gmra.mrb[2].mxu0 %vm142_vm0, %v97_v23  ;;  %v129_v27 = vpop.trf.xlu1 }
  0xb8   :  { %v98_v25 = vpop.trf.xlu0 }
  0xb9   :  { %3211 = vmatprep.mubr.msk.f32.mxu0 %vm142_vm0, %v98_v25  ;;  %v130_v29 = vpop.trf.xlu1 }
  0xbc   :  { %v99_v26 = vpop.trf.xlu0 }
  0xbd   :  { %3212 = vmatmul.mubr.msk.f32.gmra.mrb[4].mxu0 %vm142_vm0, %v99_v26  ;;  %v131_v32 = vpop.trf.xlu1 }
  0xc0   :  { %v100_v28 = vpop.trf.xlu0 }
  0xc1   :  { %3214 = vmatprep.mubr.msk.f32.mxu0 %vm142_vm0, %v100_v28  ;;  %v132_v34 = vpop.trf.xlu1 }
  0xc4   :  { %v101_v30 = vpop.trf.xlu0 }
  0xc5   :  { %3215 = vmatmul.mubr.msk.f32.gmra.mrb[6].mxu0 %vm142_vm0, %v101_v30  ;;  %v133_v37 = vpop.trf.xlu1 }
  0xc8   :  { %v102_v31 = vpop.trf.xlu0 }
  0xc9   :  { %3217 = vmatprep.mubr.msk.f32.mxu0 %vm142_vm0, %v102_v31  ;;  %v134_v39 = vpop.trf.xlu1 }
  0xcc   :  { %v103_v33 = vpop.trf.xlu0 }
  0xcd   :  { %3218 = vmatmul.mubr.msk.f32.gmra.mrb[8].mxu0 %vm142_vm0, %v103_v33  ;;  %v135_v41 = vpop.trf.xlu1 }
  0xd0   :  { %v104_v35 = vpop.trf.xlu0 }
  0xd1   :  { %3220 = vmatprep.mubr.msk.f32.mxu0 %vm142_vm0, %v104_v35  ;;  %v136_v44 = vpop.trf.xlu1 }
  0xd4   :  { %v105_v36 = vpop.trf.xlu0 }
  0xd5   :  { %3221 = vmatmul.mubr.msk.f32.gmra.mrb[10].mxu0 %vm142_vm0, %v105_v36  ;;  %v137_v45 = vpop.trf.xlu1 }
  0xd8   :  { %v106_v38 = vpop.trf.xlu0 }
  0xd9   :  { %3223 = vmatprep.mubr.msk.f32.mxu0 %vm142_vm0, %v106_v38  ;;  %v138_v46 = vpop.trf.xlu1 }
  0xdc   :  { %v107_v40 = vpop.trf.xlu0 }
  0xdd   :  { %3224 = vmatmul.mubr.msk.f32.gmra.mrb[12].mxu0 %vm142_vm0, %v107_v40  ;;  %v139_v47 = vpop.trf.xlu1 }
  0xe0   :  { %v108_v42 = vpop.trf.xlu0 }
  0xe1   :  { %3226 = vmatprep.mubr.msk.f32.mxu0 %vm142_vm0, %v108_v42  ;;  %v140_v48 = vpop.trf.xlu1 }
  0xe4   :  { %v109_v43 = vpop.trf.xlu0 }
  0xe5   :  { %3227 = vmatmul.mubr.msk.f32.gmra.mrb[14].mxu0 %vm142_vm0, %v109_v43  ;;  %v141_v49 = vpop.trf.xlu1 }
  0xe6   :  { %3229 = vmatprep.mubr.msk.f32.mxu0 %vm142_vm0, %v126_v19 }
  0xe9   :  { %3230 = vmatmul.mubr.msk.f32.gmra.mrb[16].mxu0 %vm142_vm0, %v127_v22 }
  0xea   :  { %3232 = vmatprep.mubr.msk.f32.mxu0 %vm142_vm0, %v128_v24 }
  0xed   :  { %3233 = vmatmul.mubr.msk.f32.gmra.mrb[18].mxu0 %vm142_vm0, %v129_v27 }
  0xee   :  { %3235 = vmatprep.mubr.msk.f32.mxu0 %vm142_vm0, %v130_v29 }
  0xf1   :  { %3236 = vmatmul.mubr.msk.f32.gmra.mrb[20].mxu0 %vm142_vm0, %v131_v32 }
  0xf2   :  { %3238 = vmatprep.mubr.msk.f32.mxu0 %vm142_vm0, %v132_v34 }
  0xf5   :  { %3239 = vmatmul.mubr.msk.f32.gmra.mrb[22].mxu0 %vm142_vm0, %v133_v37 }
  0xf6   :  { %3241 = vmatprep.mubr.msk.f32.mxu0 %vm142_vm0, %v134_v39 }
  0xf9   :  { %3242 = vmatmul.mubr.msk.f32.gmra.mrb[24].mxu0 %vm142_vm0, %v135_v41 }
  0xfa   :  { %3244 = vmatprep.mubr.msk.f32.mxu0 %vm142_vm0, %v136_v44 }
  0xfd   :  { %3245 = vmatmul.mubr.msk.f32.gmra.mrb[26].mxu0 %vm142_vm0, %v137_v45 }
  0xfe   :  { %3247 = vmatprep.mubr.msk.f32.mxu0 %vm142_vm0, %v138_v46 }
 0x101   :  { %3248 = vmatmul.mubr.msk.f32.gmra.mrb[28].mxu0 %vm142_vm0, %v139_v47 }
 0x102   :  { %3250 = vmatprep.mubr.msk.f32.mxu0 %vm142_vm0, %v140_v48 }
 0x105   :  { %3251 = vmatmul.mubr.msk.f32.gmra.mrb[30].mxu0 %vm142_vm0, %v141_v49 }
 0x106   :  { %1361 = vmatprep.mubr.bf16.mxu0 %v3895_v16 }
 0x180   :  { %v3207_v52 = vpop.f32.mrb[0].mxu0 }
 0x181   :  { %v311_v53 = vadd.f32 %v3207_v52, %v3940_v51  ;;  %v305_v54 = vpop.f32.mrb[1].mxu0 }
 0x182   :  { %v306_v55 = vadd.f32 %v3940_v51, %v305_v54 }
 0x184   :  { %v464_v56 = vpack.c.bf16 %v311_v53, %v306_v55 }
 0x186   :  { %3052 = vmatmul.mubr.msk.bf16.vlgmr.msra.gmra.mrb[0].mxu1 %vm142_vm0, %v464_v56 }
 0x187   :  { %570 = vmatprep.mubr.bf16.mxu1 %v5350_v50 }
 0x188   :  { %v3210_v57 = vpop.f32.mrb[2].mxu0 }
 0x189   :  { %v321_v58 = vadd.f32 %v3210_v57, %v3940_v51  ;;  %v315_v59 = vpop.f32.mrb[3].mxu0 }
 0x18a   :  { %v316_v60 = vadd.f32 %v3940_v51, %v315_v59 }
 0x18c   :  { %v465_v61 = vpack.c.bf16 %v321_v58, %v316_v60 }
 0x18e   :  { %3053 = vmatmul.mubr.msk.bf16.gmra.mrb[4].mxu1 %vm142_vm0, %v465_v61 }
 0x18f   :  { %580 = vmatprep.mubr.bf16.mxu1 %v5350_v50 }
 0x190   :  { %v3213_v62 = vpop.f32.mrb[4].mxu0 }
 0x191   :  { %v331_v63 = vadd.f32 %v3213_v62, %v3940_v51  ;;  %v325_v0 = vpop.f32.mrb[5].mxu0 }
 0x192   :  { %v326_v1 = vadd.f32 %v3940_v51, %v325_v0 }
 0x194   :  { %v466_v2 = vpack.c.bf16 %v331_v63, %v326_v1 }
 0x196   :  { %3054 = vmatmul.mubr.msk.bf16.gmra.mrb[8].mxu1 %vm142_vm0, %v466_v2 }
 0x197   :  { %590 = vmatprep.mubr.bf16.mxu1 %v5350_v50 }
 0x198   :  { %v3216_v3 = vpop.f32.mrb[6].mxu0 }
 0x199   :  { %v341_v4 = vadd.f32 %v3216_v3, %v3940_v51  ;;  %v335_v5 = vpop.f32.mrb[7].mxu0 }
 0x19a   :  { %v336_v7 = vadd.f32 %v3940_v51, %v335_v5 }
 0x19c   :  { %v467_v8 = vpack.c.bf16 %v341_v4, %v336_v7 }
 0x19e   :  { %3055 = vmatmul.mubr.msk.bf16.gmra.mrb[12].mxu1 %vm142_vm0, %v467_v8 }
 0x19f   :  { %600 = vmatprep.mubr.bf16.mxu1 %v5350_v50 }
 0x1a0   :  { %v3219_v9 = vpop.f32.mrb[8].mxu0 }
 0x1a1   :  { %v351_v11 = vadd.f32 %v3219_v9, %v3940_v51  ;;  %v345_v12 = vpop.f32.mrb[9].mxu0 }
 0x1a2   :  { %v346_v13 = vadd.f32 %v3940_v51, %v345_v12 }
 0x1a4   :  { %v468_v14 = vpack.c.bf16 %v351_v11, %v346_v13 }
 0x1a6   :  { %3056 = vmatmul.mubr.msk.bf16.gmra.mrb[16].mxu1 %vm142_vm0, %v468_v14 }
 0x1a7   :  { %610 = vmatprep.mubr.bf16.mxu1 %v5350_v50 }
 0x1a8   :  { %v3222_v15 = vpop.f32.mrb[10].mxu0 }
 0x1a9   :  { %v361_v16 = vadd.f32 %v3222_v15, %v3940_v51  ;;  %v355_v18 = vpop.f32.mrb[11].mxu0 }
 0x1aa   :  { %v356_v19 = vadd.f32 %v3940_v51, %v355_v18 }
 0x1ac   :  { %v469_v20 = vpack.c.bf16 %v361_v16, %v356_v19 }
 0x1ae   :  { %3057 = vmatmul.mubr.msk.bf16.gmra.mrb[20].mxu1 %vm142_vm0, %v469_v20 }
 0x1af   :  { %620 = vmatprep.mubr.bf16.mxu1 %v5350_v50 }
 0x1b0   :  { %v3225_v21 = vpop.f32.mrb[12].mxu0 }
 0x1b1   :  { %v371_v22 = vadd.f32 %v3225_v21, %v3940_v51  ;;  %v365_v23 = vpop.f32.mrb[13].mxu0 }
 0x1b2   :  { %v366_v24 = vadd.f32 %v3940_v51, %v365_v23 }
 0x1b4   :  { %v470_v25 = vpack.c.bf16 %v371_v22, %v366_v24 }
 0x1b6   :  { %3058 = vmatmul.mubr.msk.bf16.gmra.mrb[24].mxu1 %vm142_vm0, %v470_v25 }
 0x1b7   :  { %630 = vmatprep.mubr.bf16.mxu1 %v5350_v50 }
 0x1b8   :  { %v3228_v26 = vpop.f32.mrb[14].mxu0 }
 0x1b9   :  { %v381_v27 = vadd.f32 %v3228_v26, %v3940_v51  ;;  %v375_v28 = vpop.f32.mrb[15].mxu0 }
 0x1ba   :  { %v376_v29 = vadd.f32 %v3940_v51, %v375_v28 }
 0x1bc   :  { %v471_v30 = vpack.c.bf16 %v381_v27, %v376_v29  ;;  %v3231_v31 = vpop.f32.mrb[16].mxu0 }
 0x1bd   :  { %v391_v32 = vadd.f32 %v3231_v31, %v3940_v51  ;;  %v385_v33 = vpop.f32.mrb[17].mxu0 }
 0x1be   :  { %3059 = vmatmul.mubr.msk.bf16.gmra.mrb[28].mxu1 %vm142_vm0, %v471_v30  ;;  %v386_v34 = vadd.f32 %v3940_v51, %v385_v33 }
 0x1bf   :  { %640 = vmatprep.mubr.bf16.mxu1 %v5350_v50 }
 0x1c0   :  { %v472_v35 = vpack.c.bf16 %v391_v32, %v386_v34  ;;  %v3234_v36 = vpop.f32.mrb[18].mxu0 }
 0x1c1   :  { %v401_v37 = vadd.f32 %v3234_v36, %v3940_v51  ;;  %v395_v38 = vpop.f32.mrb[19].mxu0 }
 0x1c2   :  { %v396_v39 = vadd.f32 %v3940_v51, %v395_v38 }
 0x1c4   :  { %v473_v40 = vpack.c.bf16 %v401_v37, %v396_v39  ;;  %v3237_v41 = vpop.f32.mrb[20].mxu0 }
 0x1c5   :  { %v411_v42 = vadd.f32 %v3237_v41, %v3940_v51  ;;  %v405_v43 = vpop.f32.mrb[21].mxu0 }
 0x1c6   :  { %3060 = vmatmul.mubr.msk.bf16.gmra.mrb[32].mxu1 %vm142_vm0, %v472_v35  ;;  %v406_v44 = vadd.f32 %v3940_v51, %v405_v43 }
 0x1c7   :  { %650 = vmatprep.mubr.bf16.mxu1 %v5350_v50 }
 0x1c8   :  { %v474_v45 = vpack.c.bf16 %v411_v42, %v406_v44  ;;  %v3240_v46 = vpop.f32.mrb[22].mxu0 }
 0x1c9   :  { %v421_v47 = vadd.f32 %v3240_v46, %v3940_v51  ;;  %v415_v48 = vpop.f32.mrb[23].mxu0 }
 0x1ca   :  { %v416_v49 = vadd.f32 %v3940_v51, %v415_v48 }
 0x1cc   :  { %v475_v52 = vpack.c.bf16 %v421_v47, %v416_v49  ;;  %v3243_v53 = vpop.f32.mrb[24].mxu0 }
 0x1cd   :  { %v431_v54 = vadd.f32 %v3243_v53, %v3940_v51  ;;  %v425_v55 = vpop.f32.mrb[25].mxu0 }
 0x1ce   :  { %3061 = vmatmul.mubr.msk.bf16.gmra.mrb[36].mxu1 %vm142_vm0, %v473_v40  ;;  %v426_v56 = vadd.f32 %v3940_v51, %v425_v55 }
 0x1cf   :  { %660 = vmatprep.mubr.bf16.mxu1 %v5350_v50 }
 0x1d0   :  { %v476_v57 = vpack.c.bf16 %v431_v54, %v426_v56  ;;  %v3246_v58 = vpop.f32.mrb[26].mxu0 }
 0x1d1   :  { %v441_v59 = vadd.f32 %v3246_v58, %v3940_v51  ;;  %v435_v60 = vpop.f32.mrb[27].mxu0 }
 0x1d2   :  { %v436_v61 = vadd.f32 %v3940_v51, %v435_v60 }
 0x1d4   :  { %v477_v62 = vpack.c.bf16 %v441_v59, %v436_v61  ;;  %v3249_v63 = vpop.f32.mrb[28].mxu0 }
 0x1d5   :  { %v451_v0 = vadd.f32 %v3249_v63, %v3940_v51  ;;  %v445_v1 = vpop.f32.mrb[29].mxu0 }
 0x1d6   :  { %3062 = vmatmul.mubr.msk.bf16.gmra.mrb[40].mxu1 %vm142_vm0, %v474_v45  ;;  %v446_v2 = vadd.f32 %v3940_v51, %v445_v1 }
 0x1d7   :  { %670 = vmatprep.mubr.bf16.mxu1 %v5350_v50 }
 0x1d8   :  { %v478_v3 = vpack.c.bf16 %v451_v0, %v446_v2  ;;  %v3252_v4 = vpop.f32.mrb[30].mxu0 }
 0x1d9   :  { %v461_v5 = vadd.f32 %v3252_v4, %v3940_v51  ;;  %v455_v7 = vpop.f32.mrb[31].mxu0 }
 0x1da   :  { %v456_v8 = vadd.f32 %v3940_v51, %v455_v7 }
 0x1dc   :  { %v479_v9 = vpack.c.bf16 %v461_v5, %v456_v8 }
 0x1de   :  { %3063 = vmatmul.mubr.msk.bf16.gmra.mrb[44].mxu1 %vm142_vm0, %v475_v52 }
 0x1df   :  { %680 = vmatprep.mubr.bf16.mxu1 %v5350_v50 }
 0x1e6   :  { %3064 = vmatmul.mubr.msk.bf16.gmra.mrb[48].mxu1 %vm142_vm0, %v476_v57 }
 0x1e7   :  { %690 = vmatprep.mubr.bf16.mxu1 %v5350_v50 }
 0x1ee   :  { %3065 = vmatmul.mubr.msk.bf16.gmra.mrb[52].mxu1 %vm142_vm0, %v477_v62 }
 0x1ef   :  { %700 = vmatprep.mubr.bf16.mxu1 %v5350_v50 }
 0x1f6   :  { %3066 = vmatmul.mubr.msk.bf16.gmra.mrb[56].mxu1 %vm142_vm0, %v478_v3 }
 0x1f7   :  { %710 = vmatprep.mubr.bf16.mxu1 %v5350_v50 }
 0x1fe   :  { %3067 = vmatmul.mubr.msk.bf16.gmra.mrb[60].mxu1 %vm142_vm0, %v479_v9 }
 0x259   :  { %v4005_v51 = vpop.f32.mrb[0].mxu1 }
 0x25a   :  { %v4007_v11 = vpop.f32.mrb[1].mxu1 }
 0x25b   :  { %v4009_v12 = vpop.f32.mrb[2].mxu1  ;;  %v721_v13 = vmax.f32 %v4005_v51, %v4007_v11 }
 0x25c   :  { %v4013_v14 = vpop.f32.mrb[3].mxu1 }
 0x25d   :  { %722 = vmax.xlane.f32.xlu0 %v721_v13  ;;  %v724_v15 = vmax.f32 %v4009_v12, %v4013_v14 }
 0x25f   :  { %725 = vmax.xlane.f32.xlu1 %v724_v15 }
 0x261   :  { %v4017_v16 = vpop.f32.mrb[4].mxu1 }
 0x262   :  { %v4019_v18 = vpop.f32.mrb[5].mxu1 }
 0x263   :  { %v4021_v19 = vpop.f32.mrb[6].mxu1  ;;  %v727_v20 = vmax.f32 %v4017_v16, %v4019_v18 }
 0x264   :  { %v4025_v21 = vpop.f32.mrb[7].mxu1 }
 0x265   :  { %728 = vmax.xlane.f32.xlu1 %v727_v20  ;;  %v730_v22 = vmax.f32 %v4021_v19, %v4025_v21 }
 0x269   :  { %731 = vmax.xlane.f32.xlu1 %v730_v22  ;;  %v4029_v23 = vpop.f32.mrb[8].mxu1 }
 0x26a   :  { %v4031_v24 = vpop.f32.mrb[9].mxu1 }
 0x26b   :  { %v4033_v25 = vpop.f32.mrb[10].mxu1  ;;  %v733_v26 = vmax.f32 %v4029_v23, %v4031_v24 }
 0x26c   :  { %v4037_v27 = vpop.f32.mrb[11].mxu1 }
 0x26d   :  { %734 = vmax.xlane.f32.xlu0 %v733_v26  ;;  %v736_v28 = vmax.f32 %v4033_v25, %v4037_v27 }
 0x26f   :  { %737 = vmax.xlane.f32.xlu1 %v736_v28 }
 0x271   :  { %v4041_v29 = vpop.f32.mrb[12].mxu1 }
 0x272   :  { %v4043_v30 = vpop.f32.mrb[13].mxu1 }
 0x273   :  { %v4045_v31 = vpop.f32.mrb[14].mxu1  ;;  %v739_v32 = vmax.f32 %v4041_v29, %v4043_v30 }
 0x274   :  { %v4049_v33 = vpop.f32.mrb[15].mxu1 }
 0x275   :  { %740 = vmax.xlane.f32.xlu0 %v739_v32  ;;  %v742_v34 = vmax.f32 %v4045_v31, %v4049_v33 }
 0x277   :  { %743 = vmax.xlane.f32.xlu1 %v742_v34 }
 0x279   :  { %v4053_v35 = vpop.f32.mrb[16].mxu1 }
 0x27a   :  { %v4055_v36 = vpop.f32.mrb[17].mxu1 }
 0x27b   :  { %v4057_v37 = vpop.f32.mrb[18].mxu1  ;;  %v745_v38 = vmax.f32 %v4053_v35, %v4055_v36 }
 0x27c   :  { %v4061_v39 = vpop.f32.mrb[19].mxu1 }
 0x27d   :  { %746 = vmax.xlane.f32.xlu0 %v745_v38  ;;  %v748_v40 = vmax.f32 %v4057_v37, %v4061_v39 }
 0x27f   :  { %749 = vmax.xlane.f32.xlu1 %v748_v40 }
 0x281   :  { %v4065_v41 = vpop.f32.mrb[20].mxu1 }
 0x282   :  { %v4067_v42 = vpop.f32.mrb[21].mxu1 }
 0x283   :  { %v4069_v43 = vpop.f32.mrb[22].mxu1  ;;  %v751_v44 = vmax.f32 %v4065_v41, %v4067_v42 }
 0x284   :  { %v4073_v45 = vpop.f32.mrb[23].mxu1 }
 0x285   :  { %752 = vmax.xlane.f32.xlu0 %v751_v44  ;;  %v754_v46 = vmax.f32 %v4069_v43, %v4073_v45 }
 0x287   :  { %755 = vmax.xlane.f32.xlu1 %v754_v46 }
 0x289   :  { %v4077_v47 = vpop.f32.mrb[24].mxu1 }
 0x28a   :  { %v4079_v48 = vpop.f32.mrb[25].mxu1 }
 0x28b   :  { %v4081_v49 = vpop.f32.mrb[26].mxu1  ;;  %v757_v52 = vmax.f32 %v4077_v47, %v4079_v48 }
 0x28c   :  { %v4085_v53 = vpop.f32.mrb[27].mxu1 }
 0x28d   :  { %758 = vmax.xlane.f32.xlu0 %v757_v52  ;;  %v760_v54 = vmax.f32 %v4081_v49, %v4085_v53 }
 0x28f   :  { %761 = vmax.xlane.f32.xlu1 %v760_v54 }
 0x291   :  { %v4089_v55 = vpop.f32.mrb[28].mxu1 }
 0x292   :  { %v4091_v56 = vpop.f32.mrb[29].mxu1 }
 0x293   :  { %v4093_v57 = vpop.f32.mrb[30].mxu1  ;;  %v763_v58 = vmax.f32 %v4089_v55, %v4091_v56 }
 0x294   :  { %v4097_v59 = vpop.f32.mrb[31].mxu1 }
 0x295   :  { %764 = vmax.xlane.f32.xlu0 %v763_v58  ;;  %v766_v60 = vmax.f32 %v4093_v57, %v4097_v59 }
 0x297   :  { %767 = vmax.xlane.f32.xlu1 %v766_v60 }
 0x299   :  { %v4101_v61 = vpop.f32.mrb[32].mxu1 }
 0x29a   :  { %v4103_v62 = vpop.f32.mrb[33].mxu1 }
 0x29b   :  { %v4105_v63 = vpop.f32.mrb[34].mxu1  ;;  %v769_v0 = vmax.f32 %v4101_v61, %v4103_v62 }
 0x29c   :  { %v4109_v1 = vpop.f32.mrb[35].mxu1 }
 0x29d   :  { %5422 = vst [vmem:[#allocation15_spill] sm:$0xff] %v4109_v1  ;;  %770 = vmax.xlane.f32.xlu0 %v769_v0  ;;  %v772_v2 = vmax.f32 %v4105_v63, %v4109_v1 }
 0x29f   :  { %773 = vmax.xlane.f32.xlu1 %v772_v2 }
 0x2a1   :  { %v4113_v3 = vpop.f32.mrb[36].mxu1 }
 0x2a2   :  { %5423 = vst [vmem:[#allocation16_spill] sm:$0xff] %v4113_v3  ;;  %v4115_v4 = vpop.f32.mrb[37].mxu1 }
 0x2a3   :  { %5424 = vst [vmem:[#allocation17_spill] sm:$0xff] %v4115_v4  ;;  %v4117_v5 = vpop.f32.mrb[38].mxu1  ;;  %v775_v7 = vmax.f32 %v4113_v3, %v4115_v4 }
 0x2a4   :  { %5425 = vst [vmem:[#allocation18_spill] sm:$0xff] %v4117_v5  ;;  %v4121_v8 = vpop.f32.mrb[39].mxu1 }
 0x2a5   :  { %5426 = vst [vmem:[#allocation19_spill] sm:$0xff] %v4121_v8  ;;  %776 = vmax.xlane.f32.xlu0 %v775_v7  ;;  %v778_v9 = vmax.f32 %v4117_v5, %v4121_v8 }
 0x2a7   :  { %779 = vmax.xlane.f32.xlu1 %v778_v9 }
 0x2a9   :  { %v4125_v13 = vpop.f32.mrb[40].mxu1 }
 0x2aa   :  { %5427 = vst [vmem:[#allocation20_spill] sm:$0xff] %v4125_v13  ;;  %v4127_v15 = vpop.f32.mrb[41].mxu1 }
 0x2ab   :  { %5428 = vst [vmem:[#allocation21_spill] sm:$0xff] %v4127_v15  ;;  %v4129_v20 = vpop.f32.mrb[42].mxu1  ;;  %v781_v22 = vmax.f32 %v4125_v13, %v4127_v15 }
 0x2ac   :  { %5429 = vst [vmem:[#allocation22_spill] sm:$0xff] %v4129_v20  ;;  %v4133_v26 = vpop.f32.mrb[43].mxu1 }
 0x2ad   :  { %5430 = vst [vmem:[#allocation23_spill] sm:$0xff] %v4133_v26  ;;  %782 = vmax.xlane.f32.xlu0 %v781_v22  ;;  %v784_v28 = vmax.f32 %v4129_v20, %v4133_v26 }
 0x2af   :  { %785 = vmax.xlane.f32.xlu1 %v784_v28 }
 0x2b1   :  { %v4137_v32 = vpop.f32.mrb[44].mxu1 }
 0x2b2   :  { %5431 = vst [vmem:[#allocation24_spill] sm:$0xff] %v4137_v32  ;;  %v4139_v34 = vpop.f32.mrb[45].mxu1 }
 0x2b3   :  { %5432 = vst [vmem:[#allocation25_spill] sm:$0xff] %v4139_v34  ;;  %v4141_v38 = vpop.f32.mrb[46].mxu1  ;;  %v787_v40 = vmax.f32 %v4137_v32, %v4139_v34 }
 0x2b4   :  { %5433 = vst [vmem:[#allocation26_spill] sm:$0xff] %v4141_v38  ;;  %v4145_v44 = vpop.f32.mrb[47].mxu1 }
 0x2b5   :  { %5434 = vst [vmem:[#allocation27_spill] sm:$0xff] %v4145_v44  ;;  %788 = vmax.xlane.f32.xlu0 %v787_v40  ;;  %v790_v46 = vmax.f32 %v4141_v38, %v4145_v44 }
 0x2b7   :  { %791 = vmax.xlane.f32.xlu1 %v790_v46 }
 0x2b9   :  { %v4149_v52 = vpop.f32.mrb[48].mxu1 }
 0x2ba   :  { %v4151_v54 = vpop.f32.mrb[49].mxu1 }
 0x2bb   :  { %v4153_v58 = vpop.f32.mrb[50].mxu1 }
 0x2bc   :  { %v4157_v0 = vpop.f32.mrb[51].mxu1 }
 0x2c1   :  { %v4161_v7 = vpop.f32.mrb[52].mxu1 }
 0x2c2   :  { %v4163_v9 = vpop.f32.mrb[53].mxu1 }
 0x2c3   :  { %v4165_v22 = vpop.f32.mrb[54].mxu1 }
 0x2c4   :  { %v4169_v40 = vpop.f32.mrb[55].mxu1 }
 0x2c9   :  { %v4173_v50 = vpop.f32.mrb[56].mxu1 }
 0x2ca   :  { %v4175_v60 = vpop.f32.mrb[57].mxu1 }
 0x2cb   :  { %v4177_v6 = vpop.f32.mrb[58].mxu1 }
 0x2cc   :  { %v4181_v10 = vpop.f32.mrb[59].mxu1 }
 0x2d1   :  { %v4185_v28 = vpop.f32.mrb[60].mxu1 }
 0x2d2   :  { %v4187_v44 = vpop.f32.mrb[61].mxu1 }
 0x2d3   :  { %v4189_v38 = vpop.f32.mrb[62].mxu1 }
 0x2d4   :  { %v4193_v34 = vpop.f32.mrb[63].mxu1 }
 0x2ea   :  { %v723_v2 = vpop.xlane.xlu0 %722 }
 0x2eb   :  { %v817_v26 = vsub.f32 %v4005_v51, %v723_v2  ;;  %v818_v20 = vsub.f32 %v4007_v11, %v723_v2 }
 0x2ec   :  { %v726_v17 = vpop.xlane.xlu1 %725 }
 0x2ed   :  { %v881_v15 = vmul.f32 1.442695, %v817_v26  ;;  %v883_v13 = vmul.f32 1.442695, %v818_v20  ;;  %v819_v8 = vsub.f32 %v4009_v12, %v726_v17  ;;  %v820_v5 = vsub.f32 %v4013_v14, %v726_v17 }
 0x2ef   :  { %3352 = vpow2.f32 %v881_v15  ;;  %v885_v4 = vmul.f32 1.442695, %v819_v8  ;;  %v887_v46 = vmul.f32 1.442695, %v820_v5 }
 0x2f0   :  { %3354 = vpow2.f32 %v883_v13 }
 0x2f1   :  { %3356 = vpow2.f32 %v885_v4 }
 0x2f2   :  { %3358 = vpow2.f32 %v887_v46  ;;  %v729_v3 = vpop.xlane.xlu1 %728 }
 0x2f3   :  { %v821_v32 = vsub.f32 %v4017_v16, %v729_v3  ;;  %v822_v51 = vsub.f32 %v4019_v18, %v729_v3 }
 0x2f5   :  { %v889_v1 = vmul.f32 1.442695, %v821_v32  ;;  %v891_v11 = vmul.f32 1.442695, %v822_v51 }
 0x2f6   :  { %v732_v2 = vpop.xlane.xlu1 %731 }
 0x2f7   :  { %3360 = vpow2.f32 %v889_v1  ;;  %v823_v20 = vsub.f32 %v4021_v19, %v732_v2  ;;  %v824_v12 = vsub.f32 %v4025_v21, %v732_v2 }
 0x2f8   :  { %3362 = vpow2.f32 %v891_v11  ;;  %v5435_v11 = vmax.f32 %v4149_v52, %v4151_v54 }
 0x2f9   :  { %v4205_v17 = vpop.eup %3352  ;;  %v893_v14 = vmul.f32 1.442695, %v823_v20  ;;  %v895_v5 = vmul.f32 1.442695, %v824_v12 }
 0x2fa   :  { %v4207_v4 = vpop.eup %3354  ;;  %v735_v8 = vpop.xlane.xlu0 %734 }
 0x2fb   :  { %v4209_v13 = vpop.eup %3356  ;;  %3364 = vpow2.f32 %v893_v14  ;;  %v825_v16 = vsub.f32 %v4029_v23, %v735_v8  ;;  %v826_v18 = vsub.f32 %v4031_v24, %v735_v8  ;;  %v1009_v19 = vadd.f32 %v4207_v4, %v4205_v17 }
 0x2fc   :  { %v4215_v1 = vpop.eup %3358  ;;  %3366 = vpow2.f32 %v895_v5  ;;  %v738_v21 = vpop.xlane.xlu1 %737  ;;  %v5436_v14 = vmax.f32 %v4153_v58, %v4157_v0 }
 0x2fd   :  { %v897_v3 = vmul.f32 1.442695, %v825_v16  ;;  %v899_v15 = vmul.f32 1.442695, %v826_v18  ;;  %v827_v26 = vsub.f32 %v4033_v25, %v738_v21  ;;  %v828_v32 = vsub.f32 %v4037_v27, %v738_v21  ;;  %1010 = vadd.xlane.f32.xlu0 %v1009_v19 }
 0x2fe   :  { %v1012_v46 = vadd.f32 %v4215_v1, %v4209_v13 }
 0x2ff   :  { %3368 = vpow2.f32 %v897_v3  ;;  %v901_v23 = vmul.f32 1.442695, %v827_v26  ;;  %v903_v24 = vmul.f32 1.442695, %v828_v32  ;;  %v5437_v32 = vmax.f32 %v4161_v7, %v4163_v9 }
 0x300   :  { %3370 = vpow2.f32 %v899_v15  ;;  %1013 = vadd.xlane.f32.xlu1 %v1012_v46 }
 0x301   :  { %v4221_v51 = vpop.eup %3360  ;;  %3372 = vpow2.f32 %v901_v23  ;;  %794 = vmax.xlane.f32.xlu0 %v5435_v11 }
 0x302   :  { %v4226_v2 = vpop.eup %3362  ;;  %3374 = vpow2.f32 %v903_v24  ;;  %v741_v25 = vpop.xlane.xlu0 %740 }
 0x303   :  { %v829_v27 = vsub.f32 %v4041_v29, %v741_v25  ;;  %v830_v20 = vsub.f32 %v4043_v30, %v741_v25  ;;  %v1015_v12 = vadd.f32 %v4226_v2, %v4221_v51 }
 0x304   :  { %797 = vmax.xlane.f32.xlu1 %v5436_v14  ;;  %v744_v5 = vpop.xlane.xlu1 %743 }
 0x305   :  { %v4235_v8 = vpop.eup %3364  ;;  %v905_v16 = vmul.f32 1.442695, %v829_v27  ;;  %v907_v18 = vmul.f32 1.442695, %v830_v20  ;;  %v831_v19 = vsub.f32 %v4045_v31, %v744_v5  ;;  %v832_v21 = vsub.f32 %v4049_v33, %v744_v5  ;;  %1016 = vadd.xlane.f32.xlu0 %v1015_v12 }
 0x306   :  { %v4239_v29 = vpop.eup %3366 }
 0x307   :  { %3376 = vpow2.f32 %v905_v16  ;;  %v909_v30 = vmul.f32 1.442695, %v831_v19  ;;  %v911_v3 = vmul.f32 1.442695, %v832_v21  ;;  %v1018_v15 = vadd.f32 %v4239_v29, %v4235_v8 }
 0x308   :  { %3378 = vpow2.f32 %v907_v18  ;;  %v5438_v16 = vmax.f32 %v4165_v22, %v4169_v40 }
 0x309   :  { %v4243_v26 = vpop.eup %3368  ;;  %3380 = vpow2.f32 %v909_v30  ;;  %1019 = vadd.xlane.f32.xlu1 %v1018_v15  ;;  %800 = vmax.xlane.f32.xlu0 %v5437_v32 }
 0x30a   :  { %v4248_v31 = vpop.eup %3370  ;;  %3382 = vpow2.f32 %v911_v3  ;;  %v747_v33 = vpop.xlane.xlu0 %746 }
 0x30b   :  { %v4250_v46 = vpop.eup %3372  ;;  %v833_v23 = vsub.f32 %v4053_v35, %v747_v33  ;;  %v834_v24 = vsub.f32 %v4055_v36, %v747_v33  ;;  %v1021_v11 = vadd.f32 %v4248_v31, %v4243_v26 }
 0x30c   :  { %v4256_v25 = vpop.eup %3374  ;;  %v750_v27 = vpop.xlane.xlu1 %749 }
 0x30d   :  { %v913_v20 = vmul.f32 1.442695, %v833_v23  ;;  %v915_v12 = vmul.f32 1.442695, %v834_v24  ;;  %v835_v14 = vsub.f32 %v4057_v37, %v750_v27  ;;  %v836_v5 = vsub.f32 %v4061_v39, %v750_v27  ;;  %1022 = vadd.xlane.f32.xlu0 %v1021_v11  ;;  %803 = vmax.xlane.f32.xlu1 %v5438_v16 }
 0x30e   :  { %v1024_v18 = vadd.f32 %v4256_v25, %v4250_v46  ;;  %v5439_v37 = vmax.f32 %v4173_v50, %v4175_v60 }
 0x30f   :  { %3384 = vpow2.f32 %v913_v20  ;;  %v917_v35 = vmul.f32 1.442695, %v835_v14  ;;  %v919_v36 = vmul.f32 1.442695, %v836_v5 }
 0x310   :  { %3386 = vpow2.f32 %v915_v12  ;;  %v5440_v12 = vmax.f32 %v4177_v6, %v4181_v10 }
 0x311   :  { %v4265_v19 = vpop.eup %3376  ;;  %3388 = vpow2.f32 %v917_v35  ;;  %1025 = vadd.xlane.f32.xlu1 %v1024_v18  ;;  %806 = vmax.xlane.f32.xlu0 %v5439_v37 }
 0x312   :  { %v4270_v39 = vpop.eup %3378  ;;  %3390 = vpow2.f32 %v919_v36  ;;  %v753_v21 = vpop.xlane.xlu0 %752 }
 0x313   :  { %v4272_v30 = vpop.eup %3380  ;;  %v837_v3 = vsub.f32 %v4065_v41, %v753_v21  ;;  %v838_v15 = vsub.f32 %v4067_v42, %v753_v21  ;;  %v1027_v32 = vadd.f32 %v4270_v39, %v4265_v19 }
 0x314   :  { %v4278_v33 = vpop.eup %3382  ;;  %v756_v23 = vpop.xlane.xlu1 %755 }
 0x315   :  { %v921_v24 = vmul.f32 1.442695, %v837_v3  ;;  %v923_v11 = vmul.f32 1.442695, %v838_v15  ;;  %v839_v27 = vsub.f32 %v4069_v43, %v756_v23  ;;  %v840_v20 = vsub.f32 %v4073_v45, %v756_v23  ;;  %1028 = vadd.xlane.f32.xlu0 %v1027_v32  ;;  %809 = vmax.xlane.f32.xlu1 %v5440_v12 }
 0x316   :  { %v1030_v14 = vadd.f32 %v4278_v33, %v4272_v30  ;;  %v5441_v43 = vmax.f32 %v4185_v28, %v4187_v44 }
 0x317   :  { %3392 = vpow2.f32 %v921_v24  ;;  %v925_v41 = vmul.f32 1.442695, %v839_v27  ;;  %v927_v42 = vmul.f32 1.442695, %v840_v20 }
 0x318   :  { %3394 = vpow2.f32 %v923_v11  ;;  %v5442_v11 = vmax.f32 %v4189_v38, %v4193_v34 }
 0x319   :  { %v4287_v5 = vpop.eup %3384  ;;  %3396 = vpow2.f32 %v925_v41  ;;  %1031 = vadd.xlane.f32.xlu1 %v1030_v14  ;;  %812 = vmax.xlane.f32.xlu0 %v5441_v43 }
 0x31a   :  { %v4292_v45 = vpop.eup %3386  ;;  %3398 = vpow2.f32 %v927_v42  ;;  %v759_v16 = vpop.xlane.xlu0 %758 }
 0x31b   :  { %v4294_v35 = vpop.eup %3388  ;;  %v841_v36 = vsub.f32 %v4077_v47, %v759_v16  ;;  %v842_v18 = vsub.f32 %v4079_v48, %v759_v16  ;;  %v1033_v37 = vadd.f32 %v4292_v45, %v4287_v5 }
 0x31c   :  { %v4300_v21 = vpop.eup %3390  ;;  %v762_v3 = vpop.xlane.xlu1 %761 }
 0x31d   :  { %v929_v15 = vmul.f32 1.442695, %v841_v36  ;;  %v931_v32 = vmul.f32 1.442695, %v842_v18  ;;  %v843_v23 = vsub.f32 %v4081_v49, %v762_v3  ;;  %v844_v24 = vsub.f32 %v4085_v53, %v762_v3  ;;  %1034 = vadd.xlane.f32.xlu0 %v1033_v37  ;;  %815 = vmax.xlane.f32.xlu1 %v5442_v11 }
 0x31e   :  { %v1036_v27 = vadd.f32 %v4300_v21, %v4294_v35 }
 0x31f   :  { %3400 = vpow2.f32 %v929_v15  ;;  %v933_v47 = vmul.f32 1.442695, %v843_v23  ;;  %v935_v48 = vmul.f32 1.442695, %v844_v24 }
 0x320   :  { %3402 = vpow2.f32 %v931_v32 }
 0x321   :  { %v4309_v20 = vpop.eup %3392  ;;  %3404 = vpow2.f32 %v933_v47  ;;  %1037 = vadd.xlane.f32.xlu1 %v1036_v27 }
 0x322   :  { %v4311_v12 = vpop.eup %3394  ;;  %3406 = vpow2.f32 %v935_v48  ;;  %v765_v49 = vpop.xlane.xlu0 %764 }
 0x323   :  { %v4313_v53 = vpop.eup %3396  ;;  %v845_v41 = vsub.f32 %v4089_v55, %v765_v49  ;;  %v846_v42 = vsub.f32 %v4091_v56, %v765_v49  ;;  %v1039_v14 = vadd.f32 %v4311_v12, %v4309_v20 }
 0x324   :  { %v4319_v43 = vpop.eup %3398  ;;  %v768_v16 = vpop.xlane.xlu1 %767 }
 0x325   :  { %v937_v36 = vmul.f32 1.442695, %v845_v41  ;;  %v939_v18 = vmul.f32 1.442695, %v846_v42  ;;  %v847_v37 = vsub.f32 %v4093_v57, %v768_v16  ;;  %v848_v3 = vsub.f32 %v4097_v59, %v768_v16  ;;  %1040 = vadd.xlane.f32.xlu0 %v1039_v14  ;;  %v5443_v14 = vld [vmem:[#allocation15_spill] sm:$0xff] }
 0x326   :  { %v1042_v15 = vadd.f32 %v4319_v43, %v4313_v53 }
 0x327   :  { %3408 = vpow2.f32 %v937_v36  ;;  %v941_v55 = vmul.f32 1.442695, %v847_v37  ;;  %v943_v32 = vmul.f32 1.442695, %v848_v3 }
 0x328   :  { %3410 = vpow2.f32 %v939_v18  ;;  %1043 = vadd.xlane.f32.xlu1 %v1042_v15 }
 0x329   :  { %v4325_v56 = vpop.eup %3400  ;;  %3412 = vpow2.f32 %v941_v55 }
 0x32a   :  { %v4327_v23 = vpop.eup %3402  ;;  %3414 = vpow2.f32 %v943_v32  ;;  %v771_v24 = vpop.xlane.xlu0 %770  ;;  %v5447_v32 = vld [vmem:[#allocation17_spill] sm:$0xff] }
 0x32b   :  { %v4329_v11 = vpop.eup %3404  ;;  %v849_v57 = vsub.f32 %v4101_v61, %v771_v24  ;;  %v850_v59 = vsub.f32 %v4103_v62, %v771_v24  ;;  %v1045_v47 = vadd.f32 %v4327_v23, %v4325_v56 }
 0x32c   :  { %v4335_v48 = vpop.eup %3406  ;;  %v774_v27 = vpop.xlane.xlu1 %773 }
 0x32d   :  { %v945_v49 = vmul.f32 1.442695, %v849_v57  ;;  %v947_v41 = vmul.f32 1.442695, %v850_v59  ;;  %v851_v42 = vsub.f32 %v4105_v63, %v774_v27  ;;  %v852_v16 = vsub.f32 %v5443_v14, %v774_v27  ;;  %1046 = vadd.xlane.f32.xlu0 %v1045_v47  ;;  %v5446_v63 = vld [vmem:[#allocation16_spill] sm:$0xff]  ;;  %v5450_v14 = vld [vmem:[#allocation19_spill] sm:$0xff] }
 0x32e   :  { %v1048_v36 = vadd.f32 %v4335_v48, %v4329_v11 }
 0x32f   :  { %3416 = vpow2.f32 %v945_v49  ;;  %v949_v61 = vmul.f32 1.442695, %v851_v42  ;;  %v951_v18 = vmul.f32 1.442695, %v852_v16 }
 0x330   :  { %3418 = vpow2.f32 %v947_v41  ;;  %1049 = vadd.xlane.f32.xlu1 %v1048_v36  ;;  %v5449_v41 = vld [vmem:[#allocation18_spill] sm:$0xff] }
 0x331   :  { %v4341_v62 = vpop.eup %3408  ;;  %3420 = vpow2.f32 %v949_v61 }
 0x332   :  { %5444 = vst [vmem:[#allocation15_spill] sm:$0xff] %v4341_v62  ;;  %v4343_v37 = vpop.eup %3410  ;;  %3422 = vpow2.f32 %v951_v18  ;;  %v777_v3 = vpop.xlane.xlu0 %776 }
 0x333   :  { %v4345_v15 = vpop.eup %3412  ;;  %v853_v55 = vsub.f32 %v5446_v63, %v777_v3  ;;  %v854_v24 = vsub.f32 %v5447_v32, %v777_v3  ;;  %v1051_v57 = vadd.f32 %v4343_v37, %v4341_v62  ;;  %v5458_v62 = vld [vmem:[#allocation23_spill] sm:$0xff] }
 0x334   :  { %5445 = vst [vmem:[#allocation28_spill] sm:$0xff] %v4345_v15  ;;  %v4351_v59 = vpop.eup %3414  ;;  %v780_v47 = vpop.xlane.xlu1 %779 }
 0x335   :  { %5448 = vst [vmem:[#allocation16_spill] sm:$0xff] %v4351_v59  ;;  %v953_v27 = vmul.f32 1.442695, %v853_v55  ;;  %v955_v49 = vmul.f32 1.442695, %v854_v24  ;;  %v855_v42 = vsub.f32 %v5449_v41, %v780_v47  ;;  %v856_v16 = vsub.f32 %v5450_v14, %v780_v47  ;;  %1052 = vadd.xlane.f32.xlu0 %v1051_v57  ;;  %v5454_v24 = vld [vmem:[#allocation20_spill] sm:$0xff] }
 0x336   :  { %v1054_v36 = vadd.f32 %v4351_v59, %v4345_v15  ;;  %v5455_v57 = vld [vmem:[#allocation21_spill] sm:$0xff] }
 0x337   :  { %3424 = vpow2.f32 %v953_v27  ;;  %v957_v61 = vmul.f32 1.442695, %v855_v42  ;;  %v959_v18 = vmul.f32 1.442695, %v856_v16 }
 0x338   :  { %3426 = vpow2.f32 %v955_v49  ;;  %1055 = vadd.xlane.f32.xlu1 %v1054_v36  ;;  %v5457_v36 = vld [vmem:[#allocation22_spill] sm:$0xff] }
 0x339   :  { %v4357_v3 = vpop.eup %3416  ;;  %3428 = vpow2.f32 %v957_v61 }
 0x33a   :  { %5451 = vst [vmem:[#allocation17_spill] sm:$0xff] %v4357_v3  ;;  %v4359_v63 = vpop.eup %3418  ;;  %3430 = vpow2.f32 %v959_v18  ;;  %v783_v55 = vpop.xlane.xlu0 %782 }
 0x33b   :  { %5452 = vst [vmem:[#allocation18_spill] sm:$0xff] %v4359_v63  ;;  %v4361_v32 = vpop.eup %3420  ;;  %v857_v47 = vsub.f32 %v5454_v24, %v783_v55  ;;  %v858_v41 = vsub.f32 %v5455_v57, %v783_v55  ;;  %v1057_v27 = vadd.f32 %v4359_v63, %v4357_v3  ;;  %v5462_v3 = vld [vmem:[#allocation26_spill] sm:$0xff] }
 0x33c   :  { %5453 = vst [vmem:[#allocation19_spill] sm:$0xff] %v4361_v32  ;;  %v4367_v42 = vpop.eup %3422  ;;  %v786_v49 = vpop.xlane.xlu1 %785 }
 0x33d   :  { %5456 = vst [vmem:[#allocation20_spill] sm:$0xff] %v4367_v42  ;;  %v961_v14 = vmul.f32 1.442695, %v857_v47  ;;  %v963_v16 = vmul.f32 1.442695, %v858_v41  ;;  %v859_v61 = vsub.f32 %v5457_v36, %v786_v49  ;;  %v860_v15 = vsub.f32 %v5458_v62, %v786_v49  ;;  %1058 = vadd.xlane.f32.xlu0 %v1057_v27  ;;  %v5460_v36 = vld [vmem:[#allocation24_spill] sm:$0xff] }
 0x33e   :  { %v1060_v18 = vadd.f32 %v4367_v42, %v4361_v32  ;;  %v5461_v27 = vld [vmem:[#allocation25_spill] sm:$0xff]  ;;  %v5463_v32 = vld [vmem:[#allocation27_spill] sm:$0xff] }
 0x33f   :  { %3432 = vpow2.f32 %v961_v14  ;;  %v965_v24 = vmul.f32 1.442695, %v859_v61  ;;  %v967_v59 = vmul.f32 1.442695, %v860_v15 }
 0x340   :  { %3434 = vpow2.f32 %v963_v16  ;;  %1061 = vadd.xlane.f32.xlu1 %v1060_v18 }
 0x341   :  { %v4373_v55 = vpop.eup %3424  ;;  %3436 = vpow2.f32 %v965_v24 }
 0x342   :  { %5459 = vst [vmem:[#allocation21_spill] sm:$0xff] %v4373_v55  ;;  %v4375_v57 = vpop.eup %3426  ;;  %3438 = vpow2.f32 %v967_v59  ;;  %v789_v47 = vpop.xlane.xlu0 %788 }
 0x343   :  { %v4377_v41 = vpop.eup %3428  ;;  %v861_v62 = vsub.f32 %v5460_v36, %v789_v47  ;;  %v862_v49 = vsub.f32 %v5461_v27, %v789_v47  ;;  %v1063_v14 = vadd.f32 %v4375_v57, %v4373_v55 }
 0x344   :  { %v4383_v61 = vpop.eup %3430  ;;  %v792_v15 = vpop.xlane.xlu1 %791 }
 0x345   :  { %v969_v16 = vmul.f32 1.442695, %v861_v62  ;;  %v971_v18 = vmul.f32 1.442695, %v862_v49  ;;  %v863_v24 = vsub.f32 %v5462_v3, %v792_v15  ;;  %v864_v42 = vsub.f32 %v5463_v32, %v792_v15  ;;  %1064 = vadd.xlane.f32.xlu0 %v1063_v14 }
 0x346   :  { %v1066_v59 = vadd.f32 %v4383_v61, %v4377_v41 }
 0x347   :  { %3440 = vpow2.f32 %v969_v16  ;;  %v973_v36 = vmul.f32 1.442695, %v863_v24  ;;  %v975_v63 = vmul.f32 1.442695, %v864_v42 }
 0x348   :  { %3442 = vpow2.f32 %v971_v18  ;;  %1067 = vadd.xlane.f32.xlu1 %v1066_v59 }
 0x349   :  { %v4389_v47 = vpop.eup %3432  ;;  %3444 = vpow2.f32 %v973_v36 }
 0x34a   :  { %5464 = vst [vmem:[#allocation22_spill] sm:$0xff] %v4389_v47  ;;  %v4391_v27 = vpop.eup %3434  ;;  %3446 = vpow2.f32 %v975_v63 }
 0x34b   :  { %5465 = vst [vmem:[#allocation23_spill] sm:$0xff] %v4391_v27  ;;  %v4393_v62 = vpop.eup %3436  ;;  %v1069_v3 = vadd.f32 %v4391_v27, %v4389_v47 }
 0x34c   :  { %5466 = vst [vmem:[#allocation24_spill] sm:$0xff] %v4393_v62  ;;  %v4397_v32 = vpop.eup %3438 }
 0x34d   :  { %5467 = vst [vmem:[#allocation25_spill] sm:$0xff] %v4397_v32  ;;  %1070 = vadd.xlane.f32.xlu0 %v1069_v3  ;;  %v1072_v49 = vadd.f32 %v4397_v32, %v4393_v62 }
 0x34f   :  { %1073 = vadd.xlane.f32.xlu1 %v1072_v49 }
 0x351   :  { %v4401_v42 = vpop.eup %3440 }
 0x352   :  { %5468 = vst [vmem:[#allocation26_spill] sm:$0xff] %v4401_v42  ;;  %v4403_v14 = vpop.eup %3442 }
 0x353   :  { %5469 = vst [vmem:[#allocation27_spill] sm:$0xff] %v4403_v14  ;;  %v4405_v15 = vpop.eup %3444  ;;  %v1075_v63 = vadd.f32 %v4403_v14, %v4401_v42 }
 0x354   :  { %5470 = vst [vmem:[#allocation29_spill] sm:$0xff] %v4405_v15  ;;  %v4409_v16 = vpop.eup %3446 }
 0x355   :  { %5471 = vst [vmem:[#allocation30_spill] sm:$0xff] %v4409_v16  ;;  %1076 = vadd.xlane.f32.xlu0 %v1075_v63  ;;  %v1078_v18 = vadd.f32 %v4409_v16, %v4405_v15 }
 0x357   :  { %1079 = vadd.xlane.f32.xlu1 %v1078_v18 }
 0x38a   :  { %v1011_v24 = vpop.xlane.xlu0 %1010 }
 0x38b   :  { %3448 = vrcp.f32 %v1011_v24 }
 0x38d   :  { %v1014_v59 = vpop.xlane.xlu1 %1013 }
 0x38e   :  { %3450 = vrcp.f32 %v1014_v59  ;;  %v795_v36 = vpop.xlane.xlu0 %794 }
 0x38f   :  { %v865_v3 = vsub.f32 %v4149_v52, %v795_v36  ;;  %v866_v49 = vsub.f32 %v4151_v54, %v795_v36 }
 0x391   :  { %v977_v47 = vmul.f32 1.442695, %v865_v3  ;;  %v979_v62 = vmul.f32 1.442695, %v866_v49  ;;  %v798_v32 = vpop.xlane.xlu1 %797 }
 0x392   :  { %v867_v42 = vsub.f32 %v4153_v58, %v798_v32  ;;  %v868_v63 = vsub.f32 %v4157_v0, %v798_v32  ;;  %v1017_v14 = vpop.xlane.xlu0 %1016 }
 0x393   :  { %3452 = vpow2.f32 %v977_v47 }
 0x394   :  { %3454 = vpow2.f32 %v979_v62  ;;  %v981_v18 = vmul.f32 1.442695, %v867_v42  ;;  %v983_v15 = vmul.f32 1.442695, %v868_v63 }
 0x395   :  { %v3449_v16 = vpop.eup %3448  ;;  %3456 = vrcp.f32 %v1017_v14 }
 0x396   :  { %v1137_v27 = vmul.f32 %v3449_v16, %v1011_v24  ;;  %3458 = vpow2.f32 %v981_v18  ;;  %v1020_v55 = vpop.xlane.xlu1 %1019  ;;  %v801_v52 = vpop.xlane.xlu0 %800 }
 0x397   :  { %3460 = vpow2.f32 %v983_v15  ;;  %v869_v54 = vsub.f32 %v4161_v7, %v801_v52  ;;  %v870_v36 = vsub.f32 %v4163_v9, %v801_v52 }
 0x398   :  { %v3451_v3 = vpop.eup %3450  ;;  %v1169_v58 = vsub.f32 2.0, %v1137_v27  ;;  %3462 = vrcp.f32 %v1020_v55 }
 0x399   :  { %v1138_v0 = vmul.f32 %v3451_v3, %v1014_v59  ;;  %v985_v32 = vmul.f32 1.442695, %v869_v54  ;;  %v987_v47 = vmul.f32 1.442695, %v870_v36 }
 0x39a   :  { %v1201_v62 = vmul.f32 %v3449_v16, %v1169_v58  ;;  %v1023_v42 = vpop.xlane.xlu0 %1022  ;;  %v804_v49 = vpop.xlane.xlu1 %803 }
 0x39b   :  { %v1170_v63 = vsub.f32 2.0, %v1138_v0  ;;  %3464 = vpow2.f32 %v985_v32  ;;  %v871_v24 = vsub.f32 %v4165_v22, %v804_v49  ;;  %v872_v18 = vsub.f32 %v4169_v40, %v804_v49 }
 0x39c   :  { %3466 = vpow2.f32 %v987_v47  ;;  %v1233_v59 = vmul.f32 %v4205_v17, %v1201_v62  ;;  %v1234_v36 = vmul.f32 %v4207_v4, %v1201_v62 }
 0x39d   :  { %v4421_v15 = vpop.eup %3452  ;;  %v1202_v7 = vmul.f32 %v3451_v3, %v1170_v63  ;;  %3468 = vrcp.f32 %v1023_v42  ;;  %v989_v9 = vmul.f32 1.442695, %v871_v24  ;;  %v991_v27 = vmul.f32 1.442695, %v872_v18 }
 0x39e   :  { %v4423_v52 = vpop.eup %3454  ;;  %v4426_v16 = vpop.xlane.xlu1 %1025 }
 0x39f   :  { %v807_v54 = vpop.xlane.xlu0 %806  ;;  %v3457_v58 = vpop.eup %3456  ;;  %v1235_v22 = vmul.f32 %v4209_v13, %v1202_v7  ;;  %3470 = vpow2.f32 %v989_v9  ;;  %v1081_v17 = vadd.f32 %v4423_v52, %v4421_v15  ;;  %v1236_v47 = vmul.f32 %v4215_v1, %v1202_v7 }
 0x3a0   :  { %v873_v40 = vsub.f32 %v4173_v50, %v807_v54  ;;  %v874_v3 = vsub.f32 %v4175_v60, %v807_v54  ;;  %v4432_v0 = vpop.eup %3458  ;;  %v1139_v32 = vmul.f32 %v3457_v58, %v1017_v14  ;;  %3472 = vpow2.f32 %v991_v27 }
 0x3a1   :  { %v4437_v49 = vpop.eup %3460  ;;  %3474 = vrcp.f32 %v4426_v16  ;;  %v1297_v62 = vpack.c.bf16 %v1235_v22, %v1233_v59  ;;  %1082 = vadd.xlane.f32.xlu0 %v1081_v17  ;;  %v1298_v60 = vpack.c.bf16 %v1236_v47, %v1234_v36 }
 0x3a2   :  { %v993_v4 = vmul.f32 1.442695, %v873_v40  ;;  %v995_v13 = vmul.f32 1.442695, %v874_v3  ;;  %v3463_v63 = vpop.eup %3462  ;;  %v1171_v50 = vsub.f32 2.0, %v1139_v32  ;;  %v810_v14 = vpop.xlane.xlu1 %809  ;;  %v1084_v18 = vadd.f32 %v4437_v49, %v4432_v0 }
 0x3a3   :  { %v4440_v24 = vpop.xlane.xlu0 %1028  ;;  %v1140_v9 = vmul.f32 %v3463_v63, %v1020_v55  ;;  %v875_v1 = vsub.f32 %v4177_v6, %v810_v14  ;;  %v876_v7 = vsub.f32 %v4181_v10, %v810_v14  ;;  %1329 = vmatprep.subr.bf16.mxu0 %v1298_v60 }
 0x3a4   :  { %3476 = vpow2.f32 %v993_v4  ;;  %1085 = vadd.xlane.f32.xlu1 %v1084_v18  ;;  %1330 = vmatpush1.bf16.xpose.msra.mxu0 %v1297_v62  ;;  %v1203_v40 = vmul.f32 %v3457_v58, %v1171_v50 }
 0x3a5   :  { %3478 = vpow2.f32 %v995_v13  ;;  %v4446_v27 = vpop.eup %3464  ;;  %v1172_v59 = vsub.f32 2.0, %v1140_v9  ;;  %v997_v54 = vmul.f32 1.442695, %v875_v1  ;;  %v999_v36 = vmul.f32 1.442695, %v876_v7 }
 0x3a6   :  { %3480 = vrcp.f32 %v4440_v24  ;;  %v4449_v22 = vpop.eup %3466  ;;  %v1032_v55 = vpop.xlane.xlu1 %1031 }
 0x3a7   :  { %v813_v3 = vpop.xlane.xlu0 %812  ;;  %v3469_v32 = vpop.eup %3468  ;;  %v1204_v6 = vmul.f32 %v3463_v63, %v1172_v59  ;;  %3482 = vpow2.f32 %v997_v54  ;;  %v1087_v4 = vadd.f32 %v4449_v22, %v4446_v27  ;;  %v1237_v63 = vmul.f32 %v4221_v51, %v1203_v40 }
 0x3a8   :  { %v877_v10 = vsub.f32 %v4185_v28, %v813_v3  ;;  %v878_v17 = vsub.f32 %v4187_v44, %v813_v3  ;;  %v1141_v47 = vmul.f32 %v3469_v32, %v1023_v42  ;;  %3484 = vpow2.f32 %v999_v36 }
 0x3a9   :  { %v4455_v13 = vpop.eup %3470  ;;  %v1239_v62 = vmul.f32 %v4235_v8, %v1204_v6  ;;  %3486 = vrcp.f32 %v1032_v55  ;;  %1088 = vadd.xlane.f32.xlu0 %v1087_v4  ;;  %v1238_v42 = vmul.f32 %v4226_v2, %v1203_v40  ;;  %v1240_v18 = vmul.f32 %v4239_v29, %v1204_v6 }
 0x3aa   :  { %v1001_v58 = vmul.f32 1.442695, %v877_v10  ;;  %v1003_v50 = vmul.f32 1.442695, %v878_v17  ;;  %v4458_v60 = vpop.eup %3472  ;;  %v1173_v14 = vsub.f32 2.0, %v1141_v47  ;;  %v816_v44 = vpop.xlane.xlu1 %815 }
 0x3ab   :  { %v1035_v28 = vpop.xlane.xlu0 %1034  ;;  %v3475_v9 = vpop.eup %3474  ;;  %v879_v1 = vsub.f32 %v4189_v38, %v816_v44  ;;  %v880_v8 = vsub.f32 %v4193_v34, %v816_v44  ;;  %v1090_v7 = vadd.f32 %v4458_v60, %v4455_v13  ;;  %v1300_v54 = vpack.c.bf16 %v1240_v18, %v1238_v42 }
 0x3ac   :  { %3488 = vpow2.f32 %v1001_v58  ;;  %v1205_v59 = vmul.f32 %v3469_v32, %v1173_v14  ;;  %v1142_v51 = vmul.f32 %v3475_v9, %v4426_v16  ;;  %v1299_v29 = vpack.c.bf16 %v1239_v62, %v1237_v63 }
 0x3ad   :  { %3490 = vpow2.f32 %v1003_v50  ;;  %v1005_v2 = vmul.f32 1.442695, %v879_v1  ;;  %v1007_v40 = vmul.f32 1.442695, %v880_v8  ;;  %1091 = vadd.xlane.f32.xlu1 %v1090_v7  ;;  %1331 = vmatprep.subr.bf16.mxu0 %v1300_v54 }
 0x3ae   :  { %v4468_v36 = vpop.eup %3476  ;;  %3492 = vrcp.f32 %v1035_v28  ;;  %v1174_v38 = vsub.f32 2.0, %v1142_v51  ;;  %v1038_v34 = vpop.xlane.xlu1 %1037  ;;  %1332 = vmatpush1.bf16.xpose.msra.mxu0 %v1299_v29  ;;  %v1241_v47 = vmul.f32 %v4243_v26, %v1205_v59  ;;  %v1242_v63 = vmul.f32 %v4248_v31, %v1205_v59 }
 0x3af   :  { %v4470_v3 = vpop.eup %3478  ;;  %3494 = vpow2.f32 %v1005_v2 }
 0x3b0   :  { %v3481_v6 = vpop.eup %3480  ;;  %v1093_v16 = vadd.f32 %v4470_v3, %v4468_v36  ;;  %v1206_v32 = vmul.f32 %v3475_v9, %v1174_v38  ;;  %3496 = vpow2.f32 %v1007_v40 }
 0x3b1   :  { %v1143_v10 = vmul.f32 %v3481_v6, %v4440_v24  ;;  %v4475_v17 = vpop.eup %3482  ;;  %3498 = vrcp.f32 %v1038_v34 }
 0x3b2   :  { %1094 = vadd.xlane.f32.xlu0 %v1093_v16  ;;  %v4478_v4 = vpop.eup %3484  ;;  %v1243_v62 = vmul.f32 %v4250_v46, %v1206_v32  ;;  %v1041_v50 = vpop.xlane.xlu0 %1040  ;;  %v1244_v14 = vmul.f32 %v4256_v25, %v1206_v32 }
 0x3b3   :  { %v1175_v58 = vsub.f32 2.0, %v1143_v10  ;;  %v3487_v44 = vpop.eup %3486  ;;  %3500 = vrcp.f32 %v1041_v50  ;;  %v1096_v24 = vadd.f32 %v4478_v4, %v4475_v17 }
 0x3b4   :  { %v1144_v42 = vmul.f32 %v3487_v44, %v1032_v55  ;;  %v1302_v18 = vpack.c.bf16 %v1244_v14, %v1242_v63  ;;  %v1301_v26 = vpack.c.bf16 %v1243_v62, %v1241_v47 }
 0x3b5   :  { %v1207_v1 = vmul.f32 %v3481_v6, %v1175_v58  ;;  %1097 = vadd.xlane.f32.xlu1 %v1096_v24  ;;  %v1044_v8 = vpop.xlane.xlu1 %1043 }
 0x3b6   :  { %v4485_v9 = vpop.eup %3488  ;;  %v1176_v7 = vsub.f32 2.0, %v1144_v42  ;;  %1333 = vmatprep.subr.bf16.mxu0 %v1302_v18  ;;  %3502 = vrcp.f32 %v1044_v8 }
 0x3b7   :  { %v4487_v46 = vpop.eup %3490  ;;  %1334 = vmatpush1.bf16.xpose.msra.mxu0 %v1301_v26  ;;  %v1245_v54 = vmul.f32 %v4265_v19, %v1207_v1  ;;  %v1246_v6 = vmul.f32 %v4270_v39, %v1207_v1 }
 0x3b8   :  { %v3493_v31 = vpop.eup %3492  ;;  %v1099_v25 = vadd.f32 %v4487_v46, %v4485_v9  ;;  %v1208_v59 = vmul.f32 %v3487_v44, %v1176_v7 }
 0x3b9   :  { %v1145_v51 = vmul.f32 %v3493_v31, %v1035_v28  ;;  %v4491_v55 = vpop.eup %3494 }
 0x3ba   :  { %1100 = vadd.xlane.f32.xlu0 %v1099_v25  ;;  %v4494_v2 = vpop.eup %3496  ;;  %v1247_v40 = vmul.f32 %v4272_v30, %v1208_v59  ;;  %v1047_v38 = vpop.xlane.xlu0 %1046  ;;  %v1248_v16 = vmul.f32 %v4278_v33, %v1208_v59 }
 0x3bb   :  { %v1177_v29 = vsub.f32 2.0, %v1145_v51  ;;  %v3499_v32 = vpop.eup %3498  ;;  %3504 = vrcp.f32 %v1047_v38  ;;  %v1102_v28 = vadd.f32 %v4494_v2, %v4491_v55 }
 0x3bc   :  { %v1146_v10 = vmul.f32 %v3499_v32, %v1038_v34  ;;  %v1304_v47 = vpack.c.bf16 %v1248_v16, %v1246_v6  ;;  %v1303_v62 = vpack.c.bf16 %v1247_v40, %v1245_v54 }
 0x3bd   :  { %v3501_v19 = vpop.eup %3500  ;;  %1103 = vadd.xlane.f32.xlu1 %v1102_v28  ;;  %v1050_v58 = vpop.xlane.xlu1 %1049  ;;  %v1209_v63 = vmul.f32 %v3493_v31, %v1177_v29 }
 0x3be   :  { %v1178_v14 = vsub.f32 2.0, %v1146_v10  ;;  %v1147_v30 = vmul.f32 %v3501_v19, %v1041_v50  ;;  %1335 = vmatprep.subr.bf16.mxu0 %v1304_v47  ;;  %3506 = vrcp.f32 %v1050_v58 }
 0x3bf   :  { %1336 = vmatpush1.bf16.xpose.msra.mxu0 %v1303_v62  ;;  %v1249_v42 = vmul.f32 %v4287_v5, %v1209_v63  ;;  %v1250_v26 = vmul.f32 %v4292_v45, %v1209_v63 }
 0x3c0   :  { %v3503_v39 = vpop.eup %3502  ;;  %v1210_v44 = vmul.f32 %v3499_v32, %v1178_v14  ;;  %v1179_v33 = vsub.f32 2.0, %v1147_v30 }
 0x3c1   :  { %v1148_v24 = vmul.f32 %v3503_v39, %v1044_v8 }
 0x3c2   :  { %v1251_v18 = vmul.f32 %v4294_v35, %v1210_v44  ;;  %v1053_v34 = vpop.xlane.xlu0 %1052  ;;  %v1252_v1 = vmul.f32 %v4300_v21, %v1210_v44  ;;  %v1211_v7 = vmul.f32 %v3501_v19, %v1179_v33 }
 0x3c3   :  { %v1180_v31 = vsub.f32 2.0, %v1148_v24  ;;  %3508 = vrcp.f32 %v1053_v34 }
 0x3c4   :  { %v1306_v50 = vpack.c.bf16 %v1252_v1, %v1250_v26  ;;  %v1305_v25 = vpack.c.bf16 %v1251_v18, %v1249_v42  ;;  %v1254_v5 = vmul.f32 %v4311_v12, %v1211_v7  ;;  %v1253_v32 = vmul.f32 %v4309_v20, %v1211_v7  ;;  %v5472_v1 = vld [vmem:[#allocation16_spill] sm:$0xff] }
 0x3c5   :  { %v3505_v59 = vpop.eup %3504  ;;  %v1212_v51 = vmul.f32 %v3503_v39, %v1180_v31  ;;  %v1056_v54 = vpop.xlane.xlu1 %1055 }
 0x3c6   :  { %v1149_v40 = vmul.f32 %v3505_v59, %v1047_v38  ;;  %1337 = vmatprep.subr.bf16.mxu0 %v1306_v50  ;;  %3510 = vrcp.f32 %v1056_v54  ;;  %v5473_v50 = vld [vmem:[#allocation28_spill] sm:$0xff] }
 0x3c7   :  { %1338 = vmatpush1.bf16.xpose.msra.mxu0 %v1305_v25  ;;  %v1256_v35 = vmul.f32 %v4319_v43, %v1212_v51  ;;  %v1255_v21 = vmul.f32 %v4313_v53, %v1212_v51 }
 0x3c8   :  { %v3507_v8 = vpop.eup %3506  ;;  %v1181_v45 = vsub.f32 2.0, %v1149_v40 }
 0x3c9   :  { %v1150_v29 = vmul.f32 %v3507_v8, %v1050_v58  ;;  %v1308_v6 = vpack.c.bf16 %v1256_v35, %v1254_v5  ;;  %v1307_v19 = vpack.c.bf16 %v1255_v21, %v1253_v32  ;;  %v5476_v32 = vld [vmem:[#allocation20_spill] sm:$0xff] }
 0x3ca   :  { %v1059_v16 = vpop.xlane.xlu0 %1058  ;;  %v1213_v28 = vmul.f32 %v3505_v59, %v1181_v45 }
 0x3cb   :  { %v1182_v10 = vsub.f32 2.0, %v1150_v29  ;;  %3512 = vrcp.f32 %v1059_v16  ;;  %1339 = vmatprep.subr.bf16.mxu0 %v1308_v6  ;;  %v5475_v6 = vld [vmem:[#allocation18_spill] sm:$0xff] }
 0x3cc   :  { %v1258_v43 = vmul.f32 %v4327_v23, %v1213_v28  ;;  %v1257_v44 = vmul.f32 %v4325_v56, %v1213_v28 }
 0x3cd   :  { %v3509_v38 = vpop.eup %3508  ;;  %v1214_v47 = vmul.f32 %v3507_v8, %v1182_v10  ;;  %v1062_v62 = vpop.xlane.xlu1 %1061 }
 0x3ce   :  { %v1151_v12 = vmul.f32 %v3509_v38, %v1053_v34  ;;  %3514 = vrcp.f32 %v1062_v62 }
 0x3cf   :  { %1340 = vmatpush1.bf16.xpose.msra.mxu0 %v1307_v19  ;;  %v1260_v53 = vmul.f32 %v4335_v48, %v1214_v47  ;;  %v1259_v14 = vmul.f32 %v4329_v11, %v1214_v47  ;;  %v5477_v47 = vld [vmem:[#allocation19_spill] sm:$0xff] }
 0x3d0   :  { %v3511_v58 = vpop.eup %3510  ;;  %v1183_v63 = vsub.f32 2.0, %v1151_v12 }
 0x3d1   :  { %v1152_v20 = vmul.f32 %v3511_v58, %v1056_v54  ;;  %v1310_v30 = vpack.c.bf16 %v1260_v53, %v1258_v43  ;;  %v1309_v26 = vpack.c.bf16 %v1259_v14, %v1257_v44  ;;  %v5474_v54 = vld [vmem:[#allocation15_spill] sm:$0xff]  ;;  %v5478_v53 = vld [vmem:[#allocation17_spill] sm:$0xff] }
 0x3d2   :  { %v1065_v39 = vpop.xlane.xlu0 %1064  ;;  %v1215_v33 = vmul.f32 %v3509_v38, %v1183_v63 }
 0x3d3   :  { %v1184_v24 = vsub.f32 2.0, %v1152_v20  ;;  %3516 = vrcp.f32 %v1065_v39  ;;  %1341 = vmatprep.subr.bf16.mxu0 %v1310_v30  ;;  %v4521_v20 = vld [vmem:[#allocation3 + $0x40] sm:$0xff] }
 0x3d4   :  { %v1262_v48 = vmul.f32 %v4343_v37, %v1215_v33  ;;  %v1261_v40 = vmul.f32 %v5474_v54, %v1215_v33 }
 0x3d5   :  { %v3513_v42 = vpop.eup %3512  ;;  %v1216_v18 = vmul.f32 %v3511_v58, %v1184_v24  ;;  %v1068_v34 = vpop.xlane.xlu1 %1067 }
 0x3d6   :  { %v1153_v23 = vmul.f32 %v3513_v42, %v1059_v16  ;;  %3518 = vrcp.f32 %v1068_v34 }
 0x3d7   :  { %1342 = vmatpush1.bf16.xpose.msra.mxu0 %v1309_v26  ;;  %v1264_v11 = vmul.f32 %v5472_v1, %v1216_v18  ;;  %v1263_v25 = vmul.f32 %v5473_v50, %v1216_v18  ;;  %v4526_v26 = vld [vmem:[#allocation3 + $0x50] sm:$0xff]  ;;  %v5479_v50 = vld [vmem:[#allocation21_spill] sm:$0xff] }
 0x3d8   :  { %v3515_v7 = vpop.eup %3514  ;;  %v1185_v31 = vsub.f32 2.0, %v1153_v23 }
 0x3d9   :  { %v1154_v56 = vmul.f32 %v3515_v7, %v1062_v62  ;;  %v1312_v59 = vpack.c.bf16 %v1264_v11, %v1262_v48  ;;  %v1311_v37 = vpack.c.bf16 %v1263_v25, %v1261_v40  ;;  %v5480_v40 = vld [vmem:[#allocation23_spill] sm:$0xff] }
 0x3da   :  { %v1071_v51 = vpop.xlane.xlu0 %1070  ;;  %v1217_v5 = vmul.f32 %v3513_v42, %v1185_v31 }
 0x3db   :  { %v1186_v35 = vsub.f32 2.0, %v1154_v56  ;;  %3520 = vrcp.f32 %v1071_v51  ;;  %1343 = vmatprep.subr.bf16.mxu0 %v1312_v59  ;;  %v4531_v56 = vld [vmem:[#allocation3 + $0x60] sm:$0xff] }
 0x3dc   :  { %v1074_v8 = vpop.xlane.xlu1 %1073  ;;  %v1266_v16 = vmul.f32 %v5475_v6, %v1217_v5  ;;  %v1265_v58 = vmul.f32 %v5478_v53, %v1217_v5  ;;  %v5482_v6 = vld [vmem:[#allocation24_spill] sm:$0xff] }
 0x3dd   :  { %v3517_v45 = vpop.eup %3516  ;;  %v1218_v21 = vmul.f32 %v3515_v7, %v1186_v35  ;;  %3522 = vrcp.f32 %v1074_v8  ;;  %v5481_v35 = vld [vmem:[#allocation25_spill] sm:$0xff] }
 0x3de   :  { %v1155_v29 = vmul.f32 %v3517_v45, %v1065_v39 }
 0x3df   :  { %1344 = vmatpush1.bf16.xpose.msra.mxu0 %v1311_v37  ;;  %v1268_v28 = vmul.f32 %v5476_v32, %v1218_v21  ;;  %v1267_v62 = vmul.f32 %v5477_v47, %v1218_v21  ;;  %v4542_v32 = vld [vmem:[#allocation3 + $0x58] sm:$0xff] }
 0x3e0   :  { %v3519_v10 = vpop.eup %3518  ;;  %v1187_v38 = vsub.f32 2.0, %v1155_v29 }
 0x3e1   :  { %v1156_v19 = vmul.f32 %v3519_v10, %v1068_v34  ;;  %v1314_v12 = vpack.c.bf16 %v1268_v28, %v1266_v16  ;;  %v1313_v33 = vpack.c.bf16 %v1267_v62, %v1265_v58  ;;  %v5485_v58 = vld [vmem:[#allocation30_spill] sm:$0xff] }
 0x3e2   :  { %v1077_v43 = vpop.xlane.xlu0 %1076  ;;  %v1219_v63 = vmul.f32 %v3517_v45, %v1187_v38  ;;  %v4538_v45 = vld [vmem:[#allocation3 + $0x70] sm:$0xff] }
 0x3e3   :  { %v1188_v14 = vsub.f32 2.0, %v1156_v19  ;;  %3524 = vrcp.f32 %v1077_v43  ;;  %1345 = vmatprep.subr.bf16.mxu0 %v1314_v12  ;;  %v5483_v38 = vld [vmem:[#allocation22_spill] sm:$0xff]  ;;  %v4547_v12 = vld [vmem:[#allocation3 + $0x68] sm:$0xff] }
 0x3e4   :  { %v1080_v30 = vpop.xlane.xlu1 %1079  ;;  %v1270_v18 = vmul.f32 %v4375_v57, %v1219_v63  ;;  %v1269_v25 = vmul.f32 %v5479_v50, %v1219_v63 }
 0x3e5   :  { %v3521_v39 = vpop.eup %3520  ;;  %v1220_v44 = vmul.f32 %v3519_v10, %v1188_v14  ;;  %3526 = vrcp.f32 %v1080_v30 }
 0x3e6   :  { %v1157_v24 = vmul.f32 %v3521_v39, %v1071_v51 }
 0x3e7   :  { %1552 = vxpose.xlu0.b32.start [1/4] (short) %v4521_v20, 128  ;;  %v3523_v42 = vpop.eup %3522  ;;  %1346 = vmatpush1.bf16.xpose.msra.mxu0 %v1313_v33  ;;  %v1272_v34 = vmul.f32 %v4383_v61, %v1220_v44  ;;  %v1271_v1 = vmul.f32 %v4377_v41, %v1220_v44  ;;  %v4533_v61 = vld [vmem:[#allocation3 + $0x48] sm:$0xff]  ;;  %v4553_v44 = vld [vmem:[#allocation3 + $0x78] sm:$0xff]  ;;  %v5487_v33 = vld [vmem:[#allocation26_spill] sm:$0xff] }
 0x3e8   :  { %v1189_v23 = vsub.f32 2.0, %v1157_v24  ;;  %v1158_v48 = vmul.f32 %v3523_v42, %v1074_v8 }
 0x3e9   :  { %v1316_v11 = vpack.c.bf16 %v1272_v34, %v1270_v18  ;;  %v1315_v51 = vpack.c.bf16 %v1271_v1, %v1269_v25  ;;  %v5488_v18 = vmov 0  }
 0x3ea   :  { %v1221_v7 = vmul.f32 %v3521_v39, %v1189_v23  ;;  %v1190_v31 = vsub.f32 2.0, %v1158_v48 }
 0x3eb   :  { %1553 = vxpose.xlu0.b32.cont [2/4] (short) %v4526_v26, 128  ;;  %1347 = vmatprep.subr.bf16.mxu0 %v1316_v11 }
 0x3ec   :  { %v1222_v59 = vmul.f32 %v3523_v42, %v1190_v31  ;;  %v1274_v5 = vmul.f32 %v5480_v40, %v1221_v7  ;;  %v1273_v47 = vmul.f32 %v5483_v38, %v1221_v7 }
 0x3ed   :  { %v3525_v57 = vpop.eup %3524 }
 0x3ee   :  { %v1159_v54 = vmul.f32 %v3525_v57, %v1077_v43  ;;  %v1276_v41 = vmul.f32 %v5481_v35, %v1222_v59  ;;  %v1275_v16 = vmul.f32 %v5482_v6, %v1222_v59  ;;  %v5484_v43 = vld [vmem:[#allocation27_spill] sm:$0xff] }
 0x3ef   :  { %1554 = vxpose.xlu0.b32.cont [3/4] (short) %v4531_v56, 128  ;;  %v3527_v8 = vpop.eup %3526  ;;  %1348 = vmatpush1.bf16.xpose.msra.mxu0 %v1315_v51 }
 0x3f0   :  { %v1191_v21 = vsub.f32 2.0, %v1159_v54  ;;  %v1160_v37 = vmul.f32 %v3527_v8, %v1080_v30  ;;  %v1318_v29 = vpack.c.bf16 %v1276_v41, %v1274_v5  ;;  %1584 = vxpose.xlu1.b32.start [1/4] (short) %v4533_v61, 128  ;;  %v1317_v19 = vpack.c.bf16 %v1275_v16, %v1273_v47  ;;  %v5486_v30 = vld [vmem:[#allocation29_spill] sm:$0xff] }
 0x3f2   :  { %v1223_v28 = vmul.f32 %v3525_v57, %v1191_v21  ;;  %v1192_v10 = vsub.f32 2.0, %v1160_v37  ;;  %1349 = vmatprep.subr.bf16.mxu0 %v1318_v29 }
 0x3f3   :  { %1555 = vxpose.xlu0.b32.end [4/4] (short) %v4538_v45, 128 }
 0x3f4   :  { %v1224_v62 = vmul.f32 %v3527_v8, %v1192_v10  ;;  %1585 = vxpose.xlu1.b32.cont [2/4] (short) %v4542_v32, 128  ;;  %v1278_v53 = vmul.f32 %v5484_v43, %v1223_v28  ;;  %v1277_v24 = vmul.f32 %v5487_v33, %v1223_v28 }
 0x3f6   :  { %v1280_v63 = vmul.f32 %v5485_v58, %v1224_v62  ;;  %v1279_v39 = vmul.f32 %v5486_v30, %v1224_v62 }
 0x3f7   :  { %1350 = vmatpush1.bf16.xpose.msra.mxu0 %v1317_v19 }
 0x3f8   :  { %v1320_v14 = vpack.c.bf16 %v1280_v63, %v1278_v53  ;;  %1586 = vxpose.xlu1.b32.cont [3/4] (short) %v4547_v12, 128  ;;  %v1319_v42 = vpack.c.bf16 %v1279_v39, %v1277_v24 }
 0x3fa   :  { %1351 = vmatprep.subr.bf16.mxu0 %v1320_v14 }
 0x3fc   :  { %1587 = vxpose.xlu1.b32.end [4/4] (short) %v4553_v44, 128 }
 0x3ff   :  { %1352 = vmatpush1.bf16.xpose.msra.mxu0 %v1319_v42 }
 0x41a   :  { %3351 = vset.pattern.permute.xlu1 %v5488_v18 }
 0x41c   :  { %3350 = vset.pattern.permute.xlu0 %v5488_v18 }
 0x42e   :  { %v1083_v34 = vpop.xlane.xlu0 %1082 }
 0x42f   :  { %3528 = vrcp.f32 %v1083_v34 }
 0x431   :  { %v1086_v23 = vpop.xlane.xlu1 %1085 }
 0x432   :  { %3530 = vrcp.f32 %v1086_v23 }
 0x436   :  { %v1089_v48 = vpop.xlane.xlu0 %1088 }
 0x437   :  { %3532 = vrcp.f32 %v1089_v48 }
 0x439   :  { %v3529_v1 = vpop.eup %3528 }
 0x43a   :  { %v1092_v11 = vpop.xlane.xlu1 %1091  ;;  %v1161_v7 = vmul.f32 %v3529_v1, %v1083_v34 }
 0x43b   :  { %3534 = vrcp.f32 %v1092_v11 }
 0x43c   :  { %v3531_v31 = vpop.eup %3530  ;;  %v1193_v50 = vsub.f32 2.0, %v1161_v7 }
 0x43d   :  { %v1162_v25 = vmul.f32 %v3531_v31, %v1086_v23 }
 0x43e   :  { %v1225_v57 = vmul.f32 %v3529_v1, %v1193_v50 }
 0x43f   :  { %v1095_v59 = vpop.xlane.xlu0 %1094  ;;  %v1194_v51 = vsub.f32 2.0, %v1162_v25 }
 0x440   :  { %3536 = vrcp.f32 %v1095_v59  ;;  %v1281_v5 = vmul.f32 %v4421_v15, %v1225_v57  ;;  %v1282_v41 = vmul.f32 %v4423_v52, %v1225_v57 }
 0x441   :  { %v1226_v54 = vmul.f32 %v3531_v31, %v1194_v51  ;;  %v3533_v40 = vpop.eup %3532 }
 0x442   :  { %v1098_v35 = vpop.xlane.xlu1 %1097  ;;  %v1163_v21 = vmul.f32 %v3533_v40, %v1089_v48 }
 0x443   :  { %v1283_v8 = vmul.f32 %v4432_v0, %v1226_v54  ;;  %3538 = vrcp.f32 %v1098_v35  ;;  %v1284_v37 = vmul.f32 %v4437_v49, %v1226_v54 }
 0x444   :  { %v1195_v6 = vsub.f32 2.0, %v1163_v21  ;;  %v5489_v21 = vld [vmem:[#allocation14_spill] sm:$0xff] }
 0x445   :  { %v3535_v29 = vpop.eup %3534  ;;  %v1322_v16 = vpack.c.bf16 %v1284_v37, %v1282_v41  ;;  %v1321_v28 = vpack.c.bf16 %v1283_v8, %v1281_v5  ;;  %v1543_v41 = vld [vmem:[%s5344_s1 + $0x10] sm:$0xff] }
 0x446   :  { %v1164_v10 = vmul.f32 %v3535_v29, %v1092_v11  ;;  %v1227_v47 = vmul.f32 %v3533_v40, %v1195_v6 }
 0x447   :  { %v1101_v38 = vpop.xlane.xlu0 %1100  ;;  %1353 = vmatprep.subr.bf16.mxu0 %v1322_v16 }
 0x448   :  { %3540 = vrcp.f32 %v1101_v38  ;;  %v1196_v62 = vsub.f32 2.0, %v1164_v10  ;;  %1354 = vmatpush1.bf16.xpose.msra.mxu0 %v1321_v28  ;;  %v1285_v0 = vmul.f32 %v4446_v27, %v1227_v47  ;;  %v1286_v58 = vmul.f32 %v4449_v22, %v1227_v47 }
 0x44a   :  { %v3537_v15 = vpop.eup %3536  ;;  %v1228_v19 = vmul.f32 %v3535_v29, %v1196_v62  ;;  %v1104_v43 = vpop.xlane.xlu1 %1103  ;;  %v5491_v29 = vld [vmem:[#allocation12_spill] sm:$0xff] }
 0x44b   :  { %v1165_v52 = vmul.f32 %v3537_v15, %v1095_v59  ;;  %3542 = vrcp.f32 %v1104_v43 }
 0x44c   :  { %v1287_v49 = vmul.f32 %v4455_v13, %v1228_v19  ;;  %v1288_v63 = vmul.f32 %v4458_v60, %v1228_v19 }
 0x44d   :  { %v1197_v53 = vsub.f32 2.0, %v1165_v52  ;;  %v3539_v14 = vpop.eup %3538 }
 0x44e   :  { %v1166_v30 = vmul.f32 %v3539_v14, %v1098_v35  ;;  %v1324_v39 = vpack.c.bf16 %v1288_v63, %v1286_v58  ;;  %v1323_v33 = vpack.c.bf16 %v1287_v49, %v1285_v0 }
 0x44f   :  { %v1229_v24 = vmul.f32 %v3537_v15, %v1197_v53 }
 0x450   :  { %v1198_v42 = vsub.f32 2.0, %v1166_v30  ;;  %1355 = vmatprep.subr.bf16.mxu0 %v1324_v39 }
 0x451   :  { %1356 = vmatpush1.bf16.xpose.msra.mxu0 %v1323_v33  ;;  %v1289_v27 = vmul.f32 %v4468_v36, %v1229_v24  ;;  %v1290_v22 = vmul.f32 %v4470_v3, %v1229_v24  ;;  %v1541_v36 = vld [vmem:[%s5344_s1] sm:$0xff] }
 0x452   :  { %v3541_v34 = vpop.eup %3540  ;;  %v1230_v23 = vmul.f32 %v3539_v14, %v1198_v42 }
 0x453   :  { %v1167_v48 = vmul.f32 %v3541_v34, %v1101_v38 }
 0x454   :  { %v1291_v13 = vmul.f32 %v4475_v17, %v1230_v23  ;;  %v1292_v60 = vmul.f32 %v4478_v4, %v1230_v23  ;;  %v1542_v17 = vld [vmem:[%s5344_s1 + $0x8] sm:$0xff] }
 0x455   :  { %v1199_v1 = vsub.f32 2.0, %v1167_v48  ;;  %v3543_v11 = vpop.eup %3542  ;;  %v3325_v35 = vpack.c.bf16 %v1542_v17, %v1541_v36 }
 0x456   :  { %v1168_v7 = vmul.f32 %v3543_v11, %v1104_v43  ;;  %v1326_v31 = vpack.c.bf16 %v1292_v60, %v1290_v22  ;;  %v1325_v50 = vpack.c.bf16 %v1291_v13, %v1289_v27  ;;  %v5384_v60 = vmov 0.0  }
 0x457   :  { %v1231_v25 = vmul.f32 %v3541_v34, %v1199_v1  ;;  %1486 = vmatprep.mubr.f32.mxu1 %v5384_v60 }
 0x458   :  { %v1200_v59 = vsub.f32 2.0, %v1168_v7  ;;  %1357 = vmatprep.subr.bf16.mxu0 %v1326_v31 }
 0x459   :  { %1358 = vmatpush1.bf16.xpose.msra.mxu0 %v1325_v50  ;;  %v1293_v3 = vmul.f32 %v4485_v9, %v1231_v25  ;;  %v1294_v51 = vmul.f32 %v4487_v46, %v1231_v25  ;;  %v1544_v9 = vld [vmem:[%s5344_s1 + $0x18] sm:$0xff]  ;;  %v5490_v46 = vld [vmem:[#allocation13_spill] sm:$0xff] }
 0x45a   :  { %v1232_v57 = vmul.f32 %v3543_v11, %v1200_v59  ;;  %v1538_v11 = vpack.c.bf16 %v4542_v32, %v4533_v61  ;;  %v4628_v61 = vld [vmem:[%s5345_s2] ss:$0 sm:$0xff]  ;;  %v4632_v32 = vpack.c.bf16 %v4526_v26, %v4521_v20  ;;  %v1383_v20 = vld [vmem:[#allocation6 + $0x8] sm:$0xff] }
 0x45c   :  { %v1295_v4 = vmul.f32 %v4491_v55, %v1232_v57  ;;  %v1296_v54 = vmul.f32 %v4494_v2, %v1232_v57  ;;  %v3329_v55 = vpack.c.bf16 %v1544_v9, %v1543_v41  ;;  %5492 = vst [vmem:[#allocation16_spill] sm:$0xff] %v4632_v32 }
 0x45e   :  { %v1328_v40 = vpack.c.bf16 %v1296_v54, %v1294_v51  ;;  %v1327_v5 = vpack.c.bf16 %v1295_v4, %v1293_v3 }
 0x460   :  { %1359 = vmatprep.subr.bf16.mxu0 %v1328_v40  ;;  %v1382_v40 = vld [vmem:[#allocation6] sm:$0xff] }
 0x461   :  { %1360 = vmatpush1.bf16.xpose.msra.mxu0 %v1327_v5 }
 0x462   :  { %3326 = vmatprep.subr.bf16.mxu0 %v3325_v35 }
 0x467   :  { %v1568_v8 = vpop.trf.xlu0 }
 0x468   :  { %1362 = vmatmul.mubr.bf16.vlgmr.msra.gmra.mrb[32].mxu0 %v5489_v21 }
 0x469   :  { %1371 = vmatprep.mubr.bf16.mxu0 %v5490_v46  ;;  %3328 = vmatpush3.bf16.msra.mxu0 %v3325_v35  ;;  %v4636_v35 = vpack.c.bf16 %v4553_v44, %v4547_v12 }
 0x46a   :  { %3330 = vmatprep.subr.bf16.mxu0 %v3329_v55 }
 0x46b   :  { %v1569_v2 = vpop.trf.xlu0  ;;  %5493 = vst [vmem:[#allocation28_spill] sm:$0xff] %v4636_v35 }
 0x46d   :  { %3332 = vmatpush3.bf16.msra.mxu0 %v3329_v55  ;;  %v4643_v55 = vpack.c.bf16 %v4538_v45, %v4531_v56  ;;  %v1384_v56 = vld [vmem:[#allocation6 + $0x10] sm:$0xff] }
 0x46f   :  { %v1570_v37 = vpop.trf.xlu0  ;;  %5494 = vst [vmem:[#allocation15_spill] sm:$0xff] %v4643_v55 }
 0x470   :  { %1372 = vmatmul.mubr.bf16.gmra.mrb[36].mxu0 %v5491_v29  ;;  %v1600_v6 = vpop.trf.xlu1 }
 0x471   :  { %3261 = vmatprep.mubr.msk.f32.mxu0 %vm142_vm0, %v1568_v8 }
 0x473   :  { %v1571_v16 = vpop.trf.xlu0 }
 0x474   :  { %v1601_v28 = vpop.trf.xlu1 }
 0x477   :  { %v1572_v10 = vpop.trf.xlu0 }
 0x478   :  { %3262 = vmatmul.mubr.msk.f32.vlgmr.msra.gmra.mrb[40].mxu0 %vm142_vm0, %v1569_v2  ;;  %v1602_v38 = vpop.trf.xlu1 }
 0x479   :  { %3264 = vmatprep.mubr.msk.f32.mxu0 %vm142_vm0, %v1570_v37 }
 0x47b   :  { %v1573_v47 = vpop.trf.xlu0 }
 0x47c   :  { %3265 = vmatmul.mubr.msk.f32.gmra.mrb[42].mxu0 %vm142_vm0, %v1571_v16  ;;  %v1603_v62 = vpop.trf.xlu1  ;;  %v1385_v16 = vld [vmem:[#allocation6 + $0x18] sm:$0xff] }
 0x47d   :  { %3267 = vmatprep.mubr.msk.f32.mxu0 %vm142_vm0, %v1572_v10 }
 0x47f   :  { %v1574_v15 = vpop.trf.xlu0 }
 0x480   :  { %3268 = vmatmul.mubr.msk.f32.gmra.mrb[44].mxu0 %vm142_vm0, %v1573_v47  ;;  %v1604_v19 = vpop.trf.xlu1 }
 0x481   :  { %3270 = vmatprep.mubr.msk.f32.mxu0 %vm142_vm0, %v1574_v15 }
 0x483   :  { %v1575_v52 = vpop.trf.xlu0 }
 0x484   :  { %3271 = vmatmul.mubr.msk.f32.gmra.mrb[46].mxu0 %vm142_vm0, %v1575_v52  ;;  %v1605_v0 = vpop.trf.xlu1 }
 0x487   :  { %v1576_v43 = vpop.trf.xlu0 }
 0x488   :  { %3273 = vmatprep.mubr.msk.f32.mxu0 %vm142_vm0, %v1576_v43  ;;  %v1606_v53 = vpop.trf.xlu1 }
 0x48b   :  { %v1577_v49 = vpop.trf.xlu0 }
 0x48c   :  { %3274 = vmatmul.mubr.msk.f32.gmra.mrb[48].mxu0 %vm142_vm0, %v1577_v49  ;;  %v1607_v14 = vpop.trf.xlu1 }
 0x48f   :  { %v1578_v58 = vpop.trf.xlu0 }
 0x490   :  { %3276 = vmatprep.mubr.msk.f32.mxu0 %vm142_vm0, %v1578_v58  ;;  %v1608_v39 = vpop.trf.xlu1 }
 0x493   :  { %v1579_v63 = vpop.trf.xlu0 }
 0x494   :  { %3277 = vmatmul.mubr.msk.f32.gmra.mrb[50].mxu0 %vm142_vm0, %v1579_v63  ;;  %v1609_v24 = vpop.trf.xlu1 }
 0x497   :  { %v1580_v30 = vpop.trf.xlu0 }
 0x498   :  { %3279 = vmatprep.mubr.msk.f32.mxu0 %vm142_vm0, %v1580_v30  ;;  %v1610_v23 = vpop.trf.xlu1 }
 0x49b   :  { %v1581_v33 = vpop.trf.xlu0 }
 0x49c   :  { %3280 = vmatmul.mubr.msk.f32.gmra.mrb[52].mxu0 %vm142_vm0, %v1581_v33  ;;  %v1611_v48 = vpop.trf.xlu1 }
 0x49f   :  { %v1582_v42 = vpop.trf.xlu0 }
 0x4a0   :  { %3282 = vmatprep.mubr.msk.f32.mxu0 %vm142_vm0, %v1582_v42  ;;  %v1612_v27 = vpop.trf.xlu1 }
 0x4a3   :  { %v1583_v34 = vpop.trf.xlu0 }
 0x4a4   :  { %3283 = vmatmul.mubr.msk.f32.gmra.mrb[54].mxu0 %vm142_vm0, %v1583_v34  ;;  %v1613_v13 = vpop.trf.xlu1 }
 0x4a5   :  { %3285 = vmatprep.mubr.msk.f32.mxu0 %vm142_vm0, %v1600_v6 }
 0x4a8   :  { %3286 = vmatmul.mubr.msk.f32.gmra.mrb[56].mxu0 %vm142_vm0, %v1601_v28  ;;  %v1614_v1 = vpop.trf.xlu1 }
 0x4a9   :  { %3288 = vmatprep.mubr.msk.f32.mxu0 %vm142_vm0, %v1602_v38 }
 0x4ac   :  { %3289 = vmatmul.mubr.msk.f32.gmra.mrb[58].mxu0 %vm142_vm0, %v1603_v62  ;;  %v1615_v22 = vpop.trf.xlu1 }
 0x4ad   :  { %3291 = vmatprep.mubr.msk.f32.mxu0 %vm142_vm0, %v1604_v19 }
 0x4b0   :  { %3292 = vmatmul.mubr.msk.f32.gmra.mrb[60].mxu0 %vm142_vm0, %v1605_v0 }
 0x4b1   :  { %3294 = vmatprep.mubr.msk.f32.mxu0 %vm142_vm0, %v1606_v53 }
 0x4b4   :  { %3295 = vmatmul.mubr.msk.f32.gmra.mrb[62].mxu0 %vm142_vm0, %v1607_v14 }
 0x4b5   :  { %3297 = vmatprep.mubr.msk.f32.mxu0 %vm142_vm0, %v1608_v39 }
 0x4b8   :  { %3298 = vmatmul.mubr.msk.f32.gmra.mrb[64].mxu0 %vm142_vm0, %v1609_v24 }
 0x4b9   :  { %3300 = vmatprep.mubr.msk.f32.mxu0 %vm142_vm0, %v1610_v23 }
 0x4bc   :  { %3301 = vmatmul.mubr.msk.f32.gmra.mrb[66].mxu0 %vm142_vm0, %v1611_v48 }
 0x4bd   :  { %3303 = vmatprep.mubr.msk.f32.mxu0 %vm142_vm0, %v1612_v27 }
 0x4c0   :  { %3304 = vmatmul.mubr.msk.f32.gmra.mrb[68].mxu0 %vm142_vm0, %v1613_v13 }
 0x4c1   :  { %3306 = vmatprep.mubr.msk.f32.mxu0 %vm142_vm0, %v1614_v1 }
 0x4c4   :  { %3307 = vmatmul.mubr.msk.f32.gmra.mrb[70].mxu0 %vm142_vm0, %v1615_v22 }
 0x4c5   :  { %2834 = vmatprep.mubr.bf16.mxu0 %v1538_v11 }
 0x53b   :  { %v1363_v7 = vpop.f32.mrb[32].mxu0 }
 0x53c   :  { %v1365_v31 = vpop.f32.mrb[33].mxu0 }
 0x53d   :  { %v1367_v50 = vpop.f32.mrb[34].mxu0 }
 0x53e   :  { %v3319_v25 = vpack.c.bf16 %v1367_v50, %v1363_v7  ;;  %v1369_v59 = vpop.f32.mrb[35].mxu0 }
 0x53f   :  { %v3317_v57 = vpack.c.bf16 %v1369_v59, %v1365_v31 }
 0x541   :  { %3318 = vmatprep.subr.bf16.mxu1 %v3317_v57 }
 0x542   :  { %3320 = vmatpush1.bf16.msra.mxu1 %v3319_v25 }
 0x543   :  { %v1373_v36 = vpop.f32.mrb[36].mxu0 }
 0x544   :  { %v1375_v17 = vpop.f32.mrb[37].mxu0 }
 0x545   :  { %v1377_v3 = vpop.f32.mrb[38].mxu0 }
 0x546   :  { %v3323_v4 = vpack.c.bf16 %v1377_v3, %v1373_v36  ;;  %v1379_v51 = vpop.f32.mrb[39].mxu0 }
 0x547   :  { %v3321_v54 = vpack.c.bf16 %v1379_v51, %v1375_v17 }
 0x549   :  { %3322 = vmatprep.subr.bf16.mxu1 %v3321_v54 }
 0x54a   :  { %3324 = vmatpush1.bf16.msra.mxu1 %v3323_v4 }
 0x54b   :  { %2001 = vmatprep.subr.bf16.mxu1 %v1538_v11  ;;  %v3263_v5 = vpop.f32.mrb[40].mxu0 }
 0x54c   :  { %v1784_v41 = vadd.f32 %v3263_v5, %v4628_v61  ;;  %v1778_v9 = vpop.f32.mrb[41].mxu0 }
 0x54d   :  { %3068 = vmatmul.mubr.msk.f32.vlgmr.msra.gmra.mrb[64].mxu1 %vm142_vm0, %v1382_v40  ;;  %v1779_v8 = vadd.f32 %v4628_v61, %v1778_v9 }
 0x54e   :  { %1492 = vmatprep.mubr.f32.mxu1 %v5384_v60  ;;  %2002 = vmatpush1.bf16.msra.mxu1 %v4632_v32 }
 0x54f   :  { %v1937_v26 = vpack.c.bf16 %v1784_v41, %v1779_v8  ;;  %2003 = vmatprep.subr.bf16.mxu1 %v4636_v35  ;;  %v3266_v12 = vpop.f32.mrb[42].mxu0 }
 0x550   :  { %v1794_v44 = vadd.f32 %v3266_v12, %v4628_v61  ;;  %v1788_v21 = vpop.f32.mrb[43].mxu0 }
 0x551   :  { %3069 = vmatmul.mubr.msk.f32.gmra.mrb[66].mxu1 %vm142_vm0, %v1383_v20  ;;  %v1789_v46 = vadd.f32 %v4628_v61, %v1788_v21 }
 0x552   :  { %1498 = vmatprep.mubr.f32.mxu1 %v5384_v60  ;;  %2004 = vmatpush1.bf16.msra.mxu1 %v4643_v55 }
 0x553   :  { %v1938_v45 = vpack.c.bf16 %v1794_v44, %v1789_v46  ;;  %v3269_v2 = vpop.f32.mrb[44].mxu0 }
 0x554   :  { %v1804_v37 = vadd.f32 %v3269_v2, %v4628_v61  ;;  %v1798_v29 = vpop.f32.mrb[45].mxu0 }
 0x555   :  { %3070 = vmatmul.mubr.msk.f32.gmra.mrb[68].mxu1 %vm142_vm0, %v1384_v56  ;;  %v1799_v6 = vadd.f32 %v4628_v61, %v1798_v29 }
 0x556   :  { %1504 = vmatprep.mubr.f32.mxu1 %v5384_v60 }
 0x557   :  { %v1939_v28 = vpack.c.bf16 %v1804_v37, %v1799_v6  ;;  %v3272_v10 = vpop.f32.mrb[46].mxu0 }
 0x558   :  { %v1814_v38 = vadd.f32 %v3272_v10, %v4628_v61  ;;  %v1808_v47 = vpop.f32.mrb[47].mxu0 }
 0x559   :  { %3071 = vmatmul.mubr.msk.f32.gmra.mrb[70].mxu1 %vm142_vm0, %v1385_v16  ;;  %v1809_v62 = vadd.f32 %v4628_v61, %v1808_v47 }
 0x55a   :  { %2033 = vmatprep.mubr.bf16.mxu1 %v5488_v18 }
 0x55b   :  { %v1940_v15 = vpack.c.bf16 %v1814_v38, %v1809_v62 }
 0x55d   :  { %3105 = vmatmul.mubr.msk.bf16.vlgmr.msra.gmra.mrb[72].mxu1 %vm142_vm0, %v1937_v26 }
 0x55e   :  { %2043 = vmatprep.mubr.bf16.mxu1 %v5488_v18 }
 0x55f   :  { %v3275_v19 = vpop.f32.mrb[48].mxu0 }
 0x560   :  { %v1824_v52 = vadd.f32 %v3275_v19, %v4628_v61  ;;  %v1818_v43 = vpop.f32.mrb[49].mxu0 }
 0x561   :  { %v1819_v0 = vadd.f32 %v4628_v61, %v1818_v43 }
 0x563   :  { %v1941_v49 = vpack.c.bf16 %v1824_v52, %v1819_v0 }
 0x565   :  { %3106 = vmatmul.mubr.msk.bf16.gmra.mrb[76].mxu1 %vm142_vm0, %v1938_v45 }
 0x566   :  { %2053 = vmatprep.mubr.bf16.mxu1 %v5488_v18 }
 0x567   :  { %v3278_v53 = vpop.f32.mrb[50].mxu0 }
 0x568   :  { %v1834_v58 = vadd.f32 %v3278_v53, %v4628_v61  ;;  %v1828_v63 = vpop.f32.mrb[51].mxu0 }
 0x569   :  { %v1829_v14 = vadd.f32 %v4628_v61, %v1828_v63 }
 0x56b   :  { %v1942_v30 = vpack.c.bf16 %v1834_v58, %v1829_v14 }
 0x56d   :  { %3107 = vmatmul.mubr.msk.bf16.gmra.mrb[80].mxu1 %vm142_vm0, %v1939_v28 }
 0x56e   :  { %2063 = vmatprep.mubr.bf16.mxu1 %v5488_v18 }
 0x56f   :  { %v3281_v39 = vpop.f32.mrb[52].mxu0 }
 0x570   :  { %v1844_v33 = vadd.f32 %v3281_v39, %v4628_v61  ;;  %v1838_v24 = vpop.f32.mrb[53].mxu0 }
 0x571   :  { %v1839_v42 = vadd.f32 %v4628_v61, %v1838_v24 }
 0x573   :  { %v1943_v34 = vpack.c.bf16 %v1844_v33, %v1839_v42 }
 0x575   :  { %3108 = vmatmul.mubr.msk.bf16.gmra.mrb[84].mxu1 %vm142_vm0, %v1940_v15 }
 0x576   :  { %2073 = vmatprep.mubr.bf16.mxu1 %v5488_v18 }
 0x577   :  { %v3284_v23 = vpop.f32.mrb[54].mxu0 }
 0x578   :  { %v1854_v48 = vadd.f32 %v3284_v23, %v4628_v61  ;;  %v1848_v27 = vpop.f32.mrb[55].mxu0 }
 0x579   :  { %v1849_v13 = vadd.f32 %v4628_v61, %v1848_v27 }
 0x57b   :  { %v1944_v1 = vpack.c.bf16 %v1854_v48, %v1849_v13  ;;  %v3287_v22 = vpop.f32.mrb[56].mxu0 }
 0x57c   :  { %v1864_v11 = vadd.f32 %v3287_v22, %v4628_v61  ;;  %v1858_v7 = vpop.f32.mrb[57].mxu0 }
 0x57d   :  { %v1859_v31 = vadd.f32 %v4628_v61, %v1858_v7  ;;  %3109 = vmatmul.mubr.msk.bf16.gmra.mrb[88].mxu1 %vm142_vm0, %v1941_v49 }
 0x57e   :  { %2083 = vmatprep.mubr.bf16.mxu1 %v5488_v18 }
 0x57f   :  { %v1945_v50 = vpack.c.bf16 %v1864_v11, %v1859_v31  ;;  %v3290_v25 = vpop.f32.mrb[58].mxu0 }
 0x580   :  { %v1874_v59 = vadd.f32 %v3290_v25, %v4628_v61  ;;  %v1868_v57 = vpop.f32.mrb[59].mxu0 }
 0x581   :  { %v1869_v36 = vadd.f32 %v4628_v61, %v1868_v57 }
 0x583   :  { %v1946_v17 = vpack.c.bf16 %v1874_v59, %v1869_v36  ;;  %v3293_v3 = vpop.f32.mrb[60].mxu0 }
 0x584   :  { %v1884_v4 = vadd.f32 %v3293_v3, %v4628_v61  ;;  %v1878_v51 = vpop.f32.mrb[61].mxu0 }
 0x585   :  { %v1879_v54 = vadd.f32 %v4628_v61, %v1878_v51  ;;  %3110 = vmatmul.mubr.msk.bf16.gmra.mrb[92].mxu1 %vm142_vm0, %v1942_v30 }
 0x586   :  { %2093 = vmatprep.mubr.bf16.mxu1 %v5488_v18 }
 0x587   :  { %v1947_v40 = vpack.c.bf16 %v1884_v4, %v1879_v54  ;;  %v3296_v5 = vpop.f32.mrb[62].mxu0 }
 0x588   :  { %v1894_v41 = vadd.f32 %v3296_v5, %v4628_v61  ;;  %v1888_v9 = vpop.f32.mrb[63].mxu0 }
 0x589   :  { %v1889_v8 = vadd.f32 %v4628_v61, %v1888_v9 }
 0x58b   :  { %v1948_v20 = vpack.c.bf16 %v1894_v41, %v1889_v8  ;;  %v3299_v26 = vpop.f32.mrb[64].mxu0 }
 0x58c   :  { %v1904_v12 = vadd.f32 %v3299_v26, %v4628_v61  ;;  %v1898_v44 = vpop.f32.mrb[65].mxu0 }
 0x58d   :  { %v1899_v21 = vadd.f32 %v4628_v61, %v1898_v44  ;;  %3111 = vmatmul.mubr.msk.bf16.gmra.mrb[96].mxu1 %vm142_vm0, %v1943_v34 }
 0x58e   :  { %2103 = vmatprep.mubr.bf16.mxu1 %v5488_v18 }
 0x58f   :  { %v1949_v46 = vpack.c.bf16 %v1904_v12, %v1899_v21  ;;  %v3302_v56 = vpop.f32.mrb[66].mxu0 }
 0x590   :  { %v1914_v45 = vadd.f32 %v3302_v56, %v4628_v61  ;;  %v1908_v2 = vpop.f32.mrb[67].mxu0 }
 0x591   :  { %v1909_v37 = vadd.f32 %v4628_v61, %v1908_v2 }
 0x593   :  { %v1950_v29 = vpack.c.bf16 %v1914_v45, %v1909_v37  ;;  %v3305_v6 = vpop.f32.mrb[68].mxu0 }
 0x594   :  { %v1924_v16 = vadd.f32 %v3305_v6, %v4628_v61  ;;  %v1918_v28 = vpop.f32.mrb[69].mxu0 }
 0x595   :  { %v1919_v10 = vadd.f32 %v4628_v61, %v1918_v28  ;;  %3112 = vmatmul.mubr.msk.bf16.gmra.mrb[100].mxu1 %vm142_vm0, %v1944_v1 }
 0x596   :  { %2113 = vmatprep.mubr.bf16.mxu1 %v5488_v18 }
 0x597   :  { %v1951_v38 = vpack.c.bf16 %v1924_v16, %v1919_v10  ;;  %v3308_v47 = vpop.f32.mrb[70].mxu0 }
 0x598   :  { %v1934_v62 = vadd.f32 %v3308_v47, %v4628_v61  ;;  %v1928_v15 = vpop.f32.mrb[71].mxu0 }
 0x599   :  { %v1929_v19 = vadd.f32 %v4628_v61, %v1928_v15 }
 0x59b   :  { %v1952_v52 = vpack.c.bf16 %v1934_v62, %v1929_v19 }
 0x59d   :  { %3113 = vmatmul.mubr.msk.bf16.gmra.mrb[104].mxu1 %vm142_vm0, %v1945_v50 }
 0x59e   :  { %2123 = vmatprep.mubr.bf16.mxu1 %v5488_v18 }
 0x5a5   :  { %3114 = vmatmul.mubr.msk.bf16.gmra.mrb[108].mxu1 %vm142_vm0, %v1946_v17 }
 0x5a6   :  { %2133 = vmatprep.mubr.bf16.mxu1 %v5488_v18 }
 0x5ad   :  { %3115 = vmatmul.mubr.msk.bf16.gmra.mrb[112].mxu1 %vm142_vm0, %v1947_v40 }
 0x5ae   :  { %2143 = vmatprep.mubr.bf16.mxu1 %v5488_v18 }
 0x5b5   :  { %3116 = vmatmul.mubr.msk.bf16.gmra.mrb[116].mxu1 %vm142_vm0, %v1948_v20 }
 0x5b6   :  { %2153 = vmatprep.mubr.bf16.mxu1 %v5488_v18 }
 0x5bd   :  { %3117 = vmatmul.mubr.msk.bf16.gmra.mrb[120].mxu1 %vm142_vm0, %v1949_v46 }
 0x5be   :  { %2163 = vmatprep.mubr.bf16.mxu1 %v5488_v18 }
 0x5c5   :  { %3118 = vmatmul.mubr.msk.bf16.gmra.mrb[124].mxu1 %vm142_vm0, %v1950_v29 }
 0x5c6   :  { %2173 = vmatprep.mubr.bf16.mxu1 %v5488_v18 }
 0x5cd   :  { %3119 = vmatmul.mubr.msk.bf16.gmra.mrb[128].mxu1 %vm142_vm0, %v1951_v38 }
 0x5ce   :  { %2183 = vmatprep.mubr.bf16.mxu1 %v5488_v18 }
 0x5d5   :  { %3120 = vmatmul.mubr.msk.bf16.gmra.mrb[132].mxu1 %vm142_vm0, %v1952_v52 }
 0x5d6   :  { %2959 = vmatprep.mubr.f32.mxu1 %v5384_v60 }
 0x620   :  { %v4717_v61 = vpop.f32.mrb[64].mxu1 }
 0x621   :  { %5495 = vst [vmem:[#allocation18_spill] sm:$0xff] %v4717_v61  ;;  %v4719_v43 = vpop.f32.mrb[65].mxu1 }
 0x622   :  { %5496 = vst [vmem:[#allocation20_spill] sm:$0xff] %v4719_v43 }
 0x624   :  { %v4721_v0 = vpop.f32.mrb[66].mxu1 }
 0x625   :  { %5497 = vst [vmem:[#allocation19_spill] sm:$0xff] %v4721_v0  ;;  %v4723_v49 = vpop.f32.mrb[67].mxu1 }
 0x626   :  { %5498 = vst [vmem:[#allocation17_spill] sm:$0xff] %v4723_v49 }
 0x628   :  { %v4725_v53 = vpop.f32.mrb[68].mxu1 }
 0x629   :  { %5499 = vst [vmem:[#allocation21_spill] sm:$0xff] %v4725_v53  ;;  %v4727_v58 = vpop.f32.mrb[69].mxu1 }
 0x62a   :  { %5500 = vst [vmem:[#allocation23_spill] sm:$0xff] %v4727_v58 }
 0x62c   :  { %v4729_v63 = vpop.f32.mrb[70].mxu1 }
 0x62d   :  { %5501 = vst [vmem:[#allocation25_spill] sm:$0xff] %v4729_v63  ;;  %v4731_v14 = vpop.f32.mrb[71].mxu1 }
 0x62e   :  { %5502 = vst [vmem:[#allocation24_spill] sm:$0xff] %v4731_v14 }
 0x630   :  { %v4733_v18 = vpop.f32.mrb[72].mxu1 }
 0x631   :  { %v4735_v30 = vpop.f32.mrb[73].mxu1 }
 0x632   :  { %v2194_v39 = vmax.f32 %v4733_v18, %v4735_v30  ;;  %v4739_v33 = vpop.f32.mrb[74].mxu1 }
 0x633   :  { %v4741_v24 = vpop.f32.mrb[75].mxu1 }
 0x634   :  { %v2197_v42 = vmax.f32 %v4739_v33, %v4741_v24  ;;  %2195 = vmax.xlane.f32.xlu0 %v2194_v39 }
 0x636   :  { %2198 = vmax.xlane.f32.xlu1 %v2197_v42 }
 0x638   :  { %v4745_v34 = vpop.f32.mrb[76].mxu1 }
 0x639   :  { %v4747_v23 = vpop.f32.mrb[77].mxu1 }
 0x63a   :  { %v2200_v48 = vmax.f32 %v4745_v34, %v4747_v23  ;;  %v4751_v27 = vpop.f32.mrb[78].mxu1 }
 0x63b   :  { %v4753_v13 = vpop.f32.mrb[79].mxu1 }
 0x63c   :  { %v2203_v1 = vmax.f32 %v4751_v27, %v4753_v13  ;;  %2201 = vmax.xlane.f32.xlu0 %v2200_v48 }
 0x63e   :  { %2204 = vmax.xlane.f32.xlu1 %v2203_v1 }
 0x640   :  { %v4757_v22 = vpop.f32.mrb[80].mxu1 }
 0x641   :  { %v4759_v11 = vpop.f32.mrb[81].mxu1 }
 0x642   :  { %v2206_v7 = vmax.f32 %v4757_v22, %v4759_v11  ;;  %v4763_v31 = vpop.f32.mrb[82].mxu1 }
 0x643   :  { %v4765_v50 = vpop.f32.mrb[83].mxu1 }
 0x644   :  { %v2209_v25 = vmax.f32 %v4763_v31, %v4765_v50  ;;  %2207 = vmax.xlane.f32.xlu0 %v2206_v7 }
 0x646   :  { %2210 = vmax.xlane.f32.xlu1 %v2209_v25 }
 0x648   :  { %v4769_v59 = vpop.f32.mrb[84].mxu1 }
 0x649   :  { %v4771_v57 = vpop.f32.mrb[85].mxu1 }
 0x64a   :  { %v2212_v36 = vmax.f32 %v4769_v59, %v4771_v57  ;;  %v4775_v17 = vpop.f32.mrb[86].mxu1 }
 0x64b   :  { %v4777_v3 = vpop.f32.mrb[87].mxu1 }
 0x64c   :  { %v2215_v4 = vmax.f32 %v4775_v17, %v4777_v3  ;;  %2213 = vmax.xlane.f32.xlu0 %v2212_v36 }
 0x64e   :  { %2216 = vmax.xlane.f32.xlu1 %v2215_v4 }
 0x650   :  { %v4781_v51 = vpop.f32.mrb[88].mxu1 }
 0x651   :  { %v4783_v54 = vpop.f32.mrb[89].mxu1 }
 0x652   :  { %v2218_v40 = vmax.f32 %v4781_v51, %v4783_v54  ;;  %v4787_v5 = vpop.f32.mrb[90].mxu1 }
 0x653   :  { %v4789_v41 = vpop.f32.mrb[91].mxu1 }
 0x654   :  { %v2221_v9 = vmax.f32 %v4787_v5, %v4789_v41  ;;  %2219 = vmax.xlane.f32.xlu0 %v2218_v40 }
 0x656   :  { %2222 = vmax.xlane.f32.xlu1 %v2221_v9 }
 0x658   :  { %v4793_v8 = vpop.f32.mrb[92].mxu1 }
 0x659   :  { %v4795_v20 = vpop.f32.mrb[93].mxu1 }
 0x65a   :  { %v2224_v26 = vmax.f32 %v4793_v8, %v4795_v20  ;;  %v4799_v12 = vpop.f32.mrb[94].mxu1 }
 0x65b   :  { %v4801_v44 = vpop.f32.mrb[95].mxu1 }
 0x65c   :  { %v2227_v21 = vmax.f32 %v4799_v12, %v4801_v44  ;;  %2225 = vmax.xlane.f32.xlu0 %v2224_v26 }
 0x65e   :  { %2228 = vmax.xlane.f32.xlu1 %v2227_v21 }
 0x660   :  { %v4805_v46 = vpop.f32.mrb[96].mxu1 }
 0x661   :  { %v4807_v56 = vpop.f32.mrb[97].mxu1 }
 0x662   :  { %v2230_v45 = vmax.f32 %v4805_v46, %v4807_v56  ;;  %v4811_v2 = vpop.f32.mrb[98].mxu1 }
 0x663   :  { %v4813_v37 = vpop.f32.mrb[99].mxu1 }
 0x664   :  { %v2233_v29 = vmax.f32 %v4811_v2, %v4813_v37  ;;  %2231 = vmax.xlane.f32.xlu0 %v2230_v45 }
 0x666   :  { %2234 = vmax.xlane.f32.xlu1 %v2233_v29 }
 0x668   :  { %v4817_v6 = vpop.f32.mrb[100].mxu1 }
 0x669   :  { %v4819_v16 = vpop.f32.mrb[101].mxu1 }
 0x66a   :  { %v2236_v28 = vmax.f32 %v4817_v6, %v4819_v16  ;;  %v4823_v10 = vpop.f32.mrb[102].mxu1 }
 0x66b   :  { %v4825_v38 = vpop.f32.mrb[103].mxu1 }
 0x66c   :  { %v2239_v47 = vmax.f32 %v4823_v10, %v4825_v38  ;;  %2237 = vmax.xlane.f32.xlu0 %v2236_v28 }
 0x66e   :  { %2240 = vmax.xlane.f32.xlu1 %v2239_v47 }
 0x670   :  { %v4829_v62 = vpop.f32.mrb[104].mxu1 }
 0x671   :  { %v4831_v15 = vpop.f32.mrb[105].mxu1 }
 0x672   :  { %v2242_v19 = vmax.f32 %v4829_v62, %v4831_v15  ;;  %v4835_v52 = vpop.f32.mrb[106].mxu1 }
 0x673   :  { %v4837_v39 = vpop.f32.mrb[107].mxu1 }
 0x674   :  { %5503 = vst [vmem:[#allocation22_spill] sm:$0xff] %v4837_v39  ;;  %v2245_v42 = vmax.f32 %v4835_v52, %v4837_v39  ;;  %2243 = vmax.xlane.f32.xlu0 %v2242_v19 }
 0x676   :  { %2246 = vmax.xlane.f32.xlu1 %v2245_v42 }
 0x678   :  { %v4841_v48 = vpop.f32.mrb[108].mxu1 }
 0x679   :  { %5504 = vst [vmem:[#allocation27_spill] sm:$0xff] %v4841_v48  ;;  %v4843_v1 = vpop.f32.mrb[109].mxu1 }
 0x67a   :  { %5505 = vst [vmem:[#allocation30_spill] sm:$0xff] %v4843_v1  ;;  %v2248_v7 = vmax.f32 %v4841_v48, %v4843_v1  ;;  %v4847_v25 = vpop.f32.mrb[110].mxu1 }
 0x67b   :  { %5506 = vst [vmem:[#allocation29_spill] sm:$0xff] %v4847_v25  ;;  %v4849_v36 = vpop.f32.mrb[111].mxu1 }
 0x67c   :  { %5507 = vst [vmem:[#allocation26_spill] sm:$0xff] %v4849_v36  ;;  %v2251_v4 = vmax.f32 %v4847_v25, %v4849_v36  ;;  %2249 = vmax.xlane.f32.xlu0 %v2248_v7 }
 0x67e   :  { %2252 = vmax.xlane.f32.xlu1 %v2251_v4 }
 0x680   :  { %v4853_v40 = vpop.f32.mrb[112].mxu1 }
 0x681   :  { %5508 = vst [vmem:[#allocation14_spill] sm:$0xff] %v4853_v40  ;;  %v4855_v9 = vpop.f32.mrb[113].mxu1 }
 0x682   :  { %5509 = vst [vmem:[#allocation13_spill] sm:$0xff] %v4855_v9  ;;  %v2254_v26 = vmax.f32 %v4853_v40, %v4855_v9  ;;  %v4859_v21 = vpop.f32.mrb[114].mxu1 }
 0x683   :  { %5510 = vst [vmem:[#allocation12_spill] sm:$0xff] %v4859_v21  ;;  %v4861_v45 = vpop.f32.mrb[115].mxu1 }
 0x684   :  { %5511 = vst [vmem:[#allocation31_spill] sm:$0xff] %v4861_v45  ;;  %v2257_v29 = vmax.f32 %v4859_v21, %v4861_v45  ;;  %2255 = vmax.xlane.f32.xlu0 %v2254_v26 }
 0x686   :  { %2258 = vmax.xlane.f32.xlu1 %v2257_v29 }
 0x688   :  { %v4865_v28 = vpop.f32.mrb[116].mxu1 }
 0x689   :  { %5512 = vst [vmem:[#allocation32_spill] sm:$0xff] %v4865_v28  ;;  %v4867_v47 = vpop.f32.mrb[117].mxu1 }
 0x68a   :  { %5513 = vst [vmem:[#allocation33_spill] sm:$0xff] %v4867_v47  ;;  %v2260_v19 = vmax.f32 %v4865_v28, %v4867_v47  ;;  %v4871_v42 = vpop.f32.mrb[118].mxu1 }
 0x68b   :  { %5514 = vst [vmem:[#allocation34_spill] sm:$0xff] %v4871_v42  ;;  %v4873_v7 = vpop.f32.mrb[119].mxu1 }
 0x68c   :  { %5515 = vst [vmem:[#allocation35_spill] sm:$0xff] %v4873_v7  ;;  %v2263_v4 = vmax.f32 %v4871_v42, %v4873_v7  ;;  %2261 = vmax.xlane.f32.xlu0 %v2260_v19 }
 0x68e   :  { %2264 = vmax.xlane.f32.xlu1 %v2263_v4 }
 0x690   :  { %v4877_v60 = vpop.f32.mrb[120].mxu1 }
 0x691   :  { %v4879_v26 = vpop.f32.mrb[121].mxu1 }
 0x692   :  { %v4883_v55 = vpop.f32.mrb[122].mxu1 }
 0x693   :  { %v4885_v35 = vpop.f32.mrb[123].mxu1 }
 0x698   :  { %v4889_v14 = vpop.f32.mrb[124].mxu1 }
 0x699   :  { %v4891_v63 = vpop.f32.mrb[125].mxu1 }
 0x69a   :  { %v4895_v4 = vpop.f32.mrb[126].mxu1 }
 0x69b   :  { %v4897_v58 = vpop.f32.mrb[127].mxu1 }
 0x6a0   :  { %v4901_v53 = vpop.f32.mrb[128].mxu1 }
 0x6a1   :  { %v4903_v43 = vpop.f32.mrb[129].mxu1 }
 0x6a2   :  { %v4907_v61 = vpop.f32.mrb[130].mxu1 }
 0x6a3   :  { %v4909_v49 = vpop.f32.mrb[131].mxu1 }
 0x6a8   :  { %v4913_v0 = vpop.f32.mrb[132].mxu1 }
 0x6a9   :  { %v4915_v7 = vpop.f32.mrb[133].mxu1 }
 0x6aa   :  { %v4919_v42 = vpop.f32.mrb[134].mxu1 }
 0x6ab   :  { %v4921_v47 = vpop.f32.mrb[135].mxu1 }
 0x6c1   :  { %v2196_v28 = vpop.xlane.xlu0 %2195 }
 0x6c2   :  { %v2290_v45 = vsub.f32 %v4733_v18, %v2196_v28  ;;  %v2291_v21 = vsub.f32 %v4735_v30, %v2196_v28 }
 0x6c3   :  { %v2199_v19 = vpop.xlane.xlu1 %2198 }
 0x6c4   :  { %v2354_v9 = vmul.f32 1.442695, %v2290_v45  ;;  %v2356_v40 = vmul.f32 1.442695, %v2291_v21  ;;  %v2292_v36 = vsub.f32 %v4739_v33, %v2199_v19  ;;  %v2293_v25 = vsub.f32 %v4741_v24, %v2199_v19 }
 0x6c6   :  { %3544 = vpow2.f32 %v2354_v9  ;;  %v2358_v29 = vmul.f32 1.442695, %v2292_v36  ;;  %v2360_v1 = vmul.f32 1.442695, %v2293_v25 }
 0x6c7   :  { %3546 = vpow2.f32 %v2356_v40 }
 0x6c8   :  { %3548 = vpow2.f32 %v2358_v29 }
 0x6c9   :  { %3550 = vpow2.f32 %v2360_v1  ;;  %v2202_v48 = vpop.xlane.xlu0 %2201 }
 0x6ca   :  { %v2294_v32 = vsub.f32 %v4745_v34, %v2202_v48  ;;  %v2295_v18 = vsub.f32 %v4747_v23, %v2202_v48 }
 0x6cb   :  { %v2205_v39 = vpop.xlane.xlu1 %2204 }
 0x6cc   :  { %v2362_v30 = vmul.f32 1.442695, %v2294_v32  ;;  %v2364_v28 = vmul.f32 1.442695, %v2295_v18  ;;  %v2296_v21 = vsub.f32 %v4751_v27, %v2205_v39  ;;  %v2297_v33 = vsub.f32 %v4753_v13, %v2205_v39 }
 0x6ce   :  { %3552 = vpow2.f32 %v2362_v30  ;;  %v2366_v24 = vmul.f32 1.442695, %v2296_v21  ;;  %v2368_v9 = vmul.f32 1.442695, %v2297_v33  ;;  %v5516_v30 = vmax.f32 %v4877_v60, %v4879_v26 }
 0x6cf   :  { %3554 = vpow2.f32 %v2364_v28 }
 0x6d0   :  { %v4933_v25 = vpop.eup %3544  ;;  %3556 = vpow2.f32 %v2366_v24 }
 0x6d1   :  { %v4935_v1 = vpop.eup %3546  ;;  %3558 = vpow2.f32 %v2368_v9  ;;  %v2208_v34 = vpop.xlane.xlu0 %2207 }
 0x6d2   :  { %v4937_v36 = vpop.eup %3548  ;;  %v2298_v32 = vsub.f32 %v4757_v22, %v2208_v34  ;;  %v2299_v23 = vsub.f32 %v4759_v11, %v2208_v34  ;;  %v2482_v27 = vadd.f32 %v4935_v1, %v4933_v25  ;;  %v5517_v34 = vmax.f32 %v4883_v55, %v4885_v35 }
 0x6d3   :  { %v4943_v13 = vpop.eup %3550  ;;  %v2211_v39 = vpop.xlane.xlu1 %2210 }
 0x6d4   :  { %v2370_v48 = vmul.f32 1.442695, %v2298_v32  ;;  %v2372_v40 = vmul.f32 1.442695, %v2299_v23  ;;  %2483 = vadd.xlane.f32.xlu0 %v2482_v27  ;;  %v2300_v45 = vsub.f32 %v4763_v31, %v2211_v39  ;;  %v2301_v29 = vsub.f32 %v4765_v50, %v2211_v39 }
 0x6d5   :  { %v2485_v19 = vadd.f32 %v4943_v13, %v4937_v36 }
 0x6d6   :  { %3560 = vpow2.f32 %v2370_v48  ;;  %v2374_v22 = vmul.f32 1.442695, %v2300_v45  ;;  %v2376_v18 = vmul.f32 1.442695, %v2301_v29  ;;  %v5518_v29 = vmax.f32 %v4889_v14, %v4891_v63 }
 0x6d7   :  { %3562 = vpow2.f32 %v2372_v40  ;;  %2486 = vadd.xlane.f32.xlu1 %v2485_v19 }
 0x6d8   :  { %v4949_v11 = vpop.eup %3552  ;;  %3564 = vpow2.f32 %v2374_v22  ;;  %2267 = vmax.xlane.f32.xlu0 %v5516_v30 }
 0x6d9   :  { %v4954_v28 = vpop.eup %3554  ;;  %3566 = vpow2.f32 %v2376_v18  ;;  %v2214_v31 = vpop.xlane.xlu0 %2213 }
 0x6da   :  { %v4956_v50 = vpop.eup %3556  ;;  %v2302_v21 = vsub.f32 %v4769_v59, %v2214_v31  ;;  %v2303_v33 = vsub.f32 %v4771_v57, %v2214_v31  ;;  %v2488_v24 = vadd.f32 %v4954_v28, %v4949_v11 }
 0x6db   :  { %v4962_v9 = vpop.eup %3558  ;;  %2270 = vmax.xlane.f32.xlu1 %v5517_v34  ;;  %v2217_v32 = vpop.xlane.xlu1 %2216 }
 0x6dc   :  { %v2378_v23 = vmul.f32 1.442695, %v2302_v21  ;;  %v2380_v27 = vmul.f32 1.442695, %v2303_v33  ;;  %2489 = vadd.xlane.f32.xlu0 %v2488_v24  ;;  %v2304_v39 = vsub.f32 %v4775_v17, %v2217_v32  ;;  %v2305_v48 = vsub.f32 %v4777_v3, %v2217_v32 }
 0x6dd   :  { %v2491_v59 = vadd.f32 %v4962_v9, %v4956_v50  ;;  %v5519_v21 = vmax.f32 %v4895_v4, %v4897_v58 }
 0x6de   :  { %3568 = vpow2.f32 %v2378_v23  ;;  %v2382_v57 = vmul.f32 1.442695, %v2304_v39  ;;  %v2384_v40 = vmul.f32 1.442695, %v2305_v48  ;;  %v5520_v48 = vmax.f32 %v4901_v53, %v4903_v43 }
 0x6df   :  { %3570 = vpow2.f32 %v2380_v27  ;;  %2492 = vadd.xlane.f32.xlu1 %v2491_v59 }
 0x6e0   :  { %v4971_v45 = vpop.eup %3560  ;;  %3572 = vpow2.f32 %v2382_v57  ;;  %2273 = vmax.xlane.f32.xlu0 %v5518_v29 }
 0x6e1   :  { %v4976_v19 = vpop.eup %3562  ;;  %3574 = vpow2.f32 %v2384_v40  ;;  %v2220_v17 = vpop.xlane.xlu0 %2219 }
 0x6e2   :  { %v4978_v3 = vpop.eup %3564  ;;  %v2306_v22 = vsub.f32 %v4781_v51, %v2220_v17  ;;  %v2307_v18 = vsub.f32 %v4783_v54, %v2220_v17  ;;  %v2494_v30 = vadd.f32 %v4976_v19, %v4971_v45 }
 0x6e3   :  { %v4984_v31 = vpop.eup %3566  ;;  %2276 = vmax.xlane.f32.xlu1 %v5519_v21  ;;  %v2223_v33 = vpop.xlane.xlu1 %2222 }
 0x6e4   :  { %v2386_v24 = vmul.f32 1.442695, %v2306_v22  ;;  %v2388_v34 = vmul.f32 1.442695, %v2307_v18  ;;  %2495 = vadd.xlane.f32.xlu0 %v2494_v30  ;;  %v2308_v32 = vsub.f32 %v4787_v5, %v2223_v33  ;;  %v2309_v23 = vsub.f32 %v4789_v41, %v2223_v33 }
 0x6e5   :  { %v2497_v51 = vadd.f32 %v4984_v31, %v4978_v3  ;;  %v5521_v22 = vmax.f32 %v4907_v61, %v4909_v49 }
 0x6e6   :  { %3576 = vpow2.f32 %v2386_v24  ;;  %v2390_v54 = vmul.f32 1.442695, %v2308_v32  ;;  %v2392_v27 = vmul.f32 1.442695, %v2309_v23  ;;  %v5522_v23 = vmax.f32 %v4913_v0, %v4915_v7 }
 0x6e7   :  { %3578 = vpow2.f32 %v2388_v34  ;;  %2498 = vadd.xlane.f32.xlu1 %v2497_v51 }
 0x6e8   :  { %v4993_v39 = vpop.eup %3568  ;;  %3580 = vpow2.f32 %v2390_v54  ;;  %2279 = vmax.xlane.f32.xlu0 %v5520_v48 }
 0x6e9   :  { %v4998_v59 = vpop.eup %3570  ;;  %3582 = vpow2.f32 %v2392_v27  ;;  %v2226_v5 = vpop.xlane.xlu0 %2225 }
 0x6ea   :  { %v5000_v41 = vpop.eup %3572  ;;  %v2310_v57 = vsub.f32 %v4793_v8, %v2226_v5  ;;  %v2311_v40 = vsub.f32 %v4795_v20, %v2226_v5  ;;  %v2500_v29 = vadd.f32 %v4998_v59, %v4993_v39 }
 0x6eb   :  { %v5006_v17 = vpop.eup %3574  ;;  %2282 = vmax.xlane.f32.xlu1 %v5521_v22  ;;  %v2229_v18 = vpop.xlane.xlu1 %2228 }
 0x6ec   :  { %v2394_v30 = vmul.f32 1.442695, %v2310_v57  ;;  %v2396_v21 = vmul.f32 1.442695, %v2311_v40  ;;  %2501 = vadd.xlane.f32.xlu0 %v2500_v29  ;;  %v2312_v33 = vsub.f32 %v4799_v12, %v2229_v18  ;;  %v2313_v24 = vsub.f32 %v4801_v44, %v2229_v18 }
 0x6ed   :  { %v2503_v8 = vadd.f32 %v5006_v17, %v5000_v41  ;;  %v5523_v57 = vmax.f32 %v4919_v42, %v4921_v47 }
 0x6ee   :  { %3584 = vpow2.f32 %v2394_v30  ;;  %v2398_v20 = vmul.f32 1.442695, %v2312_v33  ;;  %v2400_v34 = vmul.f32 1.442695, %v2313_v24 }
 0x6ef   :  { %3586 = vpow2.f32 %v2396_v21  ;;  %2504 = vadd.xlane.f32.xlu1 %v2503_v8 }
 0x6f0   :  { %v5015_v32 = vpop.eup %3576  ;;  %3588 = vpow2.f32 %v2398_v20  ;;  %2285 = vmax.xlane.f32.xlu0 %v5522_v23 }
 0x6f1   :  { %v5020_v51 = vpop.eup %3578  ;;  %3590 = vpow2.f32 %v2400_v34  ;;  %v2232_v12 = vpop.xlane.xlu0 %2231 }
 0x6f2   :  { %v5022_v44 = vpop.eup %3580  ;;  %v2314_v54 = vsub.f32 %v4805_v46, %v2232_v12  ;;  %v2315_v27 = vsub.f32 %v4807_v56, %v2232_v12  ;;  %v2506_v48 = vadd.f32 %v5020_v51, %v5015_v32 }
 0x6f3   :  { %v5028_v5 = vpop.eup %3582  ;;  %2288 = vmax.xlane.f32.xlu1 %v5523_v57  ;;  %v2235_v40 = vpop.xlane.xlu1 %2234 }
 0x6f4   :  { %v2402_v29 = vmul.f32 1.442695, %v2314_v54  ;;  %v2404_v22 = vmul.f32 1.442695, %v2315_v27  ;;  %2507 = vadd.xlane.f32.xlu0 %v2506_v48  ;;  %v2316_v18 = vsub.f32 %v4811_v2, %v2235_v40  ;;  %v2317_v30 = vsub.f32 %v4813_v37, %v2235_v40 }
 0x6f5   :  { %v2509_v46 = vadd.f32 %v5028_v5, %v5022_v44 }
 0x6f6   :  { %3592 = vpow2.f32 %v2402_v29  ;;  %v2406_v56 = vmul.f32 1.442695, %v2316_v18  ;;  %v2408_v21 = vmul.f32 1.442695, %v2317_v30 }
 0x6f7   :  { %3594 = vpow2.f32 %v2404_v22  ;;  %2510 = vadd.xlane.f32.xlu1 %v2509_v46 }
 0x6f8   :  { %v5037_v33 = vpop.eup %3584  ;;  %3596 = vpow2.f32 %v2406_v56 }
 0x6f9   :  { %v5039_v24 = vpop.eup %3586  ;;  %3598 = vpow2.f32 %v2408_v21  ;;  %v2238_v8 = vpop.xlane.xlu0 %2237 }
 0x6fa   :  { %v5041_v20 = vpop.eup %3588  ;;  %v2318_v2 = vsub.f32 %v4817_v6, %v2238_v8  ;;  %v2319_v37 = vsub.f32 %v4819_v16, %v2238_v8  ;;  %v2512_v34 = vadd.f32 %v5039_v24, %v5037_v33 }
 0x6fb   :  { %v5047_v23 = vpop.eup %3590  ;;  %v2241_v12 = vpop.xlane.xlu1 %2240 }
 0x6fc   :  { %v2410_v54 = vmul.f32 1.442695, %v2318_v2  ;;  %v2412_v27 = vmul.f32 1.442695, %v2319_v37  ;;  %2513 = vadd.xlane.f32.xlu0 %v2512_v34  ;;  %v2320_v48 = vsub.f32 %v4823_v10, %v2241_v12  ;;  %v2321_v57 = vsub.f32 %v4825_v38, %v2241_v12  ;;  %v5524_v34 = vld [vmem:[#allocation22_spill] sm:$0xff] }
 0x6fd   :  { %v2515_v40 = vadd.f32 %v5047_v23, %v5041_v20 }
 0x6fe   :  { %3600 = vpow2.f32 %v2410_v54  ;;  %v2414_v6 = vmul.f32 1.442695, %v2320_v48  ;;  %v2416_v29 = vmul.f32 1.442695, %v2321_v57 }
 0x6ff   :  { %3602 = vpow2.f32 %v2412_v27  ;;  %2516 = vadd.xlane.f32.xlu1 %v2515_v40 }
 0x700   :  { %v5053_v16 = vpop.eup %3592  ;;  %3604 = vpow2.f32 %v2414_v6 }
 0x701   :  { %v5055_v22 = vpop.eup %3594  ;;  %3606 = vpow2.f32 %v2416_v29  ;;  %v2244_v18 = vpop.xlane.xlu0 %2243  ;;  %v5528_v29 = vld [vmem:[#allocation30_spill] sm:$0xff] }
 0x702   :  { %v5057_v30 = vpop.eup %3596  ;;  %v2322_v10 = vsub.f32 %v4829_v62, %v2244_v18  ;;  %v2323_v38 = vsub.f32 %v4831_v15, %v2244_v18  ;;  %v2518_v46 = vadd.f32 %v5055_v22, %v5053_v16 }
 0x703   :  { %v5063_v56 = vpop.eup %3598  ;;  %v2247_v21 = vpop.xlane.xlu1 %2246 }
 0x704   :  { %v2418_v8 = vmul.f32 1.442695, %v2322_v10  ;;  %v2420_v2 = vmul.f32 1.442695, %v2323_v38  ;;  %2519 = vadd.xlane.f32.xlu0 %v2518_v46  ;;  %v2324_v37 = vsub.f32 %v4835_v52, %v2247_v21  ;;  %v2325_v12 = vsub.f32 %v5524_v34, %v2247_v21  ;;  %v5527_v52 = vld [vmem:[#allocation27_spill] sm:$0xff]  ;;  %v5531_v34 = vld [vmem:[#allocation26_spill] sm:$0xff] }
 0x705   :  { %v2521_v54 = vadd.f32 %v5063_v56, %v5057_v30 }
 0x706   :  { %3608 = vpow2.f32 %v2418_v8  ;;  %v2422_v62 = vmul.f32 1.442695, %v2324_v37  ;;  %v2424_v27 = vmul.f32 1.442695, %v2325_v12 }
 0x707   :  { %3610 = vpow2.f32 %v2420_v2  ;;  %2522 = vadd.xlane.f32.xlu1 %v2521_v54  ;;  %v5530_v2 = vld [vmem:[#allocation29_spill] sm:$0xff] }
 0x708   :  { %v5069_v15 = vpop.eup %3600  ;;  %3612 = vpow2.f32 %v2422_v62 }
 0x709   :  { %5525 = vst [vmem:[#allocation22_spill] sm:$0xff] %v5069_v15  ;;  %v5071_v48 = vpop.eup %3602  ;;  %3614 = vpow2.f32 %v2424_v27  ;;  %v2250_v57 = vpop.xlane.xlu0 %2249 }
 0x70a   :  { %5526 = vst [vmem:[#allocation36_spill] sm:$0xff] %v5071_v48  ;;  %v5073_v40 = vpop.eup %3604  ;;  %v2326_v6 = vsub.f32 %v5527_v52, %v2250_v57  ;;  %v2327_v18 = vsub.f32 %v5528_v29, %v2250_v57  ;;  %v2524_v10 = vadd.f32 %v5071_v48, %v5069_v15  ;;  %v5539_v15 = vld [vmem:[#allocation31_spill] sm:$0xff] }
 0x70b   :  { %v5079_v38 = vpop.eup %3606  ;;  %v2253_v46 = vpop.xlane.xlu1 %2252 }
 0x70c   :  { %5529 = vst [vmem:[#allocation27_spill] sm:$0xff] %v5079_v38  ;;  %v2426_v21 = vmul.f32 1.442695, %v2326_v6  ;;  %v2428_v8 = vmul.f32 1.442695, %v2327_v18  ;;  %2525 = vadd.xlane.f32.xlu0 %v2524_v10  ;;  %v2328_v37 = vsub.f32 %v5530_v2, %v2253_v46  ;;  %v2329_v12 = vsub.f32 %v5531_v34, %v2253_v46  ;;  %v5535_v18 = vld [vmem:[#allocation14_spill] sm:$0xff] }
 0x70d   :  { %v2527_v54 = vadd.f32 %v5079_v38, %v5073_v40  ;;  %v5536_v46 = vld [vmem:[#allocation13_spill] sm:$0xff] }
 0x70e   :  { %3616 = vpow2.f32 %v2426_v21  ;;  %v2430_v62 = vmul.f32 1.442695, %v2328_v37  ;;  %v2432_v27 = vmul.f32 1.442695, %v2329_v12 }
 0x70f   :  { %3618 = vpow2.f32 %v2428_v8  ;;  %2528 = vadd.xlane.f32.xlu1 %v2527_v54  ;;  %v5538_v54 = vld [vmem:[#allocation12_spill] sm:$0xff] }
 0x710   :  { %v5085_v57 = vpop.eup %3608  ;;  %3620 = vpow2.f32 %v2430_v62 }
 0x711   :  { %5532 = vst [vmem:[#allocation30_spill] sm:$0xff] %v5085_v57  ;;  %v5087_v52 = vpop.eup %3610  ;;  %3622 = vpow2.f32 %v2432_v27  ;;  %v2256_v6 = vpop.xlane.xlu0 %2255 }
 0x712   :  { %5533 = vst [vmem:[#allocation29_spill] sm:$0xff] %v5087_v52  ;;  %v5089_v29 = vpop.eup %3612  ;;  %v2330_v10 = vsub.f32 %v5535_v18, %v2256_v6  ;;  %v2331_v2 = vsub.f32 %v5536_v46, %v2256_v6  ;;  %v2530_v21 = vadd.f32 %v5087_v52, %v5085_v57 }
 0x713   :  { %5534 = vst [vmem:[#allocation26_spill] sm:$0xff] %v5089_v29  ;;  %v5095_v37 = vpop.eup %3614  ;;  %v2259_v8 = vpop.xlane.xlu1 %2258 }
 0x714   :  { %5537 = vst [vmem:[#allocation14_spill] sm:$0xff] %v5095_v37  ;;  %v2434_v34 = vmul.f32 1.442695, %v2330_v10  ;;  %v2436_v12 = vmul.f32 1.442695, %v2331_v2  ;;  %2531 = vadd.xlane.f32.xlu0 %v2530_v21  ;;  %v2332_v62 = vsub.f32 %v5538_v54, %v2259_v8  ;;  %v2333_v27 = vsub.f32 %v5539_v15, %v2259_v8  ;;  %v5541_v21 = vld [vmem:[#allocation32_spill] sm:$0xff] }
 0x715   :  { %v2533_v38 = vadd.f32 %v5095_v37, %v5089_v29  ;;  %v5542_v15 = vld [vmem:[#allocation33_spill] sm:$0xff]  ;;  %v5545_v37 = vld [vmem:[#allocation35_spill] sm:$0xff] }
 0x716   :  { %3624 = vpow2.f32 %v2434_v34  ;;  %v2438_v18 = vmul.f32 1.442695, %v2332_v62  ;;  %v2440_v48 = vmul.f32 1.442695, %v2333_v27 }
 0x717   :  { %3626 = vpow2.f32 %v2436_v12  ;;  %2534 = vadd.xlane.f32.xlu1 %v2533_v38 }
 0x718   :  { %v5101_v6 = vpop.eup %3616  ;;  %3628 = vpow2.f32 %v2438_v18  ;;  %v5544_v18 = vld [vmem:[#allocation34_spill] sm:$0xff] }
 0x719   :  { %5540 = vst [vmem:[#allocation13_spill] sm:$0xff] %v5101_v6  ;;  %v5103_v46 = vpop.eup %3618  ;;  %3630 = vpow2.f32 %v2440_v48  ;;  %v2262_v10 = vpop.xlane.xlu0 %2261 }
 0x71a   :  { %v5105_v2 = vpop.eup %3620  ;;  %v2334_v54 = vsub.f32 %v5541_v21, %v2262_v10  ;;  %v2335_v8 = vsub.f32 %v5542_v15, %v2262_v10  ;;  %v2536_v34 = vadd.f32 %v5103_v46, %v5101_v6 }
 0x71b   :  { %v5111_v62 = vpop.eup %3622  ;;  %v2265_v12 = vpop.xlane.xlu1 %2264 }
 0x71c   :  { %5543 = vst [vmem:[#allocation12_spill] sm:$0xff] %v5111_v62  ;;  %v2442_v38 = vmul.f32 1.442695, %v2334_v54  ;;  %v2444_v27 = vmul.f32 1.442695, %v2335_v8  ;;  %2537 = vadd.xlane.f32.xlu0 %v2536_v34  ;;  %v2336_v57 = vsub.f32 %v5544_v18, %v2265_v12  ;;  %v2337_v48 = vsub.f32 %v5545_v37, %v2265_v12 }
 0x71d   :  { %v2539_v52 = vadd.f32 %v5111_v62, %v5105_v2 }
 0x71e   :  { %3632 = vpow2.f32 %v2442_v38  ;;  %v2446_v21 = vmul.f32 1.442695, %v2336_v57  ;;  %v2448_v29 = vmul.f32 1.442695, %v2337_v48 }
 0x71f   :  { %3634 = vpow2.f32 %v2444_v27  ;;  %2540 = vadd.xlane.f32.xlu1 %v2539_v52 }
 0x720   :  { %v5117_v10 = vpop.eup %3624  ;;  %3636 = vpow2.f32 %v2446_v21 }
 0x721   :  { %5546 = vst [vmem:[#allocation31_spill] sm:$0xff] %v5117_v10  ;;  %v5119_v15 = vpop.eup %3626  ;;  %3638 = vpow2.f32 %v2448_v29 }
 0x722   :  { %5547 = vst [vmem:[#allocation32_spill] sm:$0xff] %v5119_v15  ;;  %v5121_v54 = vpop.eup %3628  ;;  %v2542_v8 = vadd.f32 %v5119_v15, %v5117_v10 }
 0x723   :  { %5548 = vst [vmem:[#allocation33_spill] sm:$0xff] %v5121_v54  ;;  %v5125_v37 = vpop.eup %3630 }
 0x724   :  { %5549 = vst [vmem:[#allocation34_spill] sm:$0xff] %v5125_v37  ;;  %2543 = vadd.xlane.f32.xlu0 %v2542_v8  ;;  %v2545_v57 = vadd.f32 %v5125_v37, %v5121_v54 }
 0x726   :  { %2546 = vadd.xlane.f32.xlu1 %v2545_v57 }
 0x728   :  { %v5129_v34 = vpop.eup %3632 }
 0x729   :  { %5550 = vst [vmem:[#allocation35_spill] sm:$0xff] %v5129_v34  ;;  %v5131_v52 = vpop.eup %3634 }
 0x72a   :  { %5551 = vst [vmem:[#allocation37_spill] sm:$0xff] %v5131_v52  ;;  %v5133_v12 = vpop.eup %3636  ;;  %v2548_v29 = vadd.f32 %v5131_v52, %v5129_v34 }
 0x72b   :  { %5552 = vst [vmem:[#allocation38_spill] sm:$0xff] %v5133_v12  ;;  %v5137_v38 = vpop.eup %3638 }
 0x72c   :  { %5553 = vst [vmem:[#allocation39_spill] sm:$0xff] %v5137_v38  ;;  %2549 = vadd.xlane.f32.xlu0 %v2548_v29  ;;  %v2551_v27 = vadd.f32 %v5137_v38, %v5133_v12 }
 0x72e   :  { %2552 = vadd.xlane.f32.xlu1 %v2551_v27 }
 0x761   :  { %v2484_v18 = vpop.xlane.xlu0 %2483 }
 0x762   :  { %3640 = vrcp.f32 %v2484_v18 }
 0x764   :  { %v2487_v48 = vpop.xlane.xlu1 %2486 }
 0x765   :  { %3642 = vrcp.f32 %v2487_v48  ;;  %v2268_v21 = vpop.xlane.xlu0 %2267 }
 0x766   :  { %v2338_v8 = vsub.f32 %v4877_v60, %v2268_v21  ;;  %v2339_v57 = vsub.f32 %v4879_v26, %v2268_v21 }
 0x768   :  { %v2450_v10 = vmul.f32 1.442695, %v2338_v8  ;;  %v2452_v37 = vmul.f32 1.442695, %v2339_v57  ;;  %v2271_v15 = vpop.xlane.xlu1 %2270 }
 0x769   :  { %v2340_v34 = vsub.f32 %v4883_v55, %v2271_v15  ;;  %v2341_v29 = vsub.f32 %v4885_v35, %v2271_v15  ;;  %v2490_v52 = vpop.xlane.xlu0 %2489 }
 0x76a   :  { %3644 = vpow2.f32 %v2450_v10 }
 0x76b   :  { %3646 = vpow2.f32 %v2452_v37  ;;  %v2454_v27 = vmul.f32 1.442695, %v2340_v34  ;;  %v2456_v38 = vmul.f32 1.442695, %v2341_v29 }
 0x76c   :  { %v3641_v12 = vpop.eup %3640  ;;  %3648 = vrcp.f32 %v2490_v52  ;;  %v2493_v54 = vpop.xlane.xlu1 %2492 }
 0x76d   :  { %v2610_v6 = vmul.f32 %v3641_v12, %v2484_v18  ;;  %3650 = vpow2.f32 %v2454_v27  ;;  %v2274_v60 = vpop.xlane.xlu0 %2273 }
 0x76e   :  { %3652 = vpow2.f32 %v2456_v38  ;;  %v2342_v26 = vsub.f32 %v4889_v14, %v2274_v60  ;;  %v2343_v21 = vsub.f32 %v4891_v63, %v2274_v60 }
 0x76f   :  { %v3643_v8 = vpop.eup %3642  ;;  %v2642_v55 = vsub.f32 2.0, %v2610_v6  ;;  %3654 = vrcp.f32 %v2493_v54 }
 0x770   :  { %v2611_v35 = vmul.f32 %v3643_v8, %v2487_v48  ;;  %v2458_v15 = vmul.f32 1.442695, %v2342_v26  ;;  %v2460_v10 = vmul.f32 1.442695, %v2343_v21  ;;  %v2277_v37 = vpop.xlane.xlu1 %2276 }
 0x771   :  { %v2674_v34 = vmul.f32 %v3641_v12, %v2642_v55  ;;  %v2344_v57 = vsub.f32 %v4895_v4, %v2277_v37  ;;  %v2345_v29 = vsub.f32 %v4897_v58, %v2277_v37  ;;  %v2496_v18 = vpop.xlane.xlu0 %2495 }
 0x772   :  { %v2643_v27 = vsub.f32 2.0, %v2611_v35  ;;  %3656 = vpow2.f32 %v2458_v15 }
 0x773   :  { %3658 = vpow2.f32 %v2460_v10  ;;  %v2462_v38 = vmul.f32 1.442695, %v2344_v57  ;;  %v2464_v14 = vmul.f32 1.442695, %v2345_v29  ;;  %v2706_v12 = vmul.f32 %v4933_v25, %v2674_v34 }
 0x774   :  { %v5149_v62 = vpop.eup %3644  ;;  %v2675_v63 = vmul.f32 %v3643_v8, %v2643_v27  ;;  %3660 = vrcp.f32 %v2496_v18  ;;  %v5151_v6 = vpop.xlane.xlu1 %2498  ;;  %v2707_v58 = vmul.f32 %v4935_v1, %v2674_v34 }
 0x775   :  { %v5153_v48 = vpop.eup %3646  ;;  %3662 = vpow2.f32 %v2462_v38  ;;  %v2280_v4 = vpop.xlane.xlu0 %2279 }
 0x776   :  { %v3649_v60 = vpop.eup %3648  ;;  %v2708_v26 = vmul.f32 %v4937_v36, %v2675_v63  ;;  %3664 = vpow2.f32 %v2464_v14  ;;  %v2346_v21 = vsub.f32 %v4901_v53, %v2280_v4  ;;  %v2347_v55 = vsub.f32 %v4903_v43, %v2280_v4 }
 0x777   :  { %v5160_v8 = vpop.eup %3650  ;;  %v2612_v35 = vmul.f32 %v3649_v60, %v2490_v52  ;;  %3666 = vrcp.f32 %v5151_v6  ;;  %v2554_v25 = vadd.f32 %v5153_v48, %v5149_v62  ;;  %v2709_v15 = vmul.f32 %v4943_v13, %v2675_v63 }
 0x778   :  { %v5166_v10 = vpop.eup %3652  ;;  %v2466_v1 = vmul.f32 1.442695, %v2346_v21  ;;  %v2468_v37 = vmul.f32 1.442695, %v2347_v55  ;;  %v2283_v36 = vpop.xlane.xlu1 %2282  ;;  %v2770_v34 = vpack.c.bf16 %v2708_v26, %v2706_v12 }
 0x779   :  { %v3655_v57 = vpop.eup %3654  ;;  %v2644_v53 = vsub.f32 2.0, %v2612_v35  ;;  %2555 = vadd.xlane.f32.xlu0 %v2554_v25  ;;  %v2348_v43 = vsub.f32 %v4907_v61, %v2283_v36  ;;  %v2349_v52 = vsub.f32 %v4909_v49, %v2283_v36  ;;  %v5170_v29 = vpop.xlane.xlu0 %2501  ;;  %v2771_v27 = vpack.c.bf16 %v2709_v15, %v2707_v58 }
 0x77a   :  { %v2613_v38 = vmul.f32 %v3655_v57, %v2493_v54  ;;  %3668 = vpow2.f32 %v2466_v1  ;;  %v2557_v13 = vadd.f32 %v5166_v10, %v5160_v8 }
 0x77b   :  { %v2676_v14 = vmul.f32 %v3649_v60, %v2644_v53  ;;  %3670 = vpow2.f32 %v2468_v37  ;;  %v2470_v63 = vmul.f32 1.442695, %v2348_v43  ;;  %v2472_v4 = vmul.f32 1.442695, %v2349_v52  ;;  %2802 = vmatprep.subr.bf16.mxu0 %v2771_v27 }
 0x77c   :  { %v5174_v12 = vpop.eup %3656  ;;  %v2645_v26 = vsub.f32 2.0, %v2613_v38  ;;  %3672 = vrcp.f32 %v5170_v29  ;;  %2558 = vadd.xlane.f32.xlu1 %v2557_v13  ;;  %2803 = vmatpush1.bf16.xpose.msra.mxu0 %v2770_v34  ;;  %v2505_v61 = vpop.xlane.xlu1 %2504 }
 0x77d   :  { %v5177_v49 = vpop.eup %3658  ;;  %v2710_v54 = vmul.f32 %v4949_v11, %v2676_v14  ;;  %3674 = vpow2.f32 %v2470_v63  ;;  %v2286_v58 = vpop.xlane.xlu0 %2285  ;;  %v2711_v37 = vmul.f32 %v4954_v28, %v2676_v14 }
 0x77e   :  { %v3661_v21 = vpop.eup %3660  ;;  %v2677_v60 = vmul.f32 %v3655_v57, %v2645_v26  ;;  %3676 = vpow2.f32 %v2472_v4  ;;  %v2350_v55 = vsub.f32 %v4913_v0, %v2286_v58  ;;  %v2351_v35 = vsub.f32 %v4915_v7, %v2286_v58 }
 0x77f   :  { %v5182_v25 = vpop.eup %3662  ;;  %v2614_v15 = vmul.f32 %v3661_v21, %v2496_v18  ;;  %3678 = vrcp.f32 %v2505_v61  ;;  %v2560_v1 = vadd.f32 %v5177_v49, %v5174_v12 }
 0x780   :  { %v5187_v36 = vpop.eup %3664  ;;  %v2712_v11 = vmul.f32 %v4956_v50, %v2677_v60  ;;  %v2474_v34 = vmul.f32 1.442695, %v2350_v55  ;;  %v2476_v57 = vmul.f32 1.442695, %v2351_v35  ;;  %v2289_v53 = vpop.xlane.xlu1 %2288  ;;  %v2713_v0 = vmul.f32 %v4962_v9, %v2677_v60 }
 0x781   :  { %v3667_v43 = vpop.eup %3666  ;;  %v2646_v7 = vsub.f32 2.0, %v2614_v15  ;;  %2561 = vadd.xlane.f32.xlu0 %v2560_v1  ;;  %v2352_v18 = vsub.f32 %v4919_v42, %v2289_v53  ;;  %v2353_v52 = vsub.f32 %v4921_v47, %v2289_v53  ;;  %v2508_v27 = vpop.xlane.xlu0 %2507  ;;  %v2563_v28 = vadd.f32 %v5187_v36, %v5182_v25 }
 0x782   :  { %v2615_v38 = vmul.f32 %v3667_v43, %v5151_v6  ;;  %3680 = vpow2.f32 %v2474_v34  ;;  %v2773_v50 = vpack.c.bf16 %v2713_v0, %v2711_v37  ;;  %v2772_v13 = vpack.c.bf16 %v2712_v11, %v2710_v54 }
 0x783   :  { %3682 = vpow2.f32 %v2476_v57  ;;  %v2478_v14 = vmul.f32 1.442695, %v2352_v18  ;;  %v2480_v63 = vmul.f32 1.442695, %v2353_v52  ;;  %2564 = vadd.xlane.f32.xlu1 %v2563_v28  ;;  %v2678_v4 = vmul.f32 %v3661_v21, %v2646_v7 }
 0x784   :  { %v5196_v9 = vpop.eup %3668  ;;  %v2647_v26 = vsub.f32 2.0, %v2615_v38  ;;  %3684 = vrcp.f32 %v2508_v27  ;;  %2804 = vmatprep.subr.bf16.mxu0 %v2773_v50  ;;  %v2511_v47 = vpop.xlane.xlu1 %2510 }
 0x785   :  { %v5198_v42 = vpop.eup %3670  ;;  %3686 = vpow2.f32 %v2478_v14  ;;  %2805 = vmatpush1.bf16.xpose.msra.mxu0 %v2772_v13  ;;  %v2714_v35 = vmul.f32 %v4971_v45, %v2678_v4  ;;  %v2715_v1 = vmul.f32 %v4976_v19, %v2678_v4 }
 0x786   :  { %v3673_v58 = vpop.eup %3672  ;;  %v2679_v6 = vmul.f32 %v3667_v43, %v2647_v26  ;;  %3688 = vpow2.f32 %v2480_v63  ;;  %v2566_v54 = vadd.f32 %v5198_v42, %v5196_v9 }
 0x787   :  { %v5202_v60 = vpop.eup %3674  ;;  %v2616_v55 = vmul.f32 %v3673_v58, %v5170_v29  ;;  %3690 = vrcp.f32 %v2511_v47 }
 0x788   :  { %v5205_v21 = vpop.eup %3676  ;;  %v2716_v15 = vmul.f32 %v4978_v3, %v2679_v6  ;;  %2567 = vadd.xlane.f32.xlu0 %v2566_v54  ;;  %v2717_v37 = vmul.f32 %v4984_v31, %v2679_v6 }
 0x789   :  { %v3679_v11 = vpop.eup %3678  ;;  %v2648_v34 = vsub.f32 2.0, %v2616_v55  ;;  %v2514_v57 = vpop.xlane.xlu0 %2513  ;;  %v2569_v53 = vadd.f32 %v5205_v21, %v5202_v60 }
 0x78a   :  { %v2617_v0 = vmul.f32 %v3679_v11, %v2505_v61  ;;  %3692 = vrcp.f32 %v2514_v57  ;;  %v2775_v29 = vpack.c.bf16 %v2717_v37, %v2715_v1  ;;  %v2774_v43 = vpack.c.bf16 %v2716_v15, %v2714_v35 }
 0x78b   :  { %2570 = vadd.xlane.f32.xlu1 %v2569_v53  ;;  %v2680_v45 = vmul.f32 %v3673_v58, %v2648_v34 }
 0x78c   :  { %v5213_v7 = vpop.eup %3680  ;;  %v2649_v3 = vsub.f32 2.0, %v2617_v0  ;;  %2806 = vmatprep.subr.bf16.mxu0 %v2775_v29  ;;  %v2517_v18 = vpop.xlane.xlu1 %2516 }
 0x78d   :  { %v5215_v19 = vpop.eup %3682  ;;  %2807 = vmatpush1.bf16.xpose.msra.mxu0 %v2774_v43  ;;  %3694 = vrcp.f32 %v2517_v18  ;;  %v2718_v13 = vmul.f32 %v4993_v39, %v2680_v45  ;;  %v2719_v63 = vmul.f32 %v4998_v59, %v2680_v45 }
 0x78e   :  { %v3685_v31 = vpop.eup %3684  ;;  %v2681_v52 = vmul.f32 %v3679_v11, %v2649_v3  ;;  %v2572_v28 = vadd.f32 %v5215_v19, %v5213_v7 }
 0x78f   :  { %v5219_v61 = vpop.eup %3686  ;;  %v2618_v38 = vmul.f32 %v3685_v31, %v2508_v27 }
 0x790   :  { %v5221_v50 = vpop.eup %3688  ;;  %v2720_v14 = vmul.f32 %v5000_v41, %v2681_v52  ;;  %2573 = vadd.xlane.f32.xlu0 %v2572_v28  ;;  %v2721_v4 = vmul.f32 %v5006_v17, %v2681_v52 }
 0x791   :  { %v3691_v26 = vpop.eup %3690  ;;  %v2650_v58 = vsub.f32 2.0, %v2618_v38  ;;  %v2520_v6 = vpop.xlane.xlu0 %2519  ;;  %v2575_v54 = vadd.f32 %v5221_v50, %v5219_v61 }
 0x792   :  { %v2619_v55 = vmul.f32 %v3691_v26, %v2511_v47  ;;  %3696 = vrcp.f32 %v2520_v6  ;;  %v2777_v27 = vpack.c.bf16 %v2721_v4, %v2719_v63  ;;  %v2776_v35 = vpack.c.bf16 %v2720_v14, %v2718_v13 }
 0x793   :  { %v2682_v15 = vmul.f32 %v3685_v31, %v2650_v58  ;;  %2576 = vadd.xlane.f32.xlu1 %v2575_v54 }
 0x794   :  { %v3693_v39 = vpop.eup %3692  ;;  %v2651_v1 = vsub.f32 2.0, %v2619_v55  ;;  %2808 = vmatprep.subr.bf16.mxu0 %v2777_v27  ;;  %v2523_v41 = vpop.xlane.xlu1 %2522 }
 0x795   :  { %v2620_v37 = vmul.f32 %v3693_v39, %v2514_v57  ;;  %2809 = vmatpush1.bf16.xpose.msra.mxu0 %v2776_v35  ;;  %3698 = vrcp.f32 %v2523_v41  ;;  %v2722_v11 = vmul.f32 %v5015_v32, %v2682_v15  ;;  %v2723_v0 = vmul.f32 %v5020_v51, %v2682_v15  ;;  %v1388_v35 = vld [vmem:[%s5347_s4 + $0x10] sm:$0xff] }
 0x796   :  { %v2683_v59 = vmul.f32 %v3691_v26, %v2651_v1 }
 0x797   :  { %v3695_v17 = vpop.eup %3694  ;;  %v2652_v34 = vsub.f32 2.0, %v2620_v37 }
 0x798   :  { %v2724_v53 = vmul.f32 %v5022_v44, %v2683_v59  ;;  %v2621_v47 = vmul.f32 %v3695_v17, %v2517_v18  ;;  %v2725_v29 = vmul.f32 %v5028_v5, %v2683_v59 }
 0x799   :  { %v2684_v43 = vmul.f32 %v3693_v39, %v2652_v34  ;;  %v2526_v45 = vpop.xlane.xlu0 %2525 }
 0x79a   :  { %v2653_v3 = vsub.f32 2.0, %v2621_v47  ;;  %3700 = vrcp.f32 %v2526_v45  ;;  %v2779_v31 = vpack.c.bf16 %v2725_v29, %v2723_v0  ;;  %v2778_v57 = vpack.c.bf16 %v2724_v53, %v2722_v11  ;;  %v1389_v47 = vld [vmem:[%s5347_s4 + $0x18] sm:$0xff] }
 0x79b   :  { %v2727_v44 = vmul.f32 %v5039_v24, %v2684_v43  ;;  %v2726_v18 = vmul.f32 %v5037_v33, %v2684_v43  ;;  %v1386_v24 = vld [vmem:[%s5347_s4] sm:$0xff] }
 0x79c   :  { %v3697_v52 = vpop.eup %3696  ;;  %v2685_v28 = vmul.f32 %v3695_v17, %v2653_v3  ;;  %2810 = vmatprep.subr.bf16.mxu0 %v2779_v31  ;;  %v2529_v38 = vpop.xlane.xlu1 %2528  ;;  %v5555_v31 = vld [vmem:[#allocation27_spill] sm:$0xff] }
 0x79d   :  { %v2622_v13 = vmul.f32 %v3697_v52, %v2520_v6  ;;  %2811 = vmatpush1.bf16.xpose.msra.mxu0 %v2778_v57  ;;  %3702 = vrcp.f32 %v2529_v38  ;;  %v1387_v6 = vld [vmem:[%s5347_s4 + $0x8] sm:$0xff] }
 0x79e   :  { %v2728_v32 = vmul.f32 %v5041_v20, %v2685_v28  ;;  %v2729_v51 = vmul.f32 %v5047_v23, %v2685_v28  ;;  %v5556_v28 = vld [vmem:[#allocation22_spill] sm:$0xff] }
 0x79f   :  { %v3699_v5 = vpop.eup %3698  ;;  %v2654_v14 = vsub.f32 2.0, %v2622_v13 }
 0x7a0   :  { %v2623_v63 = vmul.f32 %v3699_v5, %v2523_v41  ;;  %v2781_v4 = vpack.c.bf16 %v2729_v51, %v2727_v44  ;;  %v2780_v58 = vpack.c.bf16 %v2728_v32, %v2726_v18 }
 0x7a1   :  { %v2532_v26 = vpop.xlane.xlu0 %2531  ;;  %v2686_v54 = vmul.f32 %v3697_v52, %v2654_v14 }
 0x7a2   :  { %v2655_v55 = vsub.f32 2.0, %v2623_v63  ;;  %3704 = vrcp.f32 %v2532_v26  ;;  %2812 = vmatprep.subr.bf16.mxu0 %v2781_v4 }
 0x7a3   :  { %v2731_v39 = vmul.f32 %v5055_v22, %v2686_v54  ;;  %v2730_v37 = vmul.f32 %v5053_v16, %v2686_v54 }
 0x7a4   :  { %v3701_v20 = vpop.eup %3700  ;;  %v2687_v23 = vmul.f32 %v3699_v5, %v2655_v55  ;;  %1397 = vperm.xlu1 %3351, %v1387_v6   ;;  %v2535_v33 = vpop.xlane.xlu1 %2534  ;;  %v5558_v55 = vld [vmem:[#allocation29_spill] sm:$0xff] }
 0x7a5   :  { %v2624_v27 = vmul.f32 %v3701_v20, %v2526_v45  ;;  %2813 = vmatpush1.bf16.xpose.msra.mxu0 %v2780_v58  ;;  %3706 = vrcp.f32 %v2535_v33  ;;  %v5554_v45 = vld [vmem:[#allocation36_spill] sm:$0xff]  ;;  %v5557_v58 = vld [vmem:[#allocation26_spill] sm:$0xff] }
 0x7a6   :  { %v2732_v15 = vmul.f32 %v5057_v30, %v2687_v23  ;;  %1392 = vperm.xlu0 %3350, %v1386_v24   ;;  %v2733_v1 = vmul.f32 %v5063_v56, %v2687_v23  ;;  %v5559_v23 = vld [vmem:[#allocation14_spill] sm:$0xff] }
 0x7a7   :  { %v3703_v41 = vpop.eup %3702  ;;  %v2656_v59 = vsub.f32 2.0, %v2624_v27  ;;  %v5560_v27 = vld [vmem:[#allocation30_spill] sm:$0xff] }
 0x7a8   :  { %v2625_v17 = vmul.f32 %v3703_v41, %v2529_v38  ;;  %1402 = vperm.xlu1 %3351, %v1388_v35   ;;  %v2783_v11 = vpack.c.bf16 %v2733_v1, %v2731_v39  ;;  %v2782_v53 = vpack.c.bf16 %v2732_v15, %v2730_v37 }
 0x7a9   :  { %v2538_v34 = vpop.xlane.xlu0 %2537  ;;  %v2688_v0 = vmul.f32 %v3701_v20, %v2656_v59 }
 0x7aa   :  { %v2657_v30 = vsub.f32 2.0, %v2625_v17  ;;  %3708 = vrcp.f32 %v2538_v34  ;;  %2814 = vmatprep.subr.bf16.mxu0 %v2783_v11 }
 0x7ab   :  { %v2735_v3 = vmul.f32 %v5554_v45, %v2688_v0  ;;  %v2734_v38 = vmul.f32 %v5556_v28, %v2688_v0 }
 0x7ac   :  { %v3705_v22 = vpop.eup %3704  ;;  %v2689_v29 = vmul.f32 %v3703_v41, %v2657_v30  ;;  %1407 = vperm.xlu1 %3351, %v1389_v47   ;;  %v2541_v56 = vpop.xlane.xlu1 %2540 }
 0x7ad   :  { %v2626_v43 = vmul.f32 %v3705_v22, %v2532_v26  ;;  %2815 = vmatpush1.bf16.xpose.msra.mxu0 %v2782_v53  ;;  %3710 = vrcp.f32 %v2541_v56 }
 0x7ae   :  { %v2736_v16 = vmul.f32 %v5073_v40, %v2689_v29  ;;  %v2737_v57 = vmul.f32 %v5555_v31, %v2689_v29 }
 0x7af   :  { %v3707_v52 = vpop.eup %3706  ;;  %v2658_v13 = vsub.f32 2.0, %v2626_v43  ;;  %v5562_v43 = vld [vmem:[#allocation13_spill] sm:$0xff] }
 0x7b0   :  { %v2627_v32 = vmul.f32 %v3707_v52, %v2535_v33  ;;  %v2785_v44 = vpack.c.bf16 %v2737_v57, %v2735_v3  ;;  %2865 = vperm.xlu1 %3351, %v1386_v24   ;;  %v2784_v5 = vpack.c.bf16 %v2736_v16, %v2734_v38 }
 0x7b1   :  { %v2544_v51 = vpop.xlane.xlu0 %2543  ;;  %v2690_v18 = vmul.f32 %v3705_v22, %v2658_v13  ;;  %v5563_v13 = vld [vmem:[#allocation33_spill] sm:$0xff] }
 0x7b2   :  { %v2659_v14 = vsub.f32 2.0, %v2627_v32  ;;  %3712 = vrcp.f32 %v2544_v51  ;;  %2816 = vmatprep.subr.bf16.mxu0 %v2785_v44 }
 0x7b3   :  { %v2547_v63 = vpop.xlane.xlu1 %2546  ;;  %v2739_v20 = vmul.f32 %v5558_v55, %v2690_v18  ;;  %v2738_v15 = vmul.f32 %v5560_v27, %v2690_v18 }
 0x7b4   :  { %v3709_v4 = vpop.eup %3708  ;;  %v2691_v40 = vmul.f32 %v3707_v52, %v2659_v14  ;;  %3714 = vrcp.f32 %v2547_v63  ;;  %2870 = vperm.xlu1 %3351, %v1387_v6   ;;  %v5566_v14 = vld [vmem:[#allocation31_spill] sm:$0xff] }
 0x7b5   :  { %v2628_v26 = vmul.f32 %v3709_v4, %v2538_v34  ;;  %2817 = vmatpush1.bf16.xpose.msra.mxu0 %v2784_v5 }
 0x7b6   :  { %v2740_v54 = vmul.f32 %v5557_v58, %v2691_v40  ;;  %v2741_v33 = vmul.f32 %v5559_v23, %v2691_v40  ;;  %v5567_v23 = vld [vmem:[#allocation38_spill] sm:$0xff] }
 0x7b7   :  { %v3711_v24 = vpop.eup %3710  ;;  %v2660_v39 = vsub.f32 2.0, %v2628_v26 }
 0x7b8   :  { %v2629_v1 = vmul.f32 %v3711_v24, %v2541_v56  ;;  %v2787_v41 = vpack.c.bf16 %v2741_v33, %v2739_v20  ;;  %2875 = vperm.xlu1 %3351, %v1388_v35   ;;  %v2786_v59 = vpack.c.bf16 %v2740_v54, %v2738_v15  ;;  %v5561_v56 = vld [vmem:[#allocation12_spill] sm:$0xff]  ;;  %v5569_v15 = vld [vmem:[#allocation39_spill] sm:$0xff] }
 0x7b9   :  { %v2550_v37 = vpop.xlane.xlu0 %2549  ;;  %v2692_v17 = vmul.f32 %v3709_v4, %v2660_v39 }
 0x7ba   :  { %v2661_v11 = vsub.f32 2.0, %v2629_v1  ;;  %3716 = vrcp.f32 %v2550_v37  ;;  %2818 = vmatprep.subr.bf16.mxu0 %v2787_v41  ;;  %v5570_v1 = vld [vmem:[#allocation35_spill] sm:$0xff] }
 0x7bb   :  { %v2553_v6 = vpop.xlane.xlu1 %2552  ;;  %v2743_v29 = vmul.f32 %v5103_v46, %v2692_v17  ;;  %v2742_v16 = vmul.f32 %v5562_v43, %v2692_v17  ;;  %v5565_v46 = vld [vmem:[#allocation34_spill] sm:$0xff] }
 0x7bc   :  { %v3713_v34 = vpop.eup %3712  ;;  %v2693_v53 = vmul.f32 %v3711_v24, %v2661_v11  ;;  %3718 = vrcp.f32 %v2553_v6  ;;  %2880 = vperm.xlu1 %3351, %v1389_v47   ;;  %v5568_v24 = vld [vmem:[#allocation37_spill] sm:$0xff] }
 0x7bd   :  { %v2630_v0 = vmul.f32 %v3713_v34, %v2544_v51  ;;  %2819 = vmatpush1.bf16.xpose.msra.mxu0 %v2786_v59 }
 0x7be   :  { %v3715_v30 = vpop.eup %3714  ;;  %v2744_v22 = vmul.f32 %v5105_v2, %v2693_v53  ;;  %v2745_v35 = vmul.f32 %v5561_v56, %v2693_v53  ;;  %v5564_v2 = vld [vmem:[#allocation32_spill] sm:$0xff] }
 0x7bf   :  { %v2662_v45 = vsub.f32 2.0, %v2630_v0  ;;  %v2631_v3 = vmul.f32 %v3715_v30, %v2547_v63 }
 0x7c0   :  { %v2789_v31 = vpack.c.bf16 %v2745_v35, %v2743_v29  ;;  %v2788_v28 = vpack.c.bf16 %v2744_v22, %v2742_v16 }
 0x7c1   :  { %v2694_v57 = vmul.f32 %v3713_v34, %v2662_v45  ;;  %v2663_v52 = vsub.f32 2.0, %v2631_v3 }
 0x7c2   :  { %2820 = vmatprep.subr.bf16.mxu0 %v2789_v31 }
 0x7c3   :  { %v2695_v38 = vmul.f32 %v3715_v30, %v2663_v52  ;;  %v2747_v51 = vmul.f32 %v5564_v2, %v2694_v57  ;;  %v2746_v4 = vmul.f32 %v5566_v14, %v2694_v57 }
 0x7c4   :  { %v3717_v47 = vpop.eup %3716 }
 0x7c5   :  { %v2748_v32 = vmul.f32 %v5563_v13, %v2695_v38  ;;  %v2632_v44 = vmul.f32 %v3717_v47, %v2550_v37  ;;  %2821 = vmatpush1.bf16.xpose.msra.mxu0 %v2788_v28  ;;  %v2749_v5 = vmul.f32 %v5565_v46, %v2695_v38 }
 0x7c6   :  { %v3719_v18 = vpop.eup %3718 }
 0x7c7   :  { %v2664_v40 = vsub.f32 2.0, %v2632_v44  ;;  %v2633_v63 = vmul.f32 %v3719_v18, %v2553_v6  ;;  %v2791_v26 = vpack.c.bf16 %v2749_v5, %v2747_v51  ;;  %v2790_v55 = vpack.c.bf16 %v2748_v32, %v2746_v4 }
 0x7c9   :  { %v2696_v58 = vmul.f32 %v3717_v47, %v2664_v40  ;;  %v2665_v54 = vsub.f32 2.0, %v2633_v63  ;;  %2822 = vmatprep.subr.bf16.mxu0 %v2791_v26 }
 0x7cb   :  { %v2697_v20 = vmul.f32 %v3719_v18, %v2665_v54  ;;  %v2751_v27 = vmul.f32 %v5568_v24, %v2696_v58  ;;  %v2750_v41 = vmul.f32 %v5570_v1, %v2696_v58  ;;  %v5284_v54 = vstv %s5348_s5  ;;  %v5574_v1 = vld [vmem:[#allocation20_spill] sm:$0xff]  ;;  %s3816_s5 = smov [#allocation8]  }
 0x7cc   :  { %s3006_s26 = sshll.u32 %s3816_s5, 4  ;;  %s3007_s26 = int_to_ptr.vmem [resolvable:$true] %s3006_s26 }
 0x7cd   :  { %v2752_v33 = vmul.f32 %v5567_v23, %v2697_v20  ;;  %2823 = vmatpush1.bf16.xpose.msra.mxu0 %v2790_v55  ;;  %v2753_v39 = vmul.f32 %v5569_v15, %v2697_v20  ;;  %s3780_s27 = scalar_lea.vmem %s3007_s26, 2048  ;;  %p3785_p3 = scmp.lt.s32.totalorder %s3007_s26, %s3007_s26 }
 0x7ce   :  { %p3781_p2 = scmp.ne.s32.totalorder %s3007_s26, %s3780_s27  ;;  %p3786_p4 = scmp.lt.s32.totalorder %s3780_s27, %s3780_s27 }
 0x7cf   :  { %v2793_v37 = vpack.c.bf16 %v2753_v39, %v2751_v27  ;;  %v2792_v59 = vpack.c.bf16 %v2752_v33, %v2750_v41  ;;  %v5571_v33 = vld [vmem:[#allocation19_spill] sm:$0xff]  ;;  %v5573_v39 = vld [vmem:[#allocation18_spill] sm:$0xff] }
 0x7d0   :  { %p3787_p5 = por %p3786_p4, %p3785_p3 }
 0x7d1   :  { %2824 = vmatprep.subr.bf16.mxu0 %v2793_v37 }
 0x7d2   :  { %p3788_p6 = pnand %p3787_p5, %p3781_p2 }
 0x7d5   :  { %2825 = vmatpush1.bf16.xpose.msra.mxu0 %v2792_v59 }
 0x806   :  { %v2556_v17 = vpop.xlane.xlu0 %2555 }
 0x807   :  { %3720 = vrcp.f32 %v2556_v17 }
 0x809   :  { %v2559_v11 = vpop.xlane.xlu1 %2558 }
 0x80a   :  { %3722 = vrcp.f32 %v2559_v11 }
 0x80e   :  { %v2562_v6 = vpop.xlane.xlu0 %2561 }
 0x80f   :  { %3724 = vrcp.f32 %v2562_v6 }
 0x810   :  { %v2565_v34 = vpop.xlane.xlu1 %2564 }
 0x811   :  { %v3721_v53 = vpop.eup %3720  ;;  %3726 = vrcp.f32 %v2565_v34 }
 0x812   :  { %v2634_v0 = vmul.f32 %v3721_v53, %v2556_v17 }
 0x814   :  { %v3723_v30 = vpop.eup %3722  ;;  %v2666_v22 = vsub.f32 2.0, %v2634_v0 }
 0x815   :  { %v2635_v29 = vmul.f32 %v3723_v30, %v2559_v11  ;;  %v2568_v56 = vpop.xlane.xlu0 %2567 }
 0x816   :  { %3728 = vrcp.f32 %v2568_v56  ;;  %v2698_v35 = vmul.f32 %v3721_v53, %v2666_v22 }
 0x817   :  { %v2667_v43 = vsub.f32 2.0, %v2635_v29  ;;  %v5576_v29 = vld [vmem:[#allocation23_spill] sm:$0xff] }
 0x818   :  { %v2571_v16 = vpop.xlane.xlu1 %2570  ;;  %v2754_v52 = vmul.f32 %v5149_v62, %v2698_v35  ;;  %v2755_v38 = vmul.f32 %v5153_v48, %v2698_v35 }
 0x819   :  { %v3725_v45 = vpop.eup %3724  ;;  %v2699_v3 = vmul.f32 %v3723_v30, %v2667_v43  ;;  %3730 = vrcp.f32 %v2571_v16  ;;  %v5575_v30 = vld [vmem:[#allocation21_spill] sm:$0xff] }
 0x81a   :  { %v2636_v31 = vmul.f32 %v3725_v45, %v2562_v6 }
 0x81b   :  { %v3727_v57 = vpop.eup %3726  ;;  %v2756_v28 = vmul.f32 %v5160_v8, %v2699_v3  ;;  %v2757_v47 = vmul.f32 %v5166_v10, %v2699_v3 }
 0x81c   :  { %v2668_v13 = vsub.f32 2.0, %v2636_v31  ;;  %v2637_v32 = vmul.f32 %v3727_v57, %v2565_v34 }
 0x81d   :  { %v2574_v44 = vpop.xlane.xlu0 %2573  ;;  %v2795_v2 = vpack.c.bf16 %v2757_v47, %v2755_v38  ;;  %v2794_v51 = vpack.c.bf16 %v2756_v28, %v2754_v52 }
 0x81e   :  { %v2700_v46 = vmul.f32 %v3725_v45, %v2668_v13  ;;  %v2669_v5 = vsub.f32 2.0, %v2637_v32  ;;  %3732 = vrcp.f32 %v2574_v44  ;;  %v5578_v32 = vld [vmem:[#allocation24_spill] sm:$0xff] }
 0x81f   :  { %2826 = vmatprep.subr.bf16.mxu0 %v2795_v2 }
 0x820   :  { %v3729_v18 = vpop.eup %3728  ;;  %v2701_v14 = vmul.f32 %v3727_v57, %v2669_v5  ;;  %2827 = vmatpush1.bf16.xpose.msra.mxu0 %v2794_v51  ;;  %v2577_v4 = vpop.xlane.xlu1 %2576  ;;  %v2758_v8 = vmul.f32 %v5174_v12, %v2700_v46  ;;  %v2759_v10 = vmul.f32 %v5177_v49, %v2700_v46  ;;  %v5572_v12 = vld [vmem:[#allocation17_spill] sm:$0xff] }
 0x821   :  { %v2638_v62 = vmul.f32 %v3729_v18, %v2568_v56  ;;  %3734 = vrcp.f32 %v2577_v4 }
 0x822   :  { %v2760_v48 = vmul.f32 %v5182_v25, %v2701_v14  ;;  %v2761_v40 = vmul.f32 %v5187_v36, %v2701_v14 }
 0x823   :  { %v3731_v63 = vpop.eup %3730  ;;  %v2670_v26 = vsub.f32 2.0, %v2638_v62 }
 0x824   :  { %v2639_v58 = vmul.f32 %v3731_v63, %v2571_v16  ;;  %v1398_v55 = vpop.permute.xlu1 %1397  ;;  %v2797_v20 = vpack.c.bf16 %v2761_v40, %v2759_v10  ;;  %v2796_v23 = vpack.c.bf16 %v2760_v48, %v2758_v8  ;;  %v5579_v48 = vld [vmem:[#allocation16_spill] sm:$0xff]  ;;  %v5581_v40 = vld [vmem:[#allocation15_spill] sm:$0xff] }
 0x825   :  { %v1495_v24 = vadd.f32 %v5571_v33, %v1398_v55  ;;  %v1497_v27 = vadd.f32 %v5572_v12, %v1398_v55  ;;  %v1393_v25 = vpop.permute.xlu0 %1392  ;;  %v2702_v15 = vmul.f32 %v3729_v18, %v2670_v26  ;;  %v5580_v10 = vld [vmem:[#allocation28_spill] sm:$0xff] }
 0x826   :  { %v2671_v49 = vsub.f32 2.0, %v2639_v58  ;;  %v1489_v36 = vadd.f32 %v5573_v39, %v1393_v25  ;;  %v1491_v41 = vadd.f32 %v5574_v1, %v1393_v25  ;;  %2828 = vmatprep.subr.bf16.mxu0 %v2797_v20  ;;  %v2855_v12 = vld [vmem:[#allocation6] sm:$0xff]  ;;  %v2856_v25 = vld [vmem:[#allocation6 + $0x8] sm:$0xff] }
 0x827   :  { %v1514_v37 = vmul.f32 %v5284_v54, %v1495_v24  ;;  %v1515_v59 = vmul.f32 %v5284_v54, %v1497_v27  ;;  %v2762_v35 = vmul.f32 %v5196_v9, %v2702_v15  ;;  %v2763_v16 = vmul.f32 %v5198_v42, %v2702_v15  ;;  %v5577_v9 = vld [vmem:[#allocation25_spill] sm:$0xff]  ;;  %v2857_v15 = vld [vmem:[#allocation6 + $0x10] sm:$0xff] }
 0x828   :  { %v3733_v17 = vpop.eup %3732  ;;  %v2703_v11 = vmul.f32 %v3731_v63, %v2671_v49  ;;  %v1512_v6 = vmul.f32 %v5284_v54, %v1489_v36  ;;  %v1513_v34 = vmul.f32 %v5284_v54, %v1491_v41  ;;  %2829 = vmatpush1.bf16.xpose.msra.mxu0 %v2796_v23  ;;  %v1403_v53 = vpop.permute.xlu1 %1402  ;;  %v5582_v27 = vmov 0.0   ;;  %v2858_v49 = vld [vmem:[#allocation6 + $0x18] sm:$0xff] }
 0x829   :  { %v2640_v0 = vmul.f32 %v3733_v17, %v2574_v44  ;;  %1522 = vst [vmem:[#allocation8 + $0x10] sm:$0xff] %v1514_v37  ;;  %1523 = vst [vmem:[#allocation8 + $0x18] sm:$0xff] %v1515_v59  ;;  %v1501_v22 = vadd.f32 %v5575_v30, %v1403_v53  ;;  %v1503_v56 = vadd.f32 %v5576_v29, %v1403_v53 }
 0x82a   :  { %v2764_v43 = vmul.f32 %v5202_v60, %v2703_v11  ;;  %1520 = vst [vmem:[#allocation8] sm:$0xff] %v1512_v6  ;;  %1521 = vst [vmem:[#allocation8 + $0x8] sm:$0xff] %v1513_v34  ;;  %v2765_v45 = vmul.f32 %v5205_v21, %v2703_v11 }
 0x82b   :  { %v3735_v3 = vpop.eup %3734  ;;  %v2672_v31 = vsub.f32 2.0, %v2640_v0  ;;  %v1516_v57 = vmul.f32 %v5284_v54, %v1501_v22  ;;  %v1517_v52 = vmul.f32 %v5284_v54, %v1503_v56 }
 0x82c   :  { %v2641_v28 = vmul.f32 %v3735_v3, %v2577_v4  ;;  %v1408_v38 = vpop.permute.xlu1 %1407  ;;  %v2799_v47 = vpack.c.bf16 %v2765_v45, %v2763_v16  ;;  %v2798_v13 = vpack.c.bf16 %v2764_v43, %v2762_v35 }
 0x82d   :  { %1524 = vst [vmem:[#allocation8 + $0x20] sm:$0xff] %v1516_v57  ;;  %1525 = vst [vmem:[#allocation8 + $0x28] sm:$0xff] %v1517_v52  ;;  %v1507_v60 = vadd.f32 %v5577_v9, %v1408_v38  ;;  %v1509_v44 = vadd.f32 %v5578_v32, %v1408_v38  ;;  %v2704_v2 = vmul.f32 %v3733_v17, %v2672_v31 }
 0x82e   :  { %v2673_v42 = vsub.f32 2.0, %v2641_v28  ;;  %2830 = vmatprep.subr.bf16.mxu0 %v2799_v47 }
 0x82f   :  { %v1518_v21 = vmul.f32 %v5284_v54, %v1507_v60  ;;  %v1519_v51 = vmul.f32 %v5284_v54, %v1509_v44  ;;  %v2766_v5 = vmul.f32 %v5213_v7, %v2704_v2  ;;  %v2767_v14 = vmul.f32 %v5215_v19, %v2704_v2 }
 0x830   :  { %v2705_v46 = vmul.f32 %v3735_v3, %v2673_v42  ;;  %2831 = vmatpush1.bf16.xpose.msra.mxu0 %v2798_v13  ;;  %v2866_v39 = vpop.permute.xlu1 %2865 }
 0x831   :  { %1526 = vst [vmem:[#allocation8 + $0x30] sm:$0xff] %v1518_v21  ;;  %1527 = vst [vmem:[#allocation8 + $0x38] sm:$0xff] %v1519_v51 }
 0x832   :  { %v2768_v18 = vmul.f32 %v5219_v61, %v2705_v46  ;;  %v2769_v4 = vmul.f32 %v5221_v50, %v2705_v46 }
 0x834   :  { %v2801_v62 = vpack.c.bf16 %v2769_v4, %v2767_v14  ;;  %v2800_v8 = vpack.c.bf16 %v2768_v18, %v2766_v5  ;;  %v2871_v36 = vpop.permute.xlu1 %2870 }
 0x836   :  { %2832 = vmatprep.subr.bf16.mxu0 %v2801_v62 }
 0x838   :  { %2833 = vmatpush1.bf16.xpose.msra.mxu0 %v2800_v8  ;;  %v2876_v30 = vpop.permute.xlu1 %2875 }
 0x83c   :  { %v2881_v57 = vpop.permute.xlu1 %2880 }
 0x83f   :  { %2835 = vmatmul.mubr.bf16.vlgmr.msra.gmra.mrb[72].mxu0 %v5579_v48 }
 0x840   :  { %2844 = vmatprep.mubr.bf16.mxu0 %v5580_v10 }
 0x847   :  { %2845 = vmatmul.mubr.bf16.gmra.mrb[76].mxu0 %v5581_v40 }
 0x912   :  { %v2836_v63 = vpop.f32.mrb[72].mxu0 }
 0x913   :  { %v2838_v26 = vpop.f32.mrb[73].mxu0 }
 0x914   :  { %v2840_v58 = vpop.f32.mrb[74].mxu0 }
 0x915   :  { %v3335_v7 = vpack.c.bf16 %v2840_v58, %v2836_v63  ;;  %v2842_v55 = vpop.f32.mrb[75].mxu0 }
 0x916   :  { %v3333_v61 = vpack.c.bf16 %v2842_v55, %v2838_v26 }
 0x918   :  { %3334 = vmatprep.subr.bf16.mxu1 %v3333_v61 }
 0x919   :  { %3336 = vmatpush1.bf16.msra.mxu1 %v3335_v7 }
 0x91a   :  { %v2846_v19 = vpop.f32.mrb[76].mxu0 }
 0x91b   :  { %v2848_v50 = vpop.f32.mrb[77].mxu0 }
 0x91c   :  { %v2850_v20 = vpop.f32.mrb[78].mxu0 }
 0x91d   :  { %v3339_v23 = vpack.c.bf16 %v2850_v20, %v2846_v19  ;;  %v2852_v33 = vpop.f32.mrb[79].mxu0 }
 0x91e   :  { %v3337_v24 = vpack.c.bf16 %v2852_v33, %v2848_v50 }
 0x920   :  { %3338 = vmatprep.subr.bf16.mxu1 %v3337_v24 }
 0x921   :  { %3340 = vmatpush1.bf16.msra.mxu1 %v3339_v23 }
 0x924   :  { %3121 = vmatmul.mubr.msk.f32.vlgmr.msra.gmra.mrb[136].mxu1 %vm142_vm0, %v2855_v12 }
 0x925   :  { %2965 = vmatprep.mubr.f32.mxu1 %v5582_v27 }
 0x928   :  { %3122 = vmatmul.mubr.msk.f32.gmra.mrb[138].mxu1 %vm142_vm0, %v2856_v25 }
 0x929   :  { %2971 = vmatprep.mubr.f32.mxu1 %v5582_v27 }
 0x92c   :  { %3123 = vmatmul.mubr.msk.f32.gmra.mrb[140].mxu1 %vm142_vm0, %v2857_v15 }
 0x92d   :  { %2977 = vmatprep.mubr.f32.mxu1 %v5582_v27 }
 0x930   :  { %3124 = vmatmul.mubr.msk.f32.gmra.mrb[142].mxu1 %vm142_vm0, %v2858_v49 }
 0x9f7   :  { %v2961_v1 = vpop.f32.mrb[136].mxu1 }
 0x9f8   :  { %v2962_v41 = vadd.f32 %v2961_v1, %v2866_v39  ;;  %v2963_v37 = vpop.f32.mrb[137].mxu1 }
 0x9f9   :  { %v2964_v59 = vadd.f32 %v2963_v37, %v2866_v39 }
 0x9fa   :  { %v2984_v17 = vmul.f32 %v2962_v41, %v5284_v54 }
 0x9fb   :  { %v2985_v11 = vmul.f32 %v2964_v59, %v5284_v54  ;;  %v2967_v6 = vpop.f32.mrb[138].mxu1 }
 0x9fc   :  { %2993 = vst [vmem:[#allocation8 + $0x40] sm:$0xff] %v2984_v17  ;;  %v2968_v34 = vadd.f32 %v2967_v6, %v2871_v36  ;;  %v2969_v53 = vpop.f32.mrb[139].mxu1 }
 0x9fd   :  { %2994 = vst [vmem:[#allocation8 + $0x48] sm:$0xff] %v2985_v11  ;;  %v2970_v0 = vadd.f32 %v2969_v53, %v2871_v36 }
 0x9fe   :  { %v2986_v22 = vmul.f32 %v2968_v34, %v5284_v54 }
 0x9ff   :  { %v2987_v29 = vmul.f32 %v2970_v0, %v5284_v54  ;;  %v2973_v56 = vpop.f32.mrb[140].mxu1 }
 0xa00   :  { %2995 = vst [vmem:[#allocation8 + $0x50] sm:$0xff] %v2986_v22  ;;  %v2974_v35 = vadd.f32 %v2973_v56, %v2876_v30  ;;  %v2975_v43 = vpop.f32.mrb[141].mxu1 }
 0xa01   :  { %2996 = vst [vmem:[#allocation8 + $0x58] sm:$0xff] %v2987_v29  ;;  %v2976_v16 = vadd.f32 %v2975_v43, %v2876_v30 }
 0xa02   :  { %v2988_v45 = vmul.f32 %v2974_v35, %v5284_v54 }
 0xa03   :  { %v2989_v3 = vmul.f32 %v2976_v16, %v5284_v54  ;;  %v2979_v31 = vpop.f32.mrb[142].mxu1 }
 0xa04   :  { %2997 = vst [vmem:[#allocation8 + $0x60] sm:$0xff] %v2988_v45  ;;  %v2981_v52 = vpop.f32.mrb[143].mxu1  ;;  %v2980_v28 = vadd.f32 %v2979_v31, %v2881_v57 }
 0xa05   :  { %2998 = vst [vmem:[#allocation8 + $0x68] sm:$0xff] %v2989_v3  ;;  %v2982_v38 = vadd.f32 %v2981_v52, %v2881_v57 }
 0xa06   :  { %v2990_v47 = vmul.f32 %v2980_v28, %v5284_v54 }
 0xa07   :  { %v2991_v13 = vmul.f32 %v2982_v38, %v5284_v54 }
 0xa08   :  { %2999 = vst [vmem:[#allocation8 + $0x70] sm:$0xff] %v2990_v47 }
 0xa09   :  { %3000 = vst [vmem:[#allocation8 + $0x78] sm:$0xff] %v2991_v13 }
 0xa0a   :  { %3791 = shalt.err (!%p3788_p6)
}
 0xa0b   :  { %s3792_s30 = scalar_lea.hbm %s5349_s6, 2048 }
 0xa0c   :  { %p3793_p7 = scmp.ne.s32.totalorder %s5349_s6, %s3792_s30  ;;  %p3796_p8 = scmp.lt.u32.totalorder %s3792_s30, %s5349_s6 }
 0xa0e   :  { %p3798_p9 = pnand %p3796_p8, %p3793_p7 }
 0xa10   :  { %3801 = shalt.err (!%p3798_p9)
}
 0xa11   :  { %3012 = dma.vmem_to_hbm [thread:$0]  %s3007_s26, 2048, %s5349_s6, [#allocation5], %s3809_s7, %s3809_s7, %s3810_s8  }
 0xa12   :  { %3806 = dma.done.wait [#allocation5], 2048  }
 0xa13   :  { %3807 = vsyncadd [#allocation5], 4294965248 }
 0xa14   :  { %3016 = vsyncpa [#allocation4], 1 }
 0xa15   :  { %3017 = vsyncpa [#allocation7], 1 }
 0xa16   :  { %3018 = vsyncpa [#allocation5], 1 }

</bundles_post_ra>
